<compile_context>
chip_gen: v7x
topology: tpu7x:2x2x1
jax: 0.10.0
libtpu: 0.0.40
codegen_flags: <defaults>
</compile_context>

<pallas_src>
import math

import jax
import jax.numpy as jnp
from jax.experimental import pallas as pl
from jax.experimental.pallas import tpu as pltpu


def _ceil_to(x, m):
    return ((x + m - 1) // m) * m


# ---------------------------------------------------------------------------
# Pallas kernel: one CausalTransformerDecoderLayer applied to a block of windows
# ---------------------------------------------------------------------------
def make_layer_kernel(Nb, S, QL, chunk, C, H, n_pad, eps=1e-5):
    """Nb: windows per block; S: padded window length (mult of 8); QL: padded
    query length (mult of 8, >= chunk); n_pad: number of masked (zero) key rows
    prepended to every window."""
    hd = C // H
    scale = 1.0 / math.sqrt(hd)
    bf16 = jnp.bfloat16

    def mm(x, w_ref, b_ref=None):
        # Flat 2-D matmul: bf16 operands, f32 accumulation on the MXU.
        y = jnp.dot(x.astype(bf16), w_ref[...], preferred_element_type=jnp.float32)
        if b_ref is not None:
            y = y + b_ref[...]
        return y

    def layer_norm(x, w_ref, b_ref):
        mu = jnp.mean(x, axis=-1, keepdims=True)
        var = jnp.mean(jnp.square(x - mu), axis=-1, keepdims=True)
        return (x - mu) * jax.lax.rsqrt(var + eps) * w_ref[...] + b_ref[...]

    def kernel(tgt_ref, mem_ref,
               sa_w, sa_b, sa_ow, sa_ob,
               ca_wq, ca_bq, ca_wkv, ca_bkv, ca_ow, ca_ob,
               n1w, n1b, n2w, n2b,
               l1w, l1b, l2w, l2b,
               n3w, n3b,
               out_ref):
        # Per-head lane mask indices (heads are packed along the lane axis).
        lane = jax.lax.broadcasted_iota(jnp.int32, (1, 1, C), 2)
        if n_pad:
            kpos = jax.lax.broadcasted_iota(jnp.int32, (1, 1, S), 2)
            key_bias = jnp.where(kpos < n_pad, -1e30, 0.0).astype(jnp.float32)
        else:
            key_bias = None

        def attn_core(q3, k3, v3):
            # q3: [Nb, QL, C] f32;  k3 / v3: [Nb, S, C] f32 (heads along C).
            q3b = q3.astype(bf16)
            k3b = k3.astype(bf16)
            v3b = v3.astype(bf16)
            out = jnp.zeros((Nb, QL, C), jnp.float32)
            for h in range(H):
                hm = (lane >= h * hd) & (lane < (h + 1) * hd)
                qh = jnp.where(hm, q3b, 0.0)          # only head-h lanes contribute
                vh = jnp.where(hm, v3b, 0.0)          # head-h output lands in its lanes
                s = jnp.einsum('nqc,nkc->nqk', qh, k3b,
                               preferred_element_type=jnp.float32) * scale
                if key_bias is not None:
                    s = s + key_bias
                p = jnp.exp(s - jnp.max(s, axis=-1, keepdims=True))
                p = p * pl.reciprocal(jnp.sum(p, axis=-1, keepdims=True), approx=True)
                out = out + jnp.einsum('nqk,nkc->nqc', p.astype(bf16), vh,
                                       preferred_element_type=jnp.float32)
            return out.reshape(Nb * QL, C)            # tile-aligned merge (QL % 8 == 0)

        tgt2d = tgt_ref[...]                          # bf16 [Nb*S, C]
        mem2d = mem_ref[...]                          # bf16 [Nb*S, C]

        # ---- self attention: fused QKV projection over the whole window batch ----
        qkv = mm(tgt2d, sa_w, sa_b)                   # f32 [Nb*S, 3C]
        qkv3 = qkv.reshape(Nb, S, 3 * C)              # tile-aligned split (S % 8 == 0)
        q3 = qkv3[:, S - QL:, :C]                     # [Nb, QL, C]
        k3 = qkv3[:, :, C:2 * C]                      # [Nb, S, C]
        v3 = qkv3[:, :, 2 * C:]
        attn = mm(attn_core(q3, k3, v3), sa_ow, sa_ob)  # single output projection

        res = tgt2d.astype(jnp.float32).reshape(Nb, S, C)[:, S - QL:, :]
        res = res.reshape(Nb * QL, C)
        x = layer_norm(res + attn, n1w, n1b)          # [Nb*QL, C]

        # ---- cross attention over the memory window ----
        q = mm(x, ca_wq, ca_bq)                       # [Nb*QL, C]
        kv = mm(mem2d, ca_wkv, ca_bkv)                # [Nb*S, 2C]
        kv3 = kv.reshape(Nb, S, 2 * C)
        attn = attn_core(q.reshape(Nb, QL, C), kv3[:, :, :C], kv3[:, :, C:])
        attn = mm(attn, ca_ow, ca_ob)
        x = layer_norm(x + attn, n2w, n2b)

        # ---- feed forward (ReLU) ----
        h1 = jnp.maximum(mm(x, l1w, l1b), 0.0)
        x = layer_norm(x + mm(h1, l2w, l2b), n3w, n3b)

        # Keep only the real `chunk` query tokens of every window.
        x3 = x.reshape(Nb, QL, C)
        out_ref[...] = x3[:, QL - chunk:, :].astype(out_ref.dtype)

    return kernel


KERNEL_PARAM_KEYS = ('sa_w', 'sa_b', 'sa_ow', 'sa_ob',
                     'ca_wq', 'ca_bq', 'ca_wkv', 'ca_bkv', 'ca_ow', 'ca_ob',
                     'n1w', 'n1b', 'n2w', 'n2b',
                     'l1w', 'l1b', 'l2w', 'l2b',
                     'n3w', 'n3b')


def prepare_layer_params(p):
    """PyTorch-layout weights -> kernel layout: [in, out] transposed matmul
    weights in bf16 (MXU), biases / LayerNorm params in f32 (VPU)."""
    C = p['sa_ow'].shape[0]
    bf, f32 = jnp.bfloat16, jnp.float32
    return {
        'sa_w':  p['sa_w'].T.astype(bf),            # [C, 3C]
        'sa_b':  p['sa_b'].astype(f32),             # [1, 3C]
        'sa_ow': p['sa_ow'].T.astype(bf),           # [C, C]
        'sa_ob': p['sa_ob'].astype(f32),
        'ca_wq': p['ca_w'][:C, :].T.astype(bf),     # [C, C]
        'ca_bq': p['ca_b'][:, :C].astype(f32),
        'ca_wkv': p['ca_w'][C:, :].T.astype(bf),    # [C, 2C]
        'ca_bkv': p['ca_b'][:, C:].astype(f32),
        'ca_ow': p['ca_ow'].T.astype(bf),
        'ca_ob': p['ca_ob'].astype(f32),
        'n1w': p['n1w'].astype(f32), 'n1b': p['n1b'].astype(f32),
        'n2w': p['n2w'].astype(f32), 'n2b': p['n2b'].astype(f32),
        'l1w': p['l1w'].T.astype(bf), 'l1b': p['l1b'].astype(f32),
        'l2w': p['l2w'].T.astype(bf), 'l2b': p['l2b'].astype(f32),
        'n3w': p['n3w'].astype(f32), 'n3b': p['n3b'].astype(f32),
    }


def decoder_layer_apply(tgt_ctx, mem_ctx, kparams, chunk, nhead, block_n=128):
    """tgt_ctx/mem_ctx: [N, S, C] windows -> [N, chunk, C] (one decoder layer)."""
    N, S, C = tgt_ctx.shape
    S_pad = _ceil_to(S, 8)            # window length padded to the sublane tile
    QL = min(S_pad, _ceil_to(chunk, 8))  # query rows kept per window (>= chunk)
    n_pad = S_pad - S                 # masked zero key rows prepended per window

    block_n = max(1, min(block_n, _ceil_to(N, 8)))
    Np = _ceil_to(N, block_n)

    tgt_p = jnp.pad(tgt_ctx, ((0, Np - N), (n_pad, 0), (0, 0)))
    mem_p = jnp.pad(mem_ctx, ((0, Np - N), (n_pad, 0), (0, 0)))

    # Flat 2-D activation layout feeding the fused projections directly.
    tgt2d = tgt_p.reshape(Np * S_pad, C).astype(jnp.bfloat16)
    mem2d = mem_p.reshape(Np * S_pad, C).astype(jnp.bfloat16)

    weights = [kparams[k] for k in KERNEL_PARAM_KEYS]
    kernel = make_layer_kernel(block_n, S_pad, QL, chunk, C, nhead, n_pad)

    in_specs = [pl.BlockSpec((block_n * S_pad, C), lambda i: (i, 0)),
                pl.BlockSpec((block_n * S_pad, C), lambda i: (i, 0))]
    for w in weights:
        in_specs.append(pl.BlockSpec(w.shape, lambda i: (0, 0)))

    out = pl.pallas_call(
        kernel,
        out_shape=jax.ShapeDtypeStruct((Np, chunk, C), jnp.float32),
        grid=(Np // block_n,),
        in_specs=in_specs,
        out_specs=pl.BlockSpec((block_n, chunk, C), lambda i: (i, 0, 0)),
        compiler_params=pltpu.CompilerParams(
            dimension_semantics=("parallel",),
            vmem_limit_bytes=48 * 1024 * 1024),
    )(tgt2d, mem2d, *weights)
    return out[:N]


# ---------------------------------------------------------------------------
# Plain-JAX glue reproducing CausalTransformerDecoder.forward
# ---------------------------------------------------------------------------
def mod_pad_jax(x, chunk):
    T = x.shape[-1]
    mod = (-T) % chunk
    if mod:
        x = jnp.pad(x, ((0, 0), (0, 0), (0, mod)))
    return x, mod


def causal_unfold(x, ctx_len, chunk):
    # x: [B, ctx_len + T, C] -> [B * (T//chunk), ctx_len + chunk, C]
    B, Tt, C = x.shape
    T = Tt - ctx_len
    L = T // chunk
    idx = jnp.arange(L)[:, None] * chunk + jnp.arange(ctx_len + chunk)[None, :]
    w = x[:, idx, :]
    return w.reshape(B * L, ctx_len + chunk, C)


def positional_encoding(length, d_model):
    pos = jnp.arange(length, dtype=jnp.float32)[:, None]
    div = jnp.exp(jnp.arange(0, d_model, 2, dtype=jnp.float32)
                  * (-math.log(10000.0) / d_model))
    pe = jnp.zeros((length, d_model), jnp.float32)
    pe = pe.at[:, 0::2].set(jnp.sin(pos * div))
    pe = pe.at[:, 1::2].set(jnp.cos(pos * div))
    return pe


def causal_transformer_decoder_forward(tgt, mem, ctx_buf, layer_params, *,
                                       model_dim, ctx_len, chunk_size, nhead,
                                       use_pos_enc, block_n=128):
    mem, _ = mod_pad_jax(mem, chunk_size)
    tgt, mod = mod_pad_jax(tgt, chunk_size)
    B, C, T = tgt.shape
    tgt = jnp.transpose(tgt, (0, 2, 1))          # [B, T, C]
    mem = jnp.transpose(mem, (0, 2, 1))

    mem = jnp.concatenate([ctx_buf[:, 0], mem], axis=1)
    ctx_buf = ctx_buf.at[:, 0].set(mem[:, -ctx_len:])
    mem_ctx = causal_unfold(mem, ctx_len, chunk_size)

    pe = positional_encoding(ctx_len + chunk_size, model_dim)
    if use_pos_enc:
        mem_ctx = mem_ctx + pe[None]

    kparams = [prepare_layer_params(p) for p in layer_params]

    # TODO(synk): dropout inside TransformerDecoderLayer is identity (inference
    # semantics); the K=1000 micro-batching loop in the reference is host-side
    # memory management only and does not change the math.
    for i, kp in enumerate(kparams):
        tgt_full = jnp.concatenate([ctx_buf[:, i + 1], tgt], axis=1)
        ctx_buf = ctx_buf.at[:, i + 1].set(tgt_full[:, -ctx_len:])
        tgt_ctx = causal_unfold(tgt_full, ctx_len, chunk_size)
        if use_pos_enc and i == 0:
            tgt_ctx = tgt_ctx + pe[None]
        out = decoder_layer_apply(tgt_ctx, mem_ctx, kp, chunk_size, nhead,
                                  block_n=block_n)
        tgt = out.reshape(B, T, C)

    tgt = jnp.transpose(tgt, (0, 2, 1))          # [B, C, T]
    if mod:
        tgt = tgt[..., :-mod]
    return tgt, ctx_buf


forward_jit = jax.jit(
    causal_transformer_decoder_forward,
    static_argnames=('model_dim', 'ctx_len', 'chunk_size', 'nhead',
                     'use_pos_enc', 'block_n'))


# ---------------------------------------------------------------------------
# Deterministic parameter initialization (shapes match nn.TransformerDecoderLayer)
# ---------------------------------------------------------------------------
def init_layer_params(key, model_dim, ff_dim):
    C, F = model_dim, ff_dim
    ks = jax.random.split(key, 12)
    n = lambda k, s: jax.random.normal(k, s, jnp.float32) * 0.1
    return {
        'sa_w': n(ks[0], (3 * C, C)), 'sa_b': n(ks[1], (1, 3 * C)),
        'sa_ow': n(ks[2], (C, C)),    'sa_ob': n(ks[3], (1, C)),
        'ca_w': n(ks[4], (3 * C, C)), 'ca_b': n(ks[5], (1, 3 * C)),
        'ca_ow': n(ks[6], (C, C)),    'ca_ob': n(ks[7], (1, C)),
        'n1w': jnp.ones((1, C)),      'n1b': jnp.zeros((1, C)),
        'n2w': jnp.ones((1, C)),      'n2b': jnp.zeros((1, C)),
        'l1w': n(ks[8], (F, C)),      'l1b': n(ks[9], (1, F)),
        'l2w': n(ks[10], (C, F)),     'l2b': n(ks[11], (1, C)),
        'n3w': jnp.ones((1, C)),      'n3b': jnp.zeros((1, C)),
    }


if __name__ == "__main__":
    # Small-but-nontrivial configuration.
    B = 2
    model_dim = 32
    ctx_len = 8
    chunk_size = 4
    num_layers = 2
    nhead = 4
    ff_dim = 64
    use_pos_enc = True
    T = 14          # not a multiple of chunk_size -> exercises mod_pad path

    key = jax.random.PRNGKey(0)
    k_tgt, k_mem, k_params = jax.random.split(key, 3)

    tgt = jax.random.normal(k_tgt, (B, model_dim, T), jnp.float32)
    mem = jax.random.normal(k_mem, (B, model_dim, T), jnp.float32)
    # init_ctx_buf equivalent: zeros of [B, num_layers+1, ctx_len, model_dim]
    ctx_buf = jnp.zeros((B, num_layers + 1, ctx_len, model_dim), jnp.float32)

    layer_keys = jax.random.split(k_params, num_layers)
    layer_params = [init_layer_params(layer_keys[i], model_dim, ff_dim)
                    for i in range(num_layers)]

    out, new_ctx_buf = forward_jit(
        tgt, mem, ctx_buf, layer_params,
        model_dim=model_dim, ctx_len=ctx_len, chunk_size=chunk_size,
        nhead=nhead, use_pos_enc=use_pos_enc)

    out = jax.block_until_ready(out)
    new_ctx_buf = jax.block_until_ready(new_ctx_buf)

    assert out.shape == (B, model_dim, T), out.shape
    assert new_ctx_buf.shape == ctx_buf.shape
    assert bool(jnp.all(jnp.isfinite(out)))
    print("KERNEL_OK")
</pallas_src>

<mosaic_0001>
module attributes {stable_mosaic.version = 11 : i64} {
  func.func @kernel(%arg0: i32, %arg1: memref<128x32xbf16, #tpu.memory_space<vmem>>, %arg2: memref<128x32xbf16, #tpu.memory_space<vmem>>, %arg3: memref<32x96xbf16, #tpu.memory_space<vmem>>, %arg4: memref<1x96xf32, #tpu.memory_space<vmem>>, %arg5: memref<32x32xbf16, #tpu.memory_space<vmem>>, %arg6: memref<1x32xf32, #tpu.memory_space<vmem>>, %arg7: memref<32x32xbf16, #tpu.memory_space<vmem>>, %arg8: memref<1x32xf32, #tpu.memory_space<vmem>>, %arg9: memref<32x64xbf16, #tpu.memory_space<vmem>>, %arg10: memref<1x64xf32, #tpu.memory_space<vmem>>, %arg11: memref<32x32xbf16, #tpu.memory_space<vmem>>, %arg12: memref<1x32xf32, #tpu.memory_space<vmem>>, %arg13: memref<1x32xf32, #tpu.memory_space<vmem>>, %arg14: memref<1x32xf32, #tpu.memory_space<vmem>>, %arg15: memref<1x32xf32, #tpu.memory_space<vmem>>, %arg16: memref<1x32xf32, #tpu.memory_space<vmem>>, %arg17: memref<32x64xbf16, #tpu.memory_space<vmem>>, %arg18: memref<1x64xf32, #tpu.memory_space<vmem>>, %arg19: memref<64x32xbf16, #tpu.memory_space<vmem>>, %arg20: memref<1x32xf32, #tpu.memory_space<vmem>>, %arg21: memref<1x32xf32, #tpu.memory_space<vmem>>, %arg22: memref<1x32xf32, #tpu.memory_space<vmem>>, %arg23: memref<8x4x32xf32, #tpu.memory_space<vmem>>) attributes {dimension_semantics = [#tpu.dimension_semantics<parallel>], iteration_bounds = array<i64: 1>, scalar_prefetch = 0 : i64, scratch_operands = 0 : i64, tpu.core_type = #tpu.core_type<tc>, window_params = [{transform_indices = @transform_0, window_bounds = array<i64: 128, 32>}, {transform_indices = @transform_1, window_bounds = array<i64: 128, 32>}, {pipeline_mode = #tpu.pipeline_mode<synchronous>, transform_indices = @transform_2, window_bounds = array<i64: 32, 96>}, {pipeline_mode = #tpu.pipeline_mode<synchronous>, transform_indices = @transform_3, window_bounds = array<i64: 1, 96>}, {pipeline_mode = #tpu.pipeline_mode<synchronous>, transform_indices = @transform_4, window_bounds = array<i64: 32, 32>}, {pipeline_mode = #tpu.pipeline_mode<synchronous>, transform_indices = @transform_5, window_bounds = array<i64: 1, 32>}, {pipeline_mode = #tpu.pipeline_mode<synchronous>, transform_indices = @transform_6, window_bounds = array<i64: 32, 32>}, {pipeline_mode = #tpu.pipeline_mode<synchronous>, transform_indices = @transform_7, window_bounds = array<i64: 1, 32>}, {pipeline_mode = #tpu.pipeline_mode<synchronous>, transform_indices = @transform_8, window_bounds = array<i64: 32, 64>}, {pipeline_mode = #tpu.pipeline_mode<synchronous>, transform_indices = @transform_9, window_bounds = array<i64: 1, 64>}, {pipeline_mode = #tpu.pipeline_mode<synchronous>, transform_indices = @transform_10, window_bounds = array<i64: 32, 32>}, {pipeline_mode = #tpu.pipeline_mode<synchronous>, transform_indices = @transform_11, window_bounds = array<i64: 1, 32>}, {pipeline_mode = #tpu.pipeline_mode<synchronous>, transform_indices = @transform_12, window_bounds = array<i64: 1, 32>}, {pipeline_mode = #tpu.pipeline_mode<synchronous>, transform_indices = @transform_13, window_bounds = array<i64: 1, 32>}, {pipeline_mode = #tpu.pipeline_mode<synchronous>, transform_indices = @transform_14, window_bounds = array<i64: 1, 32>}, {pipeline_mode = #tpu.pipeline_mode<synchronous>, transform_indices = @transform_15, window_bounds = array<i64: 1, 32>}, {pipeline_mode = #tpu.pipeline_mode<synchronous>, transform_indices = @transform_16, window_bounds = array<i64: 32, 64>}, {pipeline_mode = #tpu.pipeline_mode<synchronous>, transform_indices = @transform_17, window_bounds = array<i64: 1, 64>}, {pipeline_mode = #tpu.pipeline_mode<synchronous>, transform_indices = @transform_18, window_bounds = array<i64: 64, 32>}, {pipeline_mode = #tpu.pipeline_mode<synchronous>, transform_indices = @transform_19, window_bounds = array<i64: 1, 32>}, {pipeline_mode = #tpu.pipeline_mode<synchronous>, transform_indices = @transform_20, window_bounds = array<i64: 1, 32>}, {pipeline_mode = #tpu.pipeline_mode<synchronous>, transform_indices = @transform_21, window_bounds = array<i64: 1, 32>}, {transform_indices = @transform_22, window_bounds = array<i64: 8, 4, 32>}]} {
    %0 = tpu.iota {dimensions = array<i32: 2>} : vector<1x1x32xi32>
    %1 = tpu.iota {dimensions = array<i32: 2>} : vector<1x1x16xi32>
    %c4_i32 = arith.constant 4 : i32
    %2 = vector.broadcast %c4_i32 : i32 to vector<1x1x16xi32>
    %3 = arith.cmpi slt, %1, %2 : vector<1x1x16xi32>
    %cst = arith.constant -1.000000e+30 : f32
    %cst_0 = arith.constant 0.000000e+00 : f32
    %4 = vector.broadcast %cst : f32 to vector<1x1x16xf32>
    %5 = vector.broadcast %cst_0 : f32 to vector<1x1x16xf32>
    %6 = arith.select %3, %4, %5 : vector<1x1x16xi1>, vector<1x1x16xf32>
    %c0 = arith.constant 0 : index
    %c0_1 = arith.constant 0 : index
    %7 = vector.load %arg1[%c0, %c0_1] : memref<128x32xbf16, #tpu.memory_space<vmem>>, vector<128x32xbf16>
    %c0_2 = arith.constant 0 : index
    %c0_3 = arith.constant 0 : index
    %8 = vector.load %arg2[%c0_2, %c0_3] : memref<128x32xbf16, #tpu.memory_space<vmem>>, vector<128x32xbf16>
    %c0_4 = arith.constant 0 : index
    %c0_5 = arith.constant 0 : index
    %9 = vector.load %arg3[%c0_4, %c0_5] : memref<32x96xbf16, #tpu.memory_space<vmem>>, vector<32x96xbf16>
    %cst_6 = arith.constant dense<0.000000e+00> : vector<128x96xf32>
    %10 = tpu.matmul %7, %9, %cst_6 {dimension_numbers = #tpu.dot_dimension_numbers<[1], [0], [0], [1], [0, 0, 1, 1], [], []>} : vector<128x32xbf16>, vector<32x96xbf16>, vector<128x96xf32> -> vector<128x96xf32>
    %c0_7 = arith.constant 0 : index
    %c0_8 = arith.constant 0 : index
    %11 = vector.load %arg4[%c0_7, %c0_8] : memref<1x96xf32, #tpu.memory_space<vmem>>, vector<1x96xf32>
    %12 = vector.broadcast %11 : vector<1x96xf32> to vector<128x96xf32>
    %13 = arith.addf %10, %12 : vector<128x96xf32>
    %14 = vector.shape_cast %13 : vector<128x96xf32> to vector<8x16x96xf32>
    %15 = vector.extract_strided_slice %14 {offsets = [0, 8, 0], sizes = [8, 8, 32], strides = [1, 1, 1]} : vector<8x16x96xf32> to vector<8x8x32xf32>
    %16 = vector.extract_strided_slice %14 {offsets = [0, 0, 32], sizes = [8, 16, 32], strides = [1, 1, 1]} : vector<8x16x96xf32> to vector<8x16x32xf32>
    %17 = vector.extract_strided_slice %14 {offsets = [0, 0, 64], sizes = [8, 16, 32], strides = [1, 1, 1]} : vector<8x16x96xf32> to vector<8x16x32xf32>
    %18 = arith.truncf %15 : vector<8x8x32xf32> to vector<8x8x32xbf16>
    %19 = arith.truncf %16 : vector<8x16x32xf32> to vector<8x16x32xbf16>
    %20 = arith.truncf %17 : vector<8x16x32xf32> to vector<8x16x32xbf16>
    %cst_9 = arith.constant 0.000000e+00 : f32
    %21 = vector.broadcast %cst_9 : f32 to vector<8x8x32xf32>
    %c0_i32 = arith.constant 0 : i32
    %22 = vector.broadcast %c0_i32 : i32 to vector<1x1x32xi32>
    %23 = arith.cmpi sge, %0, %22 : vector<1x1x32xi32>
    %c8_i32 = arith.constant 8 : i32
    %24 = vector.broadcast %c8_i32 : i32 to vector<1x1x32xi32>
    %25 = arith.cmpi slt, %0, %24 : vector<1x1x32xi32>
    %26 = arith.andi %23, %25 : vector<1x1x32xi1>
    %cst_10 = arith.constant 0.000000e+00 : f32
    %27 = arith.truncf %cst_10 : f32 to bf16
    %28 = vector.shape_cast %26 : vector<1x1x32xi1> to vector<1x1x32xi1>
    %29 = vector.broadcast %28 : vector<1x1x32xi1> to vector<8x8x32xi1>
    %30 = vector.broadcast %27 : bf16 to vector<8x8x32xbf16>
    %31 = arith.select %29, %18, %30 : vector<8x8x32xi1>, vector<8x8x32xbf16>
    %cst_11 = arith.constant 0.000000e+00 : f32
    %32 = arith.truncf %cst_11 : f32 to bf16
    %33 = vector.shape_cast %26 : vector<1x1x32xi1> to vector<1x1x32xi1>
    %34 = vector.broadcast %33 : vector<1x1x32xi1> to vector<8x16x32xi1>
    %35 = vector.broadcast %32 : bf16 to vector<8x16x32xbf16>
    %36 = arith.select %34, %20, %35 : vector<8x16x32xi1>, vector<8x16x32xbf16>
    "tpu.trace_start"() <{level = 10 : i32, message = "nqc,nkc->nqk"}> : () -> ()
    %cst_12 = arith.constant dense<0.000000e+00> : vector<8x8x16xf32>
    %37 = tpu.matmul %31, %19, %cst_12 {dimension_numbers = #tpu.dot_dimension_numbers<[2], [2], [1], [1], [0, 0, 0, 1, 1, 1], [0], [0]>} : vector<8x8x32xbf16>, vector<8x16x32xbf16>, vector<8x8x16xf32> -> vector<8x8x16xf32>
    "tpu.trace_stop"() : () -> ()
    %cst_13 = arith.constant 0.353553385 : f32
    %38 = vector.broadcast %cst_13 : f32 to vector<8x8x16xf32>
    %39 = arith.mulf %37, %38 : vector<8x8x16xf32>
    %40 = vector.broadcast %6 : vector<1x1x16xf32> to vector<8x8x16xf32>
    %41 = arith.addf %39, %40 : vector<8x8x16xf32>
    %cst_14 = arith.constant dense<0xFF800000> : vector<8x8xf32>
    %42 = vector.multi_reduction <maximumf>, %41, %cst_14 [2] : vector<8x8x16xf32> to vector<8x8xf32>
    %43 = vector.shape_cast %42 : vector<8x8xf32> to vector<8x8x1xf32>
    %44 = vector.broadcast %43 : vector<8x8x1xf32> to vector<8x8x16xf32>
    %45 = arith.subf %41, %44 : vector<8x8x16xf32>
    %46 = math.exp %45 : vector<8x8x16xf32>
    %cst_15 = arith.constant dense<0.000000e+00> : vector<8x8xf32>
    %47 = vector.multi_reduction <add>, %46, %cst_15 [2] : vector<8x8x16xf32> to vector<8x8xf32>
    %48 = vector.shape_cast %47 : vector<8x8xf32> to vector<8x8x1xf32>
    %49 = tpu.reciprocal %48 {approx = true} : vector<8x8x1xf32> -> vector<8x8x1xf32>
    %50 = vector.broadcast %49 : vector<8x8x1xf32> to vector<8x8x16xf32>
    %51 = arith.mulf %46, %50 : vector<8x8x16xf32>
    %52 = arith.truncf %51 : vector<8x8x16xf32> to vector<8x8x16xbf16>
    "tpu.trace_start"() <{level = 10 : i32, message = "nqk,nkc->nqc"}> : () -> ()
    %cst_16 = arith.constant dense<0.000000e+00> : vector<8x8x32xf32>
    %53 = tpu.matmul %52, %36, %cst_16 {dimension_numbers = #tpu.dot_dimension_numbers<[2], [1], [1], [2], [0, 0, 0, 1, 1, 2], [0], [0]>} : vector<8x8x16xbf16>, vector<8x16x32xbf16>, vector<8x8x32xf32> -> vector<8x8x32xf32>
    "tpu.trace_stop"() : () -> ()
    %54 = arith.addf %21, %53 : vector<8x8x32xf32>
    %c8_i32_17 = arith.constant 8 : i32
    %55 = vector.broadcast %c8_i32_17 : i32 to vector<1x1x32xi32>
    %56 = arith.cmpi sge, %0, %55 : vector<1x1x32xi32>
    %c16_i32 = arith.constant 16 : i32
    %57 = vector.broadcast %c16_i32 : i32 to vector<1x1x32xi32>
    %58 = arith.cmpi slt, %0, %57 : vector<1x1x32xi32>
    %59 = arith.andi %56, %58 : vector<1x1x32xi1>
    %cst_18 = arith.constant 0.000000e+00 : f32
    %60 = arith.truncf %cst_18 : f32 to bf16
    %61 = vector.shape_cast %59 : vector<1x1x32xi1> to vector<1x1x32xi1>
    %62 = vector.broadcast %61 : vector<1x1x32xi1> to vector<8x8x32xi1>
    %63 = vector.broadcast %60 : bf16 to vector<8x8x32xbf16>
    %64 = arith.select %62, %18, %63 : vector<8x8x32xi1>, vector<8x8x32xbf16>
    %cst_19 = arith.constant 0.000000e+00 : f32
    %65 = arith.truncf %cst_19 : f32 to bf16
    %66 = vector.shape_cast %59 : vector<1x1x32xi1> to vector<1x1x32xi1>
    %67 = vector.broadcast %66 : vector<1x1x32xi1> to vector<8x16x32xi1>
    %68 = vector.broadcast %65 : bf16 to vector<8x16x32xbf16>
    %69 = arith.select %67, %20, %68 : vector<8x16x32xi1>, vector<8x16x32xbf16>
    "tpu.trace_start"() <{level = 10 : i32, message = "nqc,nkc->nqk"}> : () -> ()
    %cst_20 = arith.constant dense<0.000000e+00> : vector<8x8x16xf32>
    %70 = tpu.matmul %64, %19, %cst_20 {dimension_numbers = #tpu.dot_dimension_numbers<[2], [2], [1], [1], [0, 0, 0, 1, 1, 1], [0], [0]>} : vector<8x8x32xbf16>, vector<8x16x32xbf16>, vector<8x8x16xf32> -> vector<8x8x16xf32>
    "tpu.trace_stop"() : () -> ()
    %cst_21 = arith.constant 0.353553385 : f32
    %71 = vector.broadcast %cst_21 : f32 to vector<8x8x16xf32>
    %72 = arith.mulf %70, %71 : vector<8x8x16xf32>
    %73 = vector.broadcast %6 : vector<1x1x16xf32> to vector<8x8x16xf32>
    %74 = arith.addf %72, %73 : vector<8x8x16xf32>
    %cst_22 = arith.constant dense<0xFF800000> : vector<8x8xf32>
    %75 = vector.multi_reduction <maximumf>, %74, %cst_22 [2] : vector<8x8x16xf32> to vector<8x8xf32>
    %76 = vector.shape_cast %75 : vector<8x8xf32> to vector<8x8x1xf32>
    %77 = vector.broadcast %76 : vector<8x8x1xf32> to vector<8x8x16xf32>
    %78 = arith.subf %74, %77 : vector<8x8x16xf32>
    %79 = math.exp %78 : vector<8x8x16xf32>
    %cst_23 = arith.constant dense<0.000000e+00> : vector<8x8xf32>
    %80 = vector.multi_reduction <add>, %79, %cst_23 [2] : vector<8x8x16xf32> to vector<8x8xf32>
    %81 = vector.shape_cast %80 : vector<8x8xf32> to vector<8x8x1xf32>
    %82 = tpu.reciprocal %81 {approx = true} : vector<8x8x1xf32> -> vector<8x8x1xf32>
    %83 = vector.broadcast %82 : vector<8x8x1xf32> to vector<8x8x16xf32>
    %84 = arith.mulf %79, %83 : vector<8x8x16xf32>
    %85 = arith.truncf %84 : vector<8x8x16xf32> to vector<8x8x16xbf16>
    "tpu.trace_start"() <{level = 10 : i32, message = "nqk,nkc->nqc"}> : () -> ()
    %cst_24 = arith.constant dense<0.000000e+00> : vector<8x8x32xf32>
    %86 = tpu.matmul %85, %69, %cst_24 {dimension_numbers = #tpu.dot_dimension_numbers<[2], [1], [1], [2], [0, 0, 0, 1, 1, 2], [0], [0]>} : vector<8x8x16xbf16>, vector<8x16x32xbf16>, vector<8x8x32xf32> -> vector<8x8x32xf32>
    "tpu.trace_stop"() : () -> ()
    %87 = arith.addf %54, %86 : vector<8x8x32xf32>
    %c16_i32_25 = arith.constant 16 : i32
    %88 = vector.broadcast %c16_i32_25 : i32 to vector<1x1x32xi32>
    %89 = arith.cmpi sge, %0, %88 : vector<1x1x32xi32>
    %c24_i32 = arith.constant 24 : i32
    %90 = vector.broadcast %c24_i32 : i32 to vector<1x1x32xi32>
    %91 = arith.cmpi slt, %0, %90 : vector<1x1x32xi32>
    %92 = arith.andi %89, %91 : vector<1x1x32xi1>
    %cst_26 = arith.constant 0.000000e+00 : f32
    %93 = arith.truncf %cst_26 : f32 to bf16
    %94 = vector.shape_cast %92 : vector<1x1x32xi1> to vector<1x1x32xi1>
    %95 = vector.broadcast %94 : vector<1x1x32xi1> to vector<8x8x32xi1>
    %96 = vector.broadcast %93 : bf16 to vector<8x8x32xbf16>
    %97 = arith.select %95, %18, %96 : vector<8x8x32xi1>, vector<8x8x32xbf16>
    %cst_27 = arith.constant 0.000000e+00 : f32
    %98 = arith.truncf %cst_27 : f32 to bf16
    %99 = vector.shape_cast %92 : vector<1x1x32xi1> to vector<1x1x32xi1>
    %100 = vector.broadcast %99 : vector<1x1x32xi1> to vector<8x16x32xi1>
    %101 = vector.broadcast %98 : bf16 to vector<8x16x32xbf16>
    %102 = arith.select %100, %20, %101 : vector<8x16x32xi1>, vector<8x16x32xbf16>
    "tpu.trace_start"() <{level = 10 : i32, message = "nqc,nkc->nqk"}> : () -> ()
    %cst_28 = arith.constant dense<0.000000e+00> : vector<8x8x16xf32>
    %103 = tpu.matmul %97, %19, %cst_28 {dimension_numbers = #tpu.dot_dimension_numbers<[2], [2], [1], [1], [0, 0, 0, 1, 1, 1], [0], [0]>} : vector<8x8x32xbf16>, vector<8x16x32xbf16>, vector<8x8x16xf32> -> vector<8x8x16xf32>
    "tpu.trace_stop"() : () -> ()
    %cst_29 = arith.constant 0.353553385 : f32
    %104 = vector.broadcast %cst_29 : f32 to vector<8x8x16xf32>
    %105 = arith.mulf %103, %104 : vector<8x8x16xf32>
    %106 = vector.broadcast %6 : vector<1x1x16xf32> to vector<8x8x16xf32>
    %107 = arith.addf %105, %106 : vector<8x8x16xf32>
    %cst_30 = arith.constant dense<0xFF800000> : vector<8x8xf32>
    %108 = vector.multi_reduction <maximumf>, %107, %cst_30 [2] : vector<8x8x16xf32> to vector<8x8xf32>
    %109 = vector.shape_cast %108 : vector<8x8xf32> to vector<8x8x1xf32>
    %110 = vector.broadcast %109 : vector<8x8x1xf32> to vector<8x8x16xf32>
    %111 = arith.subf %107, %110 : vector<8x8x16xf32>
    %112 = math.exp %111 : vector<8x8x16xf32>
    %cst_31 = arith.constant dense<0.000000e+00> : vector<8x8xf32>
    %113 = vector.multi_reduction <add>, %112, %cst_31 [2] : vector<8x8x16xf32> to vector<8x8xf32>
    %114 = vector.shape_cast %113 : vector<8x8xf32> to vector<8x8x1xf32>
    %115 = tpu.reciprocal %114 {approx = true} : vector<8x8x1xf32> -> vector<8x8x1xf32>
    %116 = vector.broadcast %115 : vector<8x8x1xf32> to vector<8x8x16xf32>
    %117 = arith.mulf %112, %116 : vector<8x8x16xf32>
    %118 = arith.truncf %117 : vector<8x8x16xf32> to vector<8x8x16xbf16>
    "tpu.trace_start"() <{level = 10 : i32, message = "nqk,nkc->nqc"}> : () -> ()
    %cst_32 = arith.constant dense<0.000000e+00> : vector<8x8x32xf32>
    %119 = tpu.matmul %118, %102, %cst_32 {dimension_numbers = #tpu.dot_dimension_numbers<[2], [1], [1], [2], [0, 0, 0, 1, 1, 2], [0], [0]>} : vector<8x8x16xbf16>, vector<8x16x32xbf16>, vector<8x8x32xf32> -> vector<8x8x32xf32>
    "tpu.trace_stop"() : () -> ()
    %120 = arith.addf %87, %119 : vector<8x8x32xf32>
    %c24_i32_33 = arith.constant 24 : i32
    %121 = vector.broadcast %c24_i32_33 : i32 to vector<1x1x32xi32>
    %122 = arith.cmpi sge, %0, %121 : vector<1x1x32xi32>
    %c32_i32 = arith.constant 32 : i32
    %123 = vector.broadcast %c32_i32 : i32 to vector<1x1x32xi32>
    %124 = arith.cmpi slt, %0, %123 : vector<1x1x32xi32>
    %125 = arith.andi %122, %124 : vector<1x1x32xi1>
    %cst_34 = arith.constant 0.000000e+00 : f32
    %126 = arith.truncf %cst_34 : f32 to bf16
    %127 = vector.shape_cast %125 : vector<1x1x32xi1> to vector<1x1x32xi1>
    %128 = vector.broadcast %127 : vector<1x1x32xi1> to vector<8x8x32xi1>
    %129 = vector.broadcast %126 : bf16 to vector<8x8x32xbf16>
    %130 = arith.select %128, %18, %129 : vector<8x8x32xi1>, vector<8x8x32xbf16>
    %cst_35 = arith.constant 0.000000e+00 : f32
    %131 = arith.truncf %cst_35 : f32 to bf16
    %132 = vector.shape_cast %125 : vector<1x1x32xi1> to vector<1x1x32xi1>
    %133 = vector.broadcast %132 : vector<1x1x32xi1> to vector<8x16x32xi1>
    %134 = vector.broadcast %131 : bf16 to vector<8x16x32xbf16>
    %135 = arith.select %133, %20, %134 : vector<8x16x32xi1>, vector<8x16x32xbf16>
    "tpu.trace_start"() <{level = 10 : i32, message = "nqc,nkc->nqk"}> : () -> ()
    %cst_36 = arith.constant dense<0.000000e+00> : vector<8x8x16xf32>
    %136 = tpu.matmul %130, %19, %cst_36 {dimension_numbers = #tpu.dot_dimension_numbers<[2], [2], [1], [1], [0, 0, 0, 1, 1, 1], [0], [0]>} : vector<8x8x32xbf16>, vector<8x16x32xbf16>, vector<8x8x16xf32> -> vector<8x8x16xf32>
    "tpu.trace_stop"() : () -> ()
    %cst_37 = arith.constant 0.353553385 : f32
    %137 = vector.broadcast %cst_37 : f32 to vector<8x8x16xf32>
    %138 = arith.mulf %136, %137 : vector<8x8x16xf32>
    %139 = vector.broadcast %6 : vector<1x1x16xf32> to vector<8x8x16xf32>
    %140 = arith.addf %138, %139 : vector<8x8x16xf32>
    %cst_38 = arith.constant dense<0xFF800000> : vector<8x8xf32>
    %141 = vector.multi_reduction <maximumf>, %140, %cst_38 [2] : vector<8x8x16xf32> to vector<8x8xf32>
    %142 = vector.shape_cast %141 : vector<8x8xf32> to vector<8x8x1xf32>
    %143 = vector.broadcast %142 : vector<8x8x1xf32> to vector<8x8x16xf32>
    %144 = arith.subf %140, %143 : vector<8x8x16xf32>
    %145 = math.exp %144 : vector<8x8x16xf32>
    %cst_39 = arith.constant dense<0.000000e+00> : vector<8x8xf32>
    %146 = vector.multi_reduction <add>, %145, %cst_39 [2] : vector<8x8x16xf32> to vector<8x8xf32>
    %147 = vector.shape_cast %146 : vector<8x8xf32> to vector<8x8x1xf32>
    %148 = tpu.reciprocal %147 {approx = true} : vector<8x8x1xf32> -> vector<8x8x1xf32>
    %149 = vector.broadcast %148 : vector<8x8x1xf32> to vector<8x8x16xf32>
    %150 = arith.mulf %145, %149 : vector<8x8x16xf32>
    %151 = arith.truncf %150 : vector<8x8x16xf32> to vector<8x8x16xbf16>
    "tpu.trace_start"() <{level = 10 : i32, message = "nqk,nkc->nqc"}> : () -> ()
    %cst_40 = arith.constant dense<0.000000e+00> : vector<8x8x32xf32>
    %152 = tpu.matmul %151, %135, %cst_40 {dimension_numbers = #tpu.dot_dimension_numbers<[2], [1], [1], [2], [0, 0, 0, 1, 1, 2], [0], [0]>} : vector<8x8x16xbf16>, vector<8x16x32xbf16>, vector<8x8x32xf32> -> vector<8x8x32xf32>
    "tpu.trace_stop"() : () -> ()
    %153 = arith.addf %120, %152 : vector<8x8x32xf32>
    %154 = vector.shape_cast %153 : vector<8x8x32xf32> to vector<64x32xf32>
    %155 = arith.truncf %154 : vector<64x32xf32> to vector<64x32xbf16>
    %c0_41 = arith.constant 0 : index
    %c0_42 = arith.constant 0 : index
    %156 = vector.load %arg5[%c0_41, %c0_42] : memref<32x32xbf16, #tpu.memory_space<vmem>>, vector<32x32xbf16>
    %cst_43 = arith.constant dense<0.000000e+00> : vector<64x32xf32>
    %157 = tpu.matmul %155, %156, %cst_43 {dimension_numbers = #tpu.dot_dimension_numbers<[1], [0], [0], [1], [0, 0, 1, 1], [], []>} : vector<64x32xbf16>, vector<32x32xbf16>, vector<64x32xf32> -> vector<64x32xf32>
    %c0_44 = arith.constant 0 : index
    %c0_45 = arith.constant 0 : index
    %158 = vector.load %arg6[%c0_44, %c0_45] : memref<1x32xf32, #tpu.memory_space<vmem>>, vector<1x32xf32>
    %159 = vector.broadcast %158 : vector<1x32xf32> to vector<64x32xf32>
    %160 = arith.addf %157, %159 : vector<64x32xf32>
    %161 = arith.extf %7 : vector<128x32xbf16> to vector<128x32xf32>
    %162 = vector.shape_cast %161 : vector<128x32xf32> to vector<8x16x32xf32>
    %163 = vector.extract_strided_slice %162 {offsets = [0, 8, 0], sizes = [8, 8, 32], strides = [1, 1, 1]} : vector<8x16x32xf32> to vector<8x8x32xf32>
    %164 = vector.shape_cast %163 : vector<8x8x32xf32> to vector<64x32xf32>
    %165 = arith.addf %164, %160 : vector<64x32xf32>
    %cst_46 = arith.constant dense<0.000000e+00> : vector<64xf32>
    %166 = vector.multi_reduction <add>, %165, %cst_46 [1] : vector<64x32xf32> to vector<64xf32>
    %167 = vector.shape_cast %166 : vector<64xf32> to vector<64x1xf32>
    %cst_47 = arith.constant 3.200000e+01 : f32
    %168 = vector.broadcast %cst_47 : f32 to vector<64x1xf32>
    %169 = arith.divf %167, %168 : vector<64x1xf32>
    %170 = vector.broadcast %169 : vector<64x1xf32> to vector<64x32xf32>
    %171 = arith.subf %165, %170 : vector<64x32xf32>
    %172 = arith.mulf %171, %171 : vector<64x32xf32>
    %cst_48 = arith.constant dense<0.000000e+00> : vector<64xf32>
    %173 = vector.multi_reduction <add>, %172, %cst_48 [1] : vector<64x32xf32> to vector<64xf32>
    %174 = vector.shape_cast %173 : vector<64xf32> to vector<64x1xf32>
    %cst_49 = arith.constant 3.200000e+01 : f32
    %175 = vector.broadcast %cst_49 : f32 to vector<64x1xf32>
    %176 = arith.divf %174, %175 : vector<64x1xf32>
    %177 = vector.broadcast %169 : vector<64x1xf32> to vector<64x32xf32>
    %178 = arith.subf %165, %177 : vector<64x32xf32>
    %cst_50 = arith.constant 9.99999974E-6 : f32
    %179 = vector.broadcast %cst_50 : f32 to vector<64x1xf32>
    %180 = arith.addf %176, %179 : vector<64x1xf32>
    %181 = math.rsqrt %180 : vector<64x1xf32>
    %182 = vector.broadcast %181 : vector<64x1xf32> to vector<64x32xf32>
    %183 = arith.mulf %178, %182 : vector<64x32xf32>
    %c0_51 = arith.constant 0 : index
    %c0_52 = arith.constant 0 : index
    %184 = vector.load %arg13[%c0_51, %c0_52] : memref<1x32xf32, #tpu.memory_space<vmem>>, vector<1x32xf32>
    %185 = vector.broadcast %184 : vector<1x32xf32> to vector<64x32xf32>
    %186 = arith.mulf %183, %185 : vector<64x32xf32>
    %c0_53 = arith.constant 0 : index
    %c0_54 = arith.constant 0 : index
    %187 = vector.load %arg14[%c0_53, %c0_54] : memref<1x32xf32, #tpu.memory_space<vmem>>, vector<1x32xf32>
    %188 = vector.broadcast %187 : vector<1x32xf32> to vector<64x32xf32>
    %189 = arith.addf %186, %188 : vector<64x32xf32>
    %190 = arith.truncf %189 : vector<64x32xf32> to vector<64x32xbf16>
    %c0_55 = arith.constant 0 : index
    %c0_56 = arith.constant 0 : index
    %191 = vector.load %arg7[%c0_55, %c0_56] : memref<32x32xbf16, #tpu.memory_space<vmem>>, vector<32x32xbf16>
    %cst_57 = arith.constant dense<0.000000e+00> : vector<64x32xf32>
    %192 = tpu.matmul %190, %191, %cst_57 {dimension_numbers = #tpu.dot_dimension_numbers<[1], [0], [0], [1], [0, 0, 1, 1], [], []>} : vector<64x32xbf16>, vector<32x32xbf16>, vector<64x32xf32> -> vector<64x32xf32>
    %c0_58 = arith.constant 0 : index
    %c0_59 = arith.constant 0 : index
    %193 = vector.load %arg8[%c0_58, %c0_59] : memref<1x32xf32, #tpu.memory_space<vmem>>, vector<1x32xf32>
    %194 = vector.broadcast %193 : vector<1x32xf32> to vector<64x32xf32>
    %195 = arith.addf %192, %194 : vector<64x32xf32>
    %c0_60 = arith.constant 0 : index
    %c0_61 = arith.constant 0 : index
    %196 = vector.load %arg9[%c0_60, %c0_61] : memref<32x64xbf16, #tpu.memory_space<vmem>>, vector<32x64xbf16>
    %cst_62 = arith.constant dense<0.000000e+00> : vector<128x64xf32>
    %197 = tpu.matmul %8, %196, %cst_62 {dimension_numbers = #tpu.dot_dimension_numbers<[1], [0], [0], [1], [0, 0, 1, 1], [], []>} : vector<128x32xbf16>, vector<32x64xbf16>, vector<128x64xf32> -> vector<128x64xf32>
    %c0_63 = arith.constant 0 : index
    %c0_64 = arith.constant 0 : index
    %198 = vector.load %arg10[%c0_63, %c0_64] : memref<1x64xf32, #tpu.memory_space<vmem>>, vector<1x64xf32>
    %199 = vector.broadcast %198 : vector<1x64xf32> to vector<128x64xf32>
    %200 = arith.addf %197, %199 : vector<128x64xf32>
    %201 = vector.shape_cast %200 : vector<128x64xf32> to vector<8x16x64xf32>
    %202 = vector.shape_cast %195 : vector<64x32xf32> to vector<8x8x32xf32>
    %203 = vector.extract_strided_slice %201 {offsets = [0, 0, 0], sizes = [8, 16, 32], strides = [1, 1, 1]} : vector<8x16x64xf32> to vector<8x16x32xf32>
    %204 = vector.extract_strided_slice %201 {offsets = [0, 0, 32], sizes = [8, 16, 32], strides = [1, 1, 1]} : vector<8x16x64xf32> to vector<8x16x32xf32>
    %205 = arith.truncf %202 : vector<8x8x32xf32> to vector<8x8x32xbf16>
    %206 = arith.truncf %203 : vector<8x16x32xf32> to vector<8x16x32xbf16>
    %207 = arith.truncf %204 : vector<8x16x32xf32> to vector<8x16x32xbf16>
    %cst_65 = arith.constant 0.000000e+00 : f32
    %208 = vector.broadcast %cst_65 : f32 to vector<8x8x32xf32>
    %c0_i32_66 = arith.constant 0 : i32
    %209 = vector.broadcast %c0_i32_66 : i32 to vector<1x1x32xi32>
    %210 = arith.cmpi sge, %0, %209 : vector<1x1x32xi32>
    %c8_i32_67 = arith.constant 8 : i32
    %211 = vector.broadcast %c8_i32_67 : i32 to vector<1x1x32xi32>
    %212 = arith.cmpi slt, %0, %211 : vector<1x1x32xi32>
    %213 = arith.andi %210, %212 : vector<1x1x32xi1>
    %cst_68 = arith.constant 0.000000e+00 : f32
    %214 = arith.truncf %cst_68 : f32 to bf16
    %215 = vector.shape_cast %213 : vector<1x1x32xi1> to vector<1x1x32xi1>
    %216 = vector.broadcast %215 : vector<1x1x32xi1> to vector<8x8x32xi1>
    %217 = vector.broadcast %214 : bf16 to vector<8x8x32xbf16>
    %218 = arith.select %216, %205, %217 : vector<8x8x32xi1>, vector<8x8x32xbf16>
    %cst_69 = arith.constant 0.000000e+00 : f32
    %219 = arith.truncf %cst_69 : f32 to bf16
    %220 = vector.shape_cast %213 : vector<1x1x32xi1> to vector<1x1x32xi1>
    %221 = vector.broadcast %220 : vector<1x1x32xi1> to vector<8x16x32xi1>
    %222 = vector.broadcast %219 : bf16 to vector<8x16x32xbf16>
    %223 = arith.select %221, %207, %222 : vector<8x16x32xi1>, vector<8x16x32xbf16>
    "tpu.trace_start"() <{level = 10 : i32, message = "nqc,nkc->nqk"}> : () -> ()
    %cst_70 = arith.constant dense<0.000000e+00> : vector<8x8x16xf32>
    %224 = tpu.matmul %218, %206, %cst_70 {dimension_numbers = #tpu.dot_dimension_numbers<[2], [2], [1], [1], [0, 0, 0, 1, 1, 1], [0], [0]>} : vector<8x8x32xbf16>, vector<8x16x32xbf16>, vector<8x8x16xf32> -> vector<8x8x16xf32>
    "tpu.trace_stop"() : () -> ()
    %cst_71 = arith.constant 0.353553385 : f32
    %225 = vector.broadcast %cst_71 : f32 to vector<8x8x16xf32>
    %226 = arith.mulf %224, %225 : vector<8x8x16xf32>
    %227 = vector.broadcast %6 : vector<1x1x16xf32> to vector<8x8x16xf32>
    %228 = arith.addf %226, %227 : vector<8x8x16xf32>
    %cst_72 = arith.constant dense<0xFF800000> : vector<8x8xf32>
    %229 = vector.multi_reduction <maximumf>, %228, %cst_72 [2] : vector<8x8x16xf32> to vector<8x8xf32>
    %230 = vector.shape_cast %229 : vector<8x8xf32> to vector<8x8x1xf32>
    %231 = vector.broadcast %230 : vector<8x8x1xf32> to vector<8x8x16xf32>
    %232 = arith.subf %228, %231 : vector<8x8x16xf32>
    %233 = math.exp %232 : vector<8x8x16xf32>
    %cst_73 = arith.constant dense<0.000000e+00> : vector<8x8xf32>
    %234 = vector.multi_reduction <add>, %233, %cst_73 [2] : vector<8x8x16xf32> to vector<8x8xf32>
    %235 = vector.shape_cast %234 : vector<8x8xf32> to vector<8x8x1xf32>
    %236 = tpu.reciprocal %235 {approx = true} : vector<8x8x1xf32> -> vector<8x8x1xf32>
    %237 = vector.broadcast %236 : vector<8x8x1xf32> to vector<8x8x16xf32>
    %238 = arith.mulf %233, %237 : vector<8x8x16xf32>
    %239 = arith.truncf %238 : vector<8x8x16xf32> to vector<8x8x16xbf16>
    "tpu.trace_start"() <{level = 10 : i32, message = "nqk,nkc->nqc"}> : () -> ()
    %cst_74 = arith.constant dense<0.000000e+00> : vector<8x8x32xf32>
    %240 = tpu.matmul %239, %223, %cst_74 {dimension_numbers = #tpu.dot_dimension_numbers<[2], [1], [1], [2], [0, 0, 0, 1, 1, 2], [0], [0]>} : vector<8x8x16xbf16>, vector<8x16x32xbf16>, vector<8x8x32xf32> -> vector<8x8x32xf32>
    "tpu.trace_stop"() : () -> ()
    %241 = arith.addf %208, %240 : vector<8x8x32xf32>
    %c8_i32_75 = arith.constant 8 : i32
    %242 = vector.broadcast %c8_i32_75 : i32 to vector<1x1x32xi32>
    %243 = arith.cmpi sge, %0, %242 : vector<1x1x32xi32>
    %c16_i32_76 = arith.constant 16 : i32
    %244 = vector.broadcast %c16_i32_76 : i32 to vector<1x1x32xi32>
    %245 = arith.cmpi slt, %0, %244 : vector<1x1x32xi32>
    %246 = arith.andi %243, %245 : vector<1x1x32xi1>
    %cst_77 = arith.constant 0.000000e+00 : f32
    %247 = arith.truncf %cst_77 : f32 to bf16
    %248 = vector.shape_cast %246 : vector<1x1x32xi1> to vector<1x1x32xi1>
    %249 = vector.broadcast %248 : vector<1x1x32xi1> to vector<8x8x32xi1>
    %250 = vector.broadcast %247 : bf16 to vector<8x8x32xbf16>
    %251 = arith.select %249, %205, %250 : vector<8x8x32xi1>, vector<8x8x32xbf16>
    %cst_78 = arith.constant 0.000000e+00 : f32
    %252 = arith.truncf %cst_78 : f32 to bf16
    %253 = vector.shape_cast %246 : vector<1x1x32xi1> to vector<1x1x32xi1>
    %254 = vector.broadcast %253 : vector<1x1x32xi1> to vector<8x16x32xi1>
    %255 = vector.broadcast %252 : bf16 to vector<8x16x32xbf16>
    %256 = arith.select %254, %207, %255 : vector<8x16x32xi1>, vector<8x16x32xbf16>
    "tpu.trace_start"() <{level = 10 : i32, message = "nqc,nkc->nqk"}> : () -> ()
    %cst_79 = arith.constant dense<0.000000e+00> : vector<8x8x16xf32>
    %257 = tpu.matmul %251, %206, %cst_79 {dimension_numbers = #tpu.dot_dimension_numbers<[2], [2], [1], [1], [0, 0, 0, 1, 1, 1], [0], [0]>} : vector<8x8x32xbf16>, vector<8x16x32xbf16>, vector<8x8x16xf32> -> vector<8x8x16xf32>
    "tpu.trace_stop"() : () -> ()
    %cst_80 = arith.constant 0.353553385 : f32
    %258 = vector.broadcast %cst_80 : f32 to vector<8x8x16xf32>
    %259 = arith.mulf %257, %258 : vector<8x8x16xf32>
    %260 = vector.broadcast %6 : vector<1x1x16xf32> to vector<8x8x16xf32>
    %261 = arith.addf %259, %260 : vector<8x8x16xf32>
    %cst_81 = arith.constant dense<0xFF800000> : vector<8x8xf32>
    %262 = vector.multi_reduction <maximumf>, %261, %cst_81 [2] : vector<8x8x16xf32> to vector<8x8xf32>
    %263 = vector.shape_cast %262 : vector<8x8xf32> to vector<8x8x1xf32>
    %264 = vector.broadcast %263 : vector<8x8x1xf32> to vector<8x8x16xf32>
    %265 = arith.subf %261, %264 : vector<8x8x16xf32>
    %266 = math.exp %265 : vector<8x8x16xf32>
    %cst_82 = arith.constant dense<0.000000e+00> : vector<8x8xf32>
    %267 = vector.multi_reduction <add>, %266, %cst_82 [2] : vector<8x8x16xf32> to vector<8x8xf32>
    %268 = vector.shape_cast %267 : vector<8x8xf32> to vector<8x8x1xf32>
    %269 = tpu.reciprocal %268 {approx = true} : vector<8x8x1xf32> -> vector<8x8x1xf32>
    %270 = vector.broadcast %269 : vector<8x8x1xf32> to vector<8x8x16xf32>
    %271 = arith.mulf %266, %270 : vector<8x8x16xf32>
    %272 = arith.truncf %271 : vector<8x8x16xf32> to vector<8x8x16xbf16>
    "tpu.trace_start"() <{level = 10 : i32, message = "nqk,nkc->nqc"}> : () -> ()
    %cst_83 = arith.constant dense<0.000000e+00> : vector<8x8x32xf32>
    %273 = tpu.matmul %272, %256, %cst_83 {dimension_numbers = #tpu.dot_dimension_numbers<[2], [1], [1], [2], [0, 0, 0, 1, 1, 2], [0], [0]>} : vector<8x8x16xbf16>, vector<8x16x32xbf16>, vector<8x8x32xf32> -> vector<8x8x32xf32>
    "tpu.trace_stop"() : () -> ()
    %274 = arith.addf %241, %273 : vector<8x8x32xf32>
    %c16_i32_84 = arith.constant 16 : i32
    %275 = vector.broadcast %c16_i32_84 : i32 to vector<1x1x32xi32>
    %276 = arith.cmpi sge, %0, %275 : vector<1x1x32xi32>
    %c24_i32_85 = arith.constant 24 : i32
    %277 = vector.broadcast %c24_i32_85 : i32 to vector<1x1x32xi32>
    %278 = arith.cmpi slt, %0, %277 : vector<1x1x32xi32>
    %279 = arith.andi %276, %278 : vector<1x1x32xi1>
    %cst_86 = arith.constant 0.000000e+00 : f32
    %280 = arith.truncf %cst_86 : f32 to bf16
    %281 = vector.shape_cast %279 : vector<1x1x32xi1> to vector<1x1x32xi1>
    %282 = vector.broadcast %281 : vector<1x1x32xi1> to vector<8x8x32xi1>
    %283 = vector.broadcast %280 : bf16 to vector<8x8x32xbf16>
    %284 = arith.select %282, %205, %283 : vector<8x8x32xi1>, vector<8x8x32xbf16>
    %cst_87 = arith.constant 0.000000e+00 : f32
    %285 = arith.truncf %cst_87 : f32 to bf16
    %286 = vector.shape_cast %279 : vector<1x1x32xi1> to vector<1x1x32xi1>
    %287 = vector.broadcast %286 : vector<1x1x32xi1> to vector<8x16x32xi1>
    %288 = vector.broadcast %285 : bf16 to vector<8x16x32xbf16>
    %289 = arith.select %287, %207, %288 : vector<8x16x32xi1>, vector<8x16x32xbf16>
    "tpu.trace_start"() <{level = 10 : i32, message = "nqc,nkc->nqk"}> : () -> ()
    %cst_88 = arith.constant dense<0.000000e+00> : vector<8x8x16xf32>
    %290 = tpu.matmul %284, %206, %cst_88 {dimension_numbers = #tpu.dot_dimension_numbers<[2], [2], [1], [1], [0, 0, 0, 1, 1, 1], [0], [0]>} : vector<8x8x32xbf16>, vector<8x16x32xbf16>, vector<8x8x16xf32> -> vector<8x8x16xf32>
    "tpu.trace_stop"() : () -> ()
    %cst_89 = arith.constant 0.353553385 : f32
    %291 = vector.broadcast %cst_89 : f32 to vector<8x8x16xf32>
    %292 = arith.mulf %290, %291 : vector<8x8x16xf32>
    %293 = vector.broadcast %6 : vector<1x1x16xf32> to vector<8x8x16xf32>
    %294 = arith.addf %292, %293 : vector<8x8x16xf32>
    %cst_90 = arith.constant dense<0xFF800000> : vector<8x8xf32>
    %295 = vector.multi_reduction <maximumf>, %294, %cst_90 [2] : vector<8x8x16xf32> to vector<8x8xf32>
    %296 = vector.shape_cast %295 : vector<8x8xf32> to vector<8x8x1xf32>
    %297 = vector.broadcast %296 : vector<8x8x1xf32> to vector<8x8x16xf32>
    %298 = arith.subf %294, %297 : vector<8x8x16xf32>
    %299 = math.exp %298 : vector<8x8x16xf32>
    %cst_91 = arith.constant dense<0.000000e+00> : vector<8x8xf32>
    %300 = vector.multi_reduction <add>, %299, %cst_91 [2] : vector<8x8x16xf32> to vector<8x8xf32>
    %301 = vector.shape_cast %300 : vector<8x8xf32> to vector<8x8x1xf32>
    %302 = tpu.reciprocal %301 {approx = true} : vector<8x8x1xf32> -> vector<8x8x1xf32>
    %303 = vector.broadcast %302 : vector<8x8x1xf32> to vector<8x8x16xf32>
    %304 = arith.mulf %299, %303 : vector<8x8x16xf32>
    %305 = arith.truncf %304 : vector<8x8x16xf32> to vector<8x8x16xbf16>
    "tpu.trace_start"() <{level = 10 : i32, message = "nqk,nkc->nqc"}> : () -> ()
    %cst_92 = arith.constant dense<0.000000e+00> : vector<8x8x32xf32>
    %306 = tpu.matmul %305, %289, %cst_92 {dimension_numbers = #tpu.dot_dimension_numbers<[2], [1], [1], [2], [0, 0, 0, 1, 1, 2], [0], [0]>} : vector<8x8x16xbf16>, vector<8x16x32xbf16>, vector<8x8x32xf32> -> vector<8x8x32xf32>
    "tpu.trace_stop"() : () -> ()
    %307 = arith.addf %274, %306 : vector<8x8x32xf32>
    %c24_i32_93 = arith.constant 24 : i32
    %308 = vector.broadcast %c24_i32_93 : i32 to vector<1x1x32xi32>
    %309 = arith.cmpi sge, %0, %308 : vector<1x1x32xi32>
    %c32_i32_94 = arith.constant 32 : i32
    %310 = vector.broadcast %c32_i32_94 : i32 to vector<1x1x32xi32>
    %311 = arith.cmpi slt, %0, %310 : vector<1x1x32xi32>
    %312 = arith.andi %309, %311 : vector<1x1x32xi1>
    %cst_95 = arith.constant 0.000000e+00 : f32
    %313 = arith.truncf %cst_95 : f32 to bf16
    %314 = vector.shape_cast %312 : vector<1x1x32xi1> to vector<1x1x32xi1>
    %315 = vector.broadcast %314 : vector<1x1x32xi1> to vector<8x8x32xi1>
    %316 = vector.broadcast %313 : bf16 to vector<8x8x32xbf16>
    %317 = arith.select %315, %205, %316 : vector<8x8x32xi1>, vector<8x8x32xbf16>
    %cst_96 = arith.constant 0.000000e+00 : f32
    %318 = arith.truncf %cst_96 : f32 to bf16
    %319 = vector.shape_cast %312 : vector<1x1x32xi1> to vector<1x1x32xi1>
    %320 = vector.broadcast %319 : vector<1x1x32xi1> to vector<8x16x32xi1>
    %321 = vector.broadcast %318 : bf16 to vector<8x16x32xbf16>
    %322 = arith.select %320, %207, %321 : vector<8x16x32xi1>, vector<8x16x32xbf16>
    "tpu.trace_start"() <{level = 10 : i32, message = "nqc,nkc->nqk"}> : () -> ()
    %cst_97 = arith.constant dense<0.000000e+00> : vector<8x8x16xf32>
    %323 = tpu.matmul %317, %206, %cst_97 {dimension_numbers = #tpu.dot_dimension_numbers<[2], [2], [1], [1], [0, 0, 0, 1, 1, 1], [0], [0]>} : vector<8x8x32xbf16>, vector<8x16x32xbf16>, vector<8x8x16xf32> -> vector<8x8x16xf32>
    "tpu.trace_stop"() : () -> ()
    %cst_98 = arith.constant 0.353553385 : f32
    %324 = vector.broadcast %cst_98 : f32 to vector<8x8x16xf32>
    %325 = arith.mulf %323, %324 : vector<8x8x16xf32>
    %326 = vector.broadcast %6 : vector<1x1x16xf32> to vector<8x8x16xf32>
    %327 = arith.addf %325, %326 : vector<8x8x16xf32>
    %cst_99 = arith.constant dense<0xFF800000> : vector<8x8xf32>
    %328 = vector.multi_reduction <maximumf>, %327, %cst_99 [2] : vector<8x8x16xf32> to vector<8x8xf32>
    %329 = vector.shape_cast %328 : vector<8x8xf32> to vector<8x8x1xf32>
    %330 = vector.broadcast %329 : vector<8x8x1xf32> to vector<8x8x16xf32>
    %331 = arith.subf %327, %330 : vector<8x8x16xf32>
    %332 = math.exp %331 : vector<8x8x16xf32>
    %cst_100 = arith.constant dense<0.000000e+00> : vector<8x8xf32>
    %333 = vector.multi_reduction <add>, %332, %cst_100 [2] : vector<8x8x16xf32> to vector<8x8xf32>
    %334 = vector.shape_cast %333 : vector<8x8xf32> to vector<8x8x1xf32>
    %335 = tpu.reciprocal %334 {approx = true} : vector<8x8x1xf32> -> vector<8x8x1xf32>
    %336 = vector.broadcast %335 : vector<8x8x1xf32> to vector<8x8x16xf32>
    %337 = arith.mulf %332, %336 : vector<8x8x16xf32>
    %338 = arith.truncf %337 : vector<8x8x16xf32> to vector<8x8x16xbf16>
    "tpu.trace_start"() <{level = 10 : i32, message = "nqk,nkc->nqc"}> : () -> ()
    %cst_101 = arith.constant dense<0.000000e+00> : vector<8x8x32xf32>
    %339 = tpu.matmul %338, %322, %cst_101 {dimension_numbers = #tpu.dot_dimension_numbers<[2], [1], [1], [2], [0, 0, 0, 1, 1, 2], [0], [0]>} : vector<8x8x16xbf16>, vector<8x16x32xbf16>, vector<8x8x32xf32> -> vector<8x8x32xf32>
    "tpu.trace_stop"() : () -> ()
    %340 = arith.addf %307, %339 : vector<8x8x32xf32>
    %341 = vector.shape_cast %340 : vector<8x8x32xf32> to vector<64x32xf32>
    %342 = arith.truncf %341 : vector<64x32xf32> to vector<64x32xbf16>
    %c0_102 = arith.constant 0 : index
    %c0_103 = arith.constant 0 : index
    %343 = vector.load %arg11[%c0_102, %c0_103] : memref<32x32xbf16, #tpu.memory_space<vmem>>, vector<32x32xbf16>
    %cst_104 = arith.constant dense<0.000000e+00> : vector<64x32xf32>
    %344 = tpu.matmul %342, %343, %cst_104 {dimension_numbers = #tpu.dot_dimension_numbers<[1], [0], [0], [1], [0, 0, 1, 1], [], []>} : vector<64x32xbf16>, vector<32x32xbf16>, vector<64x32xf32> -> vector<64x32xf32>
    %c0_105 = arith.constant 0 : index
    %c0_106 = arith.constant 0 : index
    %345 = vector.load %arg12[%c0_105, %c0_106] : memref<1x32xf32, #tpu.memory_space<vmem>>, vector<1x32xf32>
    %346 = vector.broadcast %345 : vector<1x32xf32> to vector<64x32xf32>
    %347 = arith.addf %344, %346 : vector<64x32xf32>
    %348 = arith.addf %189, %347 : vector<64x32xf32>
    %cst_107 = arith.constant dense<0.000000e+00> : vector<64xf32>
    %349 = vector.multi_reduction <add>, %348, %cst_107 [1] : vector<64x32xf32> to vector<64xf32>
    %350 = vector.shape_cast %349 : vector<64xf32> to vector<64x1xf32>
    %cst_108 = arith.constant 3.200000e+01 : f32
    %351 = vector.broadcast %cst_108 : f32 to vector<64x1xf32>
    %352 = arith.divf %350, %351 : vector<64x1xf32>
    %353 = vector.broadcast %352 : vector<64x1xf32> to vector<64x32xf32>
    %354 = arith.subf %348, %353 : vector<64x32xf32>
    %355 = arith.mulf %354, %354 : vector<64x32xf32>
    %cst_109 = arith.constant dense<0.000000e+00> : vector<64xf32>
    %356 = vector.multi_reduction <add>, %355, %cst_109 [1] : vector<64x32xf32> to vector<64xf32>
    %357 = vector.shape_cast %356 : vector<64xf32> to vector<64x1xf32>
    %cst_110 = arith.constant 3.200000e+01 : f32
    %358 = vector.broadcast %cst_110 : f32 to vector<64x1xf32>
    %359 = arith.divf %357, %358 : vector<64x1xf32>
    %360 = vector.broadcast %352 : vector<64x1xf32> to vector<64x32xf32>
    %361 = arith.subf %348, %360 : vector<64x32xf32>
    %cst_111 = arith.constant 9.99999974E-6 : f32
    %362 = vector.broadcast %cst_111 : f32 to vector<64x1xf32>
    %363 = arith.addf %359, %362 : vector<64x1xf32>
    %364 = math.rsqrt %363 : vector<64x1xf32>
    %365 = vector.broadcast %364 : vector<64x1xf32> to vector<64x32xf32>
    %366 = arith.mulf %361, %365 : vector<64x32xf32>
    %c0_112 = arith.constant 0 : index
    %c0_113 = arith.constant 0 : index
    %367 = vector.load %arg15[%c0_112, %c0_113] : memref<1x32xf32, #tpu.memory_space<vmem>>, vector<1x32xf32>
    %368 = vector.broadcast %367 : vector<1x32xf32> to vector<64x32xf32>
    %369 = arith.mulf %366, %368 : vector<64x32xf32>
    %c0_114 = arith.constant 0 : index
    %c0_115 = arith.constant 0 : index
    %370 = vector.load %arg16[%c0_114, %c0_115] : memref<1x32xf32, #tpu.memory_space<vmem>>, vector<1x32xf32>
    %371 = vector.broadcast %370 : vector<1x32xf32> to vector<64x32xf32>
    %372 = arith.addf %369, %371 : vector<64x32xf32>
    %373 = arith.truncf %372 : vector<64x32xf32> to vector<64x32xbf16>
    %c0_116 = arith.constant 0 : index
    %c0_117 = arith.constant 0 : index
    %374 = vector.load %arg17[%c0_116, %c0_117] : memref<32x64xbf16, #tpu.memory_space<vmem>>, vector<32x64xbf16>
    %cst_118 = arith.constant dense<0.000000e+00> : vector<64x64xf32>
    %375 = tpu.matmul %373, %374, %cst_118 {dimension_numbers = #tpu.dot_dimension_numbers<[1], [0], [0], [1], [0, 0, 1, 1], [], []>} : vector<64x32xbf16>, vector<32x64xbf16>, vector<64x64xf32> -> vector<64x64xf32>
    %c0_119 = arith.constant 0 : index
    %c0_120 = arith.constant 0 : index
    %376 = vector.load %arg18[%c0_119, %c0_120] : memref<1x64xf32, #tpu.memory_space<vmem>>, vector<1x64xf32>
    %377 = vector.broadcast %376 : vector<1x64xf32> to vector<64x64xf32>
    %378 = arith.addf %375, %377 : vector<64x64xf32>
    %cst_121 = arith.constant 0.000000e+00 : f32
    %379 = vector.broadcast %cst_121 : f32 to vector<64x64xf32>
    %380 = arith.maximumf %378, %379 : vector<64x64xf32>
    %381 = arith.truncf %380 : vector<64x64xf32> to vector<64x64xbf16>
    %c0_122 = arith.constant 0 : index
    %c0_123 = arith.constant 0 : index
    %382 = vector.load %arg19[%c0_122, %c0_123] : memref<64x32xbf16, #tpu.memory_space<vmem>>, vector<64x32xbf16>
    %cst_124 = arith.constant dense<0.000000e+00> : vector<64x32xf32>
    %383 = tpu.matmul %381, %382, %cst_124 {dimension_numbers = #tpu.dot_dimension_numbers<[1], [0], [0], [1], [0, 0, 1, 1], [], []>} : vector<64x64xbf16>, vector<64x32xbf16>, vector<64x32xf32> -> vector<64x32xf32>
    %c0_125 = arith.constant 0 : index
    %c0_126 = arith.constant 0 : index
    %384 = vector.load %arg20[%c0_125, %c0_126] : memref<1x32xf32, #tpu.memory_space<vmem>>, vector<1x32xf32>
    %385 = vector.broadcast %384 : vector<1x32xf32> to vector<64x32xf32>
    %386 = arith.addf %383, %385 : vector<64x32xf32>
    %387 = arith.addf %372, %386 : vector<64x32xf32>
    %cst_127 = arith.constant dense<0.000000e+00> : vector<64xf32>
    %388 = vector.multi_reduction <add>, %387, %cst_127 [1] : vector<64x32xf32> to vector<64xf32>
    %389 = vector.shape_cast %388 : vector<64xf32> to vector<64x1xf32>
    %cst_128 = arith.constant 3.200000e+01 : f32
    %390 = vector.broadcast %cst_128 : f32 to vector<64x1xf32>
    %391 = arith.divf %389, %390 : vector<64x1xf32>
    %392 = vector.broadcast %391 : vector<64x1xf32> to vector<64x32xf32>
    %393 = arith.subf %387, %392 : vector<64x32xf32>
    %394 = arith.mulf %393, %393 : vector<64x32xf32>
    %cst_129 = arith.constant dense<0.000000e+00> : vector<64xf32>
    %395 = vector.multi_reduction <add>, %394, %cst_129 [1] : vector<64x32xf32> to vector<64xf32>
    %396 = vector.shape_cast %395 : vector<64xf32> to vector<64x1xf32>
    %cst_130 = arith.constant 3.200000e+01 : f32
    %397 = vector.broadcast %cst_130 : f32 to vector<64x1xf32>
    %398 = arith.divf %396, %397 : vector<64x1xf32>
    %399 = vector.broadcast %391 : vector<64x1xf32> to vector<64x32xf32>
    %400 = arith.subf %387, %399 : vector<64x32xf32>
    %cst_131 = arith.constant 9.99999974E-6 : f32
    %401 = vector.broadcast %cst_131 : f32 to vector<64x1xf32>
    %402 = arith.addf %398, %401 : vector<64x1xf32>
    %403 = math.rsqrt %402 : vector<64x1xf32>
    %404 = vector.broadcast %403 : vector<64x1xf32> to vector<64x32xf32>
    %405 = arith.mulf %400, %404 : vector<64x32xf32>
    %c0_132 = arith.constant 0 : index
    %c0_133 = arith.constant 0 : index
    %406 = vector.load %arg21[%c0_132, %c0_133] : memref<1x32xf32, #tpu.memory_space<vmem>>, vector<1x32xf32>
    %407 = vector.broadcast %406 : vector<1x32xf32> to vector<64x32xf32>
    %408 = arith.mulf %405, %407 : vector<64x32xf32>
    %c0_134 = arith.constant 0 : index
    %c0_135 = arith.constant 0 : index
    %409 = vector.load %arg22[%c0_134, %c0_135] : memref<1x32xf32, #tpu.memory_space<vmem>>, vector<1x32xf32>
    %410 = vector.broadcast %409 : vector<1x32xf32> to vector<64x32xf32>
    %411 = arith.addf %408, %410 : vector<64x32xf32>
    %412 = vector.shape_cast %411 : vector<64x32xf32> to vector<8x8x32xf32>
    %413 = vector.extract_strided_slice %412 {offsets = [0, 4, 0], sizes = [8, 4, 32], strides = [1, 1, 1]} : vector<8x8x32xf32> to vector<8x4x32xf32>
    %c0_136 = arith.constant 0 : index
    %c0_137 = arith.constant 0 : index
    %c0_138 = arith.constant 0 : index
    %414 = vector.load %arg23[%c0_136, %c0_137, %c0_138] : memref<8x4x32xf32, #tpu.memory_space<vmem>>, vector<8x4x32xf32>
    tpu.vector_store %arg23[%c0_136, %c0_137, %c0_138], %413 {strides = array<i32>} : memref<8x4x32xf32, #tpu.memory_space<vmem>>, vector<8x4x32xf32>,
    return
  }
  func.func @transform_0(%arg0: i32) -> (i32, i32) {
    %c0_i32 = arith.constant 0 : i32
    %c0_i32_0 = arith.constant 0 : i32
    return %arg0, %c0_i32 : i32, i32
  }
  func.func @transform_1(%arg0: i32) -> (i32, i32) {
    %c0_i32 = arith.constant 0 : i32
    %c0_i32_0 = arith.constant 0 : i32
    return %arg0, %c0_i32 : i32, i32
  }
  func.func @transform_2(%arg0: i32) -> (i32, i32) {
    %c0_i32 = arith.constant 0 : i32
    %c0_i32_0 = arith.constant 0 : i32
    %c0_i32_1 = arith.constant 0 : i32
    return %c0_i32, %c0_i32_0 : i32, i32
  }
  func.func @transform_3(%arg0: i32) -> (i32, i32) {
    %c0_i32 = arith.constant 0 : i32
    %c0_i32_0 = arith.constant 0 : i32
    %c0_i32_1 = arith.constant 0 : i32
    return %c0_i32, %c0_i32_0 : i32, i32
  }
  func.func @transform_4(%arg0: i32) -> (i32, i32) {
    %c0_i32 = arith.constant 0 : i32
    %c0_i32_0 = arith.constant 0 : i32
    %c0_i32_1 = arith.constant 0 : i32
    return %c0_i32, %c0_i32_0 : i32, i32
  }
  func.func @transform_5(%arg0: i32) -> (i32, i32) {
    %c0_i32 = arith.constant 0 : i32
    %c0_i32_0 = arith.constant 0 : i32
    %c0_i32_1 = arith.constant 0 : i32
    return %c0_i32, %c0_i32_0 : i32, i32
  }
  func.func @transform_6(%arg0: i32) -> (i32, i32) {
    %c0_i32 = arith.constant 0 : i32
    %c0_i32_0 = arith.constant 0 : i32
    %c0_i32_1 = arith.constant 0 : i32
    return %c0_i32, %c0_i32_0 : i32, i32
  }
  func.func @transform_7(%arg0: i32) -> (i32, i32) {
    %c0_i32 = arith.constant 0 : i32
    %c0_i32_0 = arith.constant 0 : i32
    %c0_i32_1 = arith.constant 0 : i32
    return %c0_i32, %c0_i32_0 : i32, i32
  }
  func.func @transform_8(%arg0: i32) -> (i32, i32) {
    %c0_i32 = arith.constant 0 : i32
    %c0_i32_0 = arith.constant 0 : i32
    %c0_i32_1 = arith.constant 0 : i32
    return %c0_i32, %c0_i32_0 : i32, i32
  }
  func.func @transform_9(%arg0: i32) -> (i32, i32) {
    %c0_i32 = arith.constant 0 : i32
    %c0_i32_0 = arith.constant 0 : i32
    %c0_i32_1 = arith.constant 0 : i32
    return %c0_i32, %c0_i32_0 : i32, i32
  }
  func.func @transform_10(%arg0: i32) -> (i32, i32) {
    %c0_i32 = arith.constant 0 : i32
    %c0_i32_0 = arith.constant 0 : i32
    %c0_i32_1 = arith.constant 0 : i32
    return %c0_i32, %c0_i32_0 : i32, i32
  }
  func.func @transform_11(%arg0: i32) -> (i32, i32) {
    %c0_i32 = arith.constant 0 : i32
    %c0_i32_0 = arith.constant 0 : i32
    %c0_i32_1 = arith.constant 0 : i32
    return %c0_i32, %c0_i32_0 : i32, i32
  }
  func.func @transform_12(%arg0: i32) -> (i32, i32) {
    %c0_i32 = arith.constant 0 : i32
    %c0_i32_0 = arith.constant 0 : i32
    %c0_i32_1 = arith.constant 0 : i32
    return %c0_i32, %c0_i32_0 : i32, i32
  }
  func.func @transform_13(%arg0: i32) -> (i32, i32) {
    %c0_i32 = arith.constant 0 : i32
    %c0_i32_0 = arith.constant 0 : i32
    %c0_i32_1 = arith.constant 0 : i32
    return %c0_i32, %c0_i32_0 : i32, i32
  }
  func.func @transform_14(%arg0: i32) -> (i32, i32) {
    %c0_i32 = arith.constant 0 : i32
    %c0_i32_0 = arith.constant 0 : i32
    %c0_i32_1 = arith.constant 0 : i32
    return %c0_i32, %c0_i32_0 : i32, i32
  }
  func.func @transform_15(%arg0: i32) -> (i32, i32) {
    %c0_i32 = arith.constant 0 : i32
    %c0_i32_0 = arith.constant 0 : i32
    %c0_i32_1 = arith.constant 0 : i32
    return %c0_i32, %c0_i32_0 : i32, i32
  }
  func.func @transform_16(%arg0: i32) -> (i32, i32) {
    %c0_i32 = arith.constant 0 : i32
    %c0_i32_0 = arith.constant 0 : i32
    %c0_i32_1 = arith.constant 0 : i32
    return %c0_i32, %c0_i32_0 : i32, i32
  }
  func.func @transform_17(%arg0: i32) -> (i32, i32) {
    %c0_i32 = arith.constant 0 : i32
    %c0_i32_0 = arith.constant 0 : i32
    %c0_i32_1 = arith.constant 0 : i32
    return %c0_i32, %c0_i32_0 : i32, i32
  }
  func.func @transform_18(%arg0: i32) -> (i32, i32) {
    %c0_i32 = arith.constant 0 : i32
    %c0_i32_0 = arith.constant 0 : i32
    %c0_i32_1 = arith.constant 0 : i32
    return %c0_i32, %c0_i32_0 : i32, i32
  }
  func.func @transform_19(%arg0: i32) -> (i32, i32) {
    %c0_i32 = arith.constant 0 : i32
    %c0_i32_0 = arith.constant 0 : i32
    %c0_i32_1 = arith.constant 0 : i32
    return %c0_i32, %c0_i32_0 : i32, i32
  }
  func.func @transform_20(%arg0: i32) -> (i32, i32) {
    %c0_i32 = arith.constant 0 : i32
    %c0_i32_0 = arith.constant 0 : i32
    %c0_i32_1 = arith.constant 0 : i32
    return %c0_i32, %c0_i32_0 : i32, i32
  }
  func.func @transform_21(%arg0: i32) -> (i32, i32) {
    %c0_i32 = arith.constant 0 : i32
    %c0_i32_0 = arith.constant 0 : i32
    %c0_i32_1 = arith.constant 0 : i32
    return %c0_i32, %c0_i32_0 : i32, i32
  }
  func.func @transform_22(%arg0: i32) -> (i32, i32, i32) {
    %c0_i32 = arith.constant 0 : i32
    %c0_i32_0 = arith.constant 0 : i32
    %c0_i32_1 = arith.constant 0 : i32
    return %arg0, %c0_i32, %c0_i32_0 : i32, i32, i32
  }
}

</mosaic_0001>

<bundles_post_ra>
// kernel: causal_transformer_decoder_forward.2
= control target key start
LH: loop header
LB: loop body
LE: loop exit
PB: predicated region body
PF: predicated region fallthrough
CT: control target
= control target key end

     0   :  { %vm173_vm0 = vcmask 261120   ;;  %v12941_v10 = vmov 0.0   ;;  %vm10405_vm1 = vmmov 0   ;;  %s10406_s25 = smov 96   ;;  %v74_v37 = vlaneseq  ;;  %s10408_s26 = smov 64   ;;  %s12911_s2 = inlined_call_operand.vmem [shape: bf16[32,96], index: 2, kind: input, shape index: {}]   ;;  %s12912_s0 = inlined_call_operand.vmem [shape: bf16[128,32], index: 0, kind: input, shape index: {}]   ;;  %s12913_s3 = inlined_call_operand.vmem [shape: f32[1,96], index: 3, kind: input, shape index: {}]   ;;  %s12914_s4 = inlined_call_operand.vmem [shape: bf16[32,32], index: 4, kind: input, shape index: {}]   ;;  %s12915_s5 = inlined_call_operand.vmem [shape: f32[1,32], index: 5, kind: input, shape index: {}]   ;;  %s12916_s8 = inlined_call_operand.vmem [shape: bf16[32,64], index: 8, kind: input, shape index: {}]   ;;  %s12917_s1 = inlined_call_operand.vmem [shape: bf16[128,32], index: 1, kind: input, shape index: {}]   ;;  %s12918_s6 = inlined_call_operand.vmem [shape: bf16[32,32], index: 6, kind: input, shape index: {}]   ;;  %s12919_s12 = inlined_call_operand.vmem [shape: f32[1,32], index: 12, kind: input, shape index: {}]   ;;  %s12920_s13 = inlined_call_operand.vmem [shape: f32[1,32], index: 13, kind: input, shape index: {}]   ;;  %s12921_s9 = inlined_call_operand.vmem [shape: f32[1,64], index: 9, kind: input, shape index: {}]   ;;  %s12922_s7 = inlined_call_operand.vmem [shape: f32[1,32], index: 7, kind: input, shape index: {}]   ;;  %s12923_s10 = inlined_call_operand.vmem [shape: bf16[32,32], index: 10, kind: input, shape index: {}]   ;;  %s12924_s11 = inlined_call_operand.vmem [shape: f32[1,32], index: 11, kind: input, shape index: {}]   ;;  %s12925_s16 = inlined_call_operand.vmem [shape: bf16[32,64], index: 16, kind: input, shape index: {}]   ;;  %s12926_s14 = inlined_call_operand.vmem [shape: f32[1,32], index: 14, kind: input, shape index: {}]   ;;  %s12927_s15 = inlined_call_operand.vmem [shape: f32[1,32], index: 15, kind: input, shape index: {}]   ;;  %s12928_s18 = inlined_call_operand.vmem [shape: bf16[64,32], index: 18, kind: input, shape index: {}]   ;;  %s12929_s17 = inlined_call_operand.vmem [shape: f32[1,64], index: 17, kind: input, shape index: {}]   ;;  %s12930_s19 = inlined_call_operand.vmem [shape: f32[1,32], index: 19, kind: input, shape index: {}]   ;;  %s12931_s20 = inlined_call_operand.vmem [shape: f32[1,32], index: 20, kind: input, shape index: {}]   ;;  %s12932_s21 = inlined_call_operand.vmem [shape: f32[1,32], index: 21, kind: input, shape index: {}]   ;;  %s12933_s22 = inlined_call_operand.vmem [shape: f32[8,4,32], index: 22, kind: output, shape index: {}]  }
   0x1   :  { %12956 = sst [smem:[#allocation13_spill]] %s12911_s2  ;;  %v12966_v55 = vmov 0  ;;  %v12969_v57 = vmov 0  ;;  %v12939_v58 = vmov 0   ;;  %vm749_vm10 = vcmask 130048  }
   0x2   :  { %12957 = sst [smem:[#allocation14_spill]] %s12912_s0  ;;  %s12963_s29 = sld [smem:[#allocation13_spill]]  ;;  %v10600_v43 = vand.u32 127, %v74_v37  ;;  %v327_v52 = vshrl.u32 %v74_v37, 7 }
   0x3   :  { %12958 = sst [smem:[#allocation15_spill]] %s12913_s3  ;;  %s12964_s0 = sld [smem:[#allocation14_spill]] }
   0x4   :  { %12959 = sst [smem:[#allocation16_spill]] %s12914_s4  ;;  %vm846_vm2 = vcmp.ge.s32.totalorder %v10600_v43, 8  ;;  %vm847_vm3 = vcmp.lt.s32.totalorder %v10600_v43, 16  ;;  %vm312_vm4 = vcmp.lt.s32.totalorder %v10600_v43, 8  ;;  %v10624_v56 = vsub.s32 0, %v327_v52 }
   0x5   :  { %12960 = sst [smem:[#allocation17_spill]] %s12915_s5  ;;  %vm848_vm5 = vmand %vm846_vm2, %vm847_vm3  ;;  %vm76_vm9 = vcmp.lt.s32.totalorder %v10600_v43, 4  ;;  %vm2084_vm12 = vcmp.ge.s32.totalorder %v10600_v43, 16  ;;  %vm2085_vm13 = vcmp.lt.s32.totalorder %v10600_v43, 24  ;;  %vm2954_vm3 = vcmp.ge.s32.totalorder %v10600_v43, 24  ;;  %s12979_s4 = sld [smem:[#allocation16_spill]] }
   0x6   :  { %12961 = sst [smem:[#allocation18_spill]] %s12916_s8  ;;  %vm10616_vm6 = vmpackc.low %vm312_vm4, %vm312_vm4  ;;  %vm2955_vm4 = vcmp.lt.s32.totalorder %v10600_v43, 32  ;;  %s12980_s2 = sld [smem:[#allocation17_spill]] }
   0x7   :  { %12962 = sst [smem:[#allocation19_spill]] %s12917_s1  ;;  %s12965_s1 = sld [smem:[#allocation15_spill]]  ;;  %v12967_v55 = vsel %vm10616_vm6, 4294967295, %v12966_v55  ;;  %vm10626_vm7 = vmpackc.low %vm848_vm5, %vm848_vm5  ;;  %v325_v60 = vsel %vm10616_vm6, 65537, %v12939_v58 }
   0x8   :  { %v10052_v0 = vld [vmem:[%s12963_s29] sm:$0xff]   ;;  %v10053_v1 = vld [vmem:[%s12963_s29 + $0x8] sm:$0xff]   ;;  %12968 = vst [vmem:[#allocation2_spill] sm:$0xff] %v12967_v55  ;;  %v12970_v57 = vsel %vm10626_vm7, 4294967295, %v12969_v57  ;;  %v860_v59 = vsel %vm10626_vm7, 65537, %v12939_v58  ;;  %v10644_v62 = vrot.slane %v325_v60, %v10624_v56  ;;  %vm2086_vm14 = vmand %vm2084_vm12, %vm2085_vm13  ;;  %s12982_s29 = sld [smem:[#allocation19_spill]] }
   0x9   :  { %8978 = vmatprep.subr.bf16.mxu0 %v10052_v0  ;;  %v78_v2 = vld [vmem:[%s12964_s0] sm:$0xff]   ;;  %9850 = vmatprep.subr.bf16.mxu1 %v10052_v0  ;;  %v80_v3 = vld [vmem:[%s12964_s0 + $0x8] sm:$0xff]   ;;  %v82_v4 = vld [vmem:[%s12964_s0 + $0x10] sm:$0xff]   ;;  %12971 = vst [vmem:[#allocation3_spill] sm:$0xff] %v12970_v57  ;;  %v10641_v61 = vrot.slane %v860_v59, %v10624_v56  ;;  %s10409_s8 = smov 32  }
   0xa   :  { %8979 = vmatpush3.bf16.msra.mxu0 %v10052_v0  ;;  %9852 = vmatpush3.bf16.msra.mxu1 %v10052_v0  ;;  %v90_v5 = vld [vmem:[%s12964_s0 + $0x30] sm:$0xff]   ;;  %v92_v6 = vld [vmem:[%s12964_s0 + $0x38] sm:$0xff]   ;;  %v86_v8 = vld [vmem:[%s12964_s0 + $0x20] sm:$0xff]  }
   0xb   :  { %8980 = vmatprep.subr.bf16.mxu0 %v10053_v1  ;;  %9851 = vmatprep.subr.bf16.mxu1 %v10053_v1  ;;  %v84_v7 = vld [vmem:[%s12964_s0 + $0x18] sm:$0xff]   ;;  %v88_v9 = vld [vmem:[%s12964_s0 + $0x28] sm:$0xff]   ;;  %vm11154_vm15 = vmpackc.low %vm2086_vm14, %vm2086_vm14 }
   0xc   :  { %8982 = vmatprep.mubr.msk.bf16.mxu0 %vm173_vm0, %v78_v2  ;;  %8994 = vmatprep.mubr.msk.bf16.mxu1 %vm173_vm0, %v90_v5  ;;  %vm2956_vm5 = vmand %vm2954_vm3, %vm2955_vm4 }
   0xd   :  { %v8461_v12 = vld [vmem:[%s12965_s1] ss:$0 sm:$0xff] }
   0xe   :  { %8981 = vmatpush3.bf16.msra.mxu0 %v10053_v1  ;;  %9853 = vmatpush3.bf16.msra.mxu1 %v10053_v1 }
   0xf   :  { %8998 = vmatprep.subr.bf16.mxu1 %v12941_v10  ;;  %9022 = vmatprep.subr.bf16.mxu0 %v12941_v10 }
  0x11   :  { %8983 = vmatmul.mubr.msk.bf16.vlgmr.msra.gmra.mrb[0].mxu0 %vm173_vm0, %v80_v3  ;;  %8995 = vmatmul.mubr.msk.bf16.vlgmr.msra.gmra.mrb[0].mxu1 %vm173_vm0, %v92_v6 }
  0x12   :  { %8986 = vmatprep.mubr.msk.bf16.mxu0 %vm173_vm0, %v82_v4  ;;  %9000 = vmatprep.mubr.msk.bf16.mxu1 %vm10405_vm1, %v12941_v10 }
  0x19   :  { %8987 = vmatmul.mubr.msk.bf16.gmra.mrb[4].mxu0 %vm173_vm0, %v84_v7 }
  0x1a   :  { %8990 = vmatprep.mubr.msk.bf16.mxu0 %vm173_vm0, %v86_v8 }
  0x21   :  { %8991 = vmatmul.mubr.msk.bf16.gmra.mrb[8].mxu0 %vm173_vm0, %v88_v9 }
  0x22   :  { %9024 = vmatprep.mubr.msk.bf16.mxu0 %vm10405_vm1, %v12941_v10 }
  0xe4   :  { %v8984_v11 = vpop.f32.mrb[0].mxu0  ;;  %v8996_v13 = vpop.f32.mrb[0].mxu1 }
  0xe5   :  { %v232_v14 = vpop.f32.mrb[1].mxu0  ;;  %v289_v15 = vadd.f32 %v8996_v13, %v8461_v12  ;;  %v280_v16 = vpop.f32.mrb[1].mxu1  ;;  %v241_v20 = vadd.f32 %v8984_v11, %v8461_v12 }
  0xe6   :  { %v8985_v17 = vpop.f32.mrb[2].mxu0  ;;  %v281_v18 = vadd.f32 %v8461_v12, %v280_v16  ;;  %v8997_v19 = vpop.f32.mrb[2].mxu1  ;;  %v233_v25 = vadd.f32 %v8461_v12, %v232_v14 }
  0xe7   :  { %v10572_v21 = vadd.f32 %v8985_v17, %v8461_v12  ;;  %v235_v22 = vpop.f32.mrb[3].mxu0  ;;  %v10574_v23 = vadd.f32 %v8997_v19, %v8461_v12  ;;  %v283_v24 = vpop.f32.mrb[3].mxu1 }
  0xe8   :  { %v236_v26 = vadd.f32 %v8461_v12, %v235_v22  ;;  %v10576_v27 = vadd.f32 %v8461_v12, %v283_v24 }
  0xe9   :  { %v10579_v28 = vpack.c.bf16 %v10572_v21, %v241_v20  ;;  %v10582_v29 = vpack.c.bf16 %v10574_v23, %v289_v15  ;;  %v10670_v6 = vpack.c.bf16 %v10572_v21, %v10572_v21 }
  0xea   :  { %v10584_v30 = vpack.c.bf16 %v236_v26, %v233_v25  ;;  %v10587_v31 = vpack.c.bf16 %v10576_v27, %v281_v18  ;;  %v10655_v1 = vpack.c.bf16 %v236_v26, %v236_v26 }
  0xeb   :  { %v318_v11 = vsel %vm10616_vm6, %v10670_v6, 0 }
  0xec   :  { %v8988_v32 = vpop.f32.mrb[4].mxu0  ;;  %342 = vrot.lane.b32.xlu0 %v10584_v30, %s10406_s25  ;;  %v317_v4 = vsel %vm10616_vm6, %v10655_v1, 0 }
  0xed   :  { %v257_v33 = vadd.f32 %v8988_v32, %v8461_v12  ;;  %v248_v34 = vpop.f32.mrb[5].mxu0  ;;  %v10725_v32 = vpack.c.bf16 %v10576_v27, %v10576_v27 }
  0xee   :  { %v249_v35 = vadd.f32 %v8461_v12, %v248_v34  ;;  %v8989_v36 = vpop.f32.mrb[6].mxu0 }
  0xef   :  { %v10591_v38 = vadd.f32 %v8989_v36, %v8461_v12  ;;  %v251_v39 = vpop.f32.mrb[7].mxu0 }
  0xf0   :  { %v252_v40 = vadd.f32 %v8461_v12, %v251_v39  ;;  %391 = vrot.lane.b32.xlu0 %v10579_v28, %s10406_s25  ;;  %v852_v39 = vsel %vm10626_vm7, %v10655_v1, 0 }
  0xf1   :  { %v10596_v41 = vpack.c.bf16 %v10591_v38, %v257_v33  ;;  %v10721_v26 = vpack.c.bf16 %v10591_v38, %v10591_v38 }
  0xf2   :  { %v10598_v42 = vpack.c.bf16 %v252_v40, %v249_v35  ;;  %v10687_v14 = vpack.c.bf16 %v252_v40, %v252_v40  ;;  %v323_v35 = vsel %vm10616_vm6, %v10725_v32, 0 }
  0xf3   :  { %v320_v27 = vsel %vm10616_vm6, %v10721_v26, 0 }
  0xf4   :  { %v8992_v44 = vpop.f32.mrb[8].mxu0  ;;  %440 = vrot.lane.b32.xlu1 %v10598_v42, %s10406_s25  ;;  %v319_v20 = vsel %vm10616_vm6, %v10687_v14, 0 }
  0xf5   :  { %v273_v45 = vadd.f32 %v8992_v44, %v8461_v12  ;;  %v264_v46 = vpop.f32.mrb[9].mxu0  ;;  %v10783_v44 = vpack.c.bf16 %v10574_v23, %v10574_v23  ;;  %v853_v23 = vsel %vm10626_vm7, %v10670_v6, 0 }
  0xf6   :  { %v265_v47 = vadd.f32 %v8461_v12, %v264_v46  ;;  %v8993_v48 = vpop.f32.mrb[10].mxu0  ;;  %v854_v46 = vsel %vm10626_vm7, %v10687_v14, 0 }
  0xf7   :  { %v10606_v49 = vadd.f32 %v8993_v48, %v8461_v12  ;;  %v267_v50 = vpop.f32.mrb[11].mxu0  ;;  %v855_v48 = vsel %vm10626_vm7, %v10721_v26, 0 }
  0xf8   :  { %v268_v51 = vadd.f32 %v8461_v12, %v267_v50  ;;  %489 = vrot.lane.b32.xlu1 %v10596_v41, %s10406_s25 }
  0xf9   :  { %v10612_v53 = vpack.c.bf16 %v10606_v49, %v273_v45  ;;  %v10760_v37 = vpack.c.bf16 %v10606_v49, %v10606_v49  ;;  %v324_v45 = vsel %vm10616_vm6, %v10783_v44, 0  ;;  %v858_v49 = vsel %vm10626_vm7, %v10725_v32, 0 }
  0xfa   :  { %v10614_v54 = vpack.c.bf16 %v268_v51, %v265_v47  ;;  %v10689_v15 = vpack.c.bf16 %v268_v51, %v268_v51  ;;  %v859_v51 = vsel %vm10626_vm7, %v10783_v44, 0 }
  0xfb   :  { %v322_v38 = vsel %vm10616_vm6, %v10760_v37, 0  ;;  %v857_v50 = vsel %vm10626_vm7, %v10760_v37, 0 }
  0xfc   :  { %587 = vrot.lane.b32.xlu1 %v10612_v53, %s10406_s25  ;;  %538 = vrot.lane.b32.xlu0 %v10614_v54, %s10406_s25  ;;  %v321_v21 = vsel %vm10616_vm6, %v10689_v15, 0  ;;  %v856_v47 = vsel %vm10626_vm7, %v10689_v15, 0 }
 0x100   :  { %685 = vrot.lane.b32.xlu1 %v10582_v29, %s10406_s25  ;;  %636 = vrot.lane.b32.xlu0 %v10587_v31, %s10406_s25 }
 0x104   :  { %865 = vrot.lane.b32.xlu1 %v10641_v61, %s10408_s26  ;;  %330 = vrot.lane.b32.xlu0 %v10644_v62, %s10408_s26 }
 0x15e   :  { %v343_v63 = vpop.permute.xlu0 %342 }
 0x15f   :  { %v10651_v0 = vsel %vm173_vm0, %v343_v63, 0  ;;  %v10853_v63 = vsel %vm76_vm9, -1e+30, %v12941_v10 }
 0x160   :  { %8999 = vmatpush3.bf16.xpose.msra.mxu1 %v10651_v0 }
 0x161   :  { %9004 = vmatprep.subr.bf16.mxu1 %v12941_v10 }
 0x162   :  { %v392_v2 = vpop.permute.xlu0 %391 }
 0x163   :  { %v10661_v5 = vsel %vm173_vm0, %v392_v2, 0 }
 0x166   :  { %v441_v3 = vpop.permute.xlu1 %440 }
 0x167   :  { %9001 = vmatmul.mubr.msk.bf16.vlgmr.msra.gmra.mrb[4].mxu1 %vm173_vm0, %v317_v4  ;;  %v10676_v12 = vsel %vm173_vm0, %v441_v3, 0 }
 0x168   :  { %9005 = vmatpush3.bf16.xpose.msra.mxu1 %v10661_v5  ;;  %9006 = vmatprep.mubr.msk.bf16.mxu1 %vm10405_vm1, %v12941_v10 }
 0x169   :  { %9010 = vmatprep.subr.bf16.mxu1 %v12941_v10 }
 0x16a   :  { %v490_v7 = vpop.permute.xlu1 %489 }
 0x16b   :  { %v10704_v22 = vsel %vm173_vm0, %v490_v7, 0 }
 0x16e   :  { %v588_v8 = vpop.permute.xlu1 %587  ;;  %v539_v9 = vpop.permute.xlu0 %538 }
 0x16f   :  { %v10679_v13 = vsel %vm173_vm0, %v539_v9, 0  ;;  %9007 = vmatmul.mubr.msk.bf16.vlgmr.msra.gmra.mrb[8].mxu1 %vm173_vm0, %v318_v11  ;;  %v10748_v36 = vsel %vm173_vm0, %v588_v8, 0 }
 0x170   :  { %9011 = vmatpush3.bf16.xpose.msra.mxu1 %v10676_v12  ;;  %9023 = vmatpush3.bf16.xpose.msra.mxu0 %v10679_v13 }
 0x171   :  { %9012 = vmatprep.mubr.msk.bf16.mxu1 %vm10405_vm1, %v12941_v10  ;;  %9016 = vmatprep.subr.bf16.mxu1 %v12941_v10 }
 0x172   :  { %v686_v16 = vpop.permute.xlu1 %685  ;;  %9034 = vmatprep.subr.bf16.mxu0 %v12941_v10  ;;  %v637_v17 = vpop.permute.xlu0 %636 }
 0x173   :  { %v10693_v18 = vsel %vm173_vm0, %v637_v17, 0  ;;  %v10771_v40 = vsel %vm173_vm0, %v686_v16, 0 }
 0x176   :  { %v10695_v19 = vpop.permute.xlu1 %865  ;;  %v10847_v52 = vpop.permute.xlu0 %330 }
 0x177   :  { %vm867_vm8 = vcmp.ne.s16.totalorder %v10695_v19, 0  ;;  %9013 = vmatmul.mubr.msk.bf16.vlgmr.msra.gmra.mrb[12].mxu1 %vm173_vm0, %v319_v20  ;;  %9025 = vmatmul.mubr.msk.bf16.vlgmr.msra.gmra.mrb[12].mxu0 %vm173_vm0, %v321_v21  ;;  %vm332_vm11 = vcmp.ne.s16.totalorder %v10847_v52, 0 }
 0x178   :  { %9017 = vmatpush3.bf16.xpose.msra.mxu1 %v10704_v22  ;;  %9035 = vmatpush3.bf16.xpose.msra.mxu0 %v10693_v18  ;;  %v869_v24 = vsel %vm867_vm8, %v10579_v28, 0  ;;  %v868_v25 = vsel %vm867_vm8, %v10584_v30, 0  ;;  %v871_v33 = vsel %vm867_vm8, %v10596_v41, 0  ;;  %v870_v34 = vsel %vm867_vm8, %v10598_v42, 0 }
 0x179   :  { %1380 = vrot.lane.b32.xlu0 %v869_v24, %s10408_s26  ;;  %1333 = vrot.lane.b32.xlu1 %v868_v25, %s10408_s26  ;;  %v340_v52 = vsel %vm332_vm11, %v10582_v29, 0 }
 0x17a   :  { %9018 = vmatprep.mubr.msk.bf16.mxu1 %vm10405_vm1, %v12941_v10  ;;  %9036 = vmatprep.mubr.msk.bf16.mxu0 %vm10405_vm1, %v12941_v10 }
 0x17b   :  { %9028 = vmatprep.subr.bf16.mxu1 %v12941_v10  ;;  %9046 = vmatprep.subr.bf16.mxu0 %v12941_v10 }
 0x17d   :  { %1474 = vrot.lane.b32.xlu0 %v871_v33, %s10408_s26  ;;  %1427 = vrot.lane.b32.xlu1 %v870_v34, %s10408_s26 }
 0x17f   :  { %9019 = vmatmul.mubr.msk.bf16.vlgmr.msra.gmra.mrb[16].mxu1 %vm173_vm0, %v320_v27  ;;  %9037 = vmatmul.mubr.msk.bf16.vlgmr.msra.gmra.mrb[16].mxu0 %vm173_vm0, %v323_v35 }
 0x180   :  { %9029 = vmatpush3.bf16.xpose.msra.mxu1 %v10748_v36  ;;  %9047 = vmatpush3.bf16.xpose.msra.mxu0 %v10651_v0 }
 0x181   :  { %9030 = vmatprep.mubr.msk.bf16.mxu1 %vm10405_vm1, %v12941_v10  ;;  %9048 = vmatprep.mubr.msk.bf16.mxu0 %vm10405_vm1, %v12941_v10 }
 0x182   :  { %9040 = vmatprep.subr.bf16.mxu1 %v12941_v10  ;;  %9058 = vmatprep.subr.bf16.mxu0 %v12941_v10 }
 0x187   :  { %9031 = vmatmul.mubr.msk.bf16.vlgmr.msra.gmra.mrb[20].mxu1 %vm173_vm0, %v322_v38  ;;  %9049 = vmatmul.mubr.msk.bf16.vlgmr.msra.gmra.mrb[20].mxu0 %vm173_vm0, %v852_v39 }
 0x188   :  { %9041 = vmatpush3.bf16.xpose.msra.mxu1 %v10771_v40  ;;  %9059 = vmatpush3.bf16.xpose.msra.mxu0 %v10676_v12 }
 0x189   :  { %9042 = vmatprep.mubr.msk.bf16.mxu1 %vm10405_vm1, %v12941_v10  ;;  %9060 = vmatprep.mubr.msk.bf16.mxu0 %vm10405_vm1, %v12941_v10 }
 0x18a   :  { %9052 = vmatprep.subr.bf16.mxu1 %v12941_v10  ;;  %9070 = vmatprep.subr.bf16.mxu0 %v12941_v10 }
 0x18f   :  { %9043 = vmatmul.mubr.msk.bf16.vlgmr.msra.gmra.mrb[24].mxu1 %vm173_vm0, %v324_v45  ;;  %9061 = vmatmul.mubr.msk.bf16.vlgmr.msra.gmra.mrb[24].mxu0 %vm173_vm0, %v854_v46 }
 0x190   :  { %9053 = vmatpush3.bf16.xpose.msra.mxu1 %v10661_v5  ;;  %9071 = vmatpush3.bf16.xpose.msra.mxu0 %v10679_v13 }
 0x191   :  { %9054 = vmatprep.mubr.msk.bf16.mxu1 %vm10405_vm1, %v12941_v10  ;;  %9072 = vmatprep.mubr.msk.bf16.mxu0 %vm10405_vm1, %v12941_v10 }
 0x192   :  { %9064 = vmatprep.subr.bf16.mxu1 %v12941_v10  ;;  %9082 = vmatprep.subr.bf16.mxu0 %v12941_v10 }
 0x197   :  { %9055 = vmatmul.mubr.msk.bf16.vlgmr.msra.gmra.mrb[28].mxu1 %vm173_vm0, %v853_v23  ;;  %9073 = vmatmul.mubr.msk.bf16.vlgmr.msra.gmra.mrb[28].mxu0 %vm173_vm0, %v856_v47 }
 0x198   :  { %9065 = vmatpush3.bf16.xpose.msra.mxu1 %v10704_v22  ;;  %9083 = vmatpush3.bf16.xpose.msra.mxu0 %v10693_v18 }
 0x199   :  { %9066 = vmatprep.mubr.msk.bf16.mxu1 %vm10405_vm1, %v12941_v10  ;;  %9084 = vmatprep.mubr.msk.bf16.mxu0 %vm10405_vm1, %v12941_v10 }
 0x19a   :  { %9076 = vmatprep.subr.bf16.mxu1 %v12941_v10  ;;  %9094 = vmatprep.subr.bf16.mxu0 %v12941_v10 }
 0x19f   :  { %9067 = vmatmul.mubr.msk.bf16.vlgmr.msra.gmra.mrb[32].mxu1 %vm173_vm0, %v855_v48  ;;  %9085 = vmatmul.mubr.msk.bf16.vlgmr.msra.gmra.mrb[32].mxu0 %vm173_vm0, %v858_v49 }
 0x1a0   :  { %9077 = vmatpush3.bf16.xpose.msra.mxu1 %v10748_v36  ;;  %9078 = vmatprep.mubr.msk.bf16.mxu1 %vm10405_vm1, %v12941_v10 }
 0x1a1   :  { %9088 = vmatprep.subr.bf16.mxu1 %v12941_v10  ;;  %9096 = vmatprep.mubr.msk.bf16.mxu0 %vm10405_vm1, %v12941_v10 }
 0x1a7   :  { %9079 = vmatmul.mubr.msk.bf16.vlgmr.msra.gmra.mrb[36].mxu1 %vm173_vm0, %v857_v50 }
 0x1a8   :  { %9089 = vmatpush3.bf16.xpose.msra.mxu1 %v10771_v40  ;;  %9090 = vmatprep.mubr.msk.bf16.mxu1 %vm10405_vm1, %v12941_v10 }
 0x1a9   :  { %9100 = vmatprep.subr.bf16.mxu1 %v12941_v10 }
 0x1af   :  { %9091 = vmatmul.mubr.msk.bf16.vlgmr.msra.gmra.mrb[40].mxu1 %vm173_vm0, %v859_v51 }
 0x1b0   :  { %9102 = vmatprep.mubr.msk.bf16.mxu1 %vm10405_vm1, %v12941_v10 }
 0x1eb   :  { %v1381_v59 = vpop.permute.xlu0 %1380  ;;  %v1334_v60 = vpop.permute.xlu1 %1333 }
 0x1ec   :  { %9095 = vmatpush3.bf16.msra.mxu0 %v1334_v60  ;;  %9101 = vmatpush3.bf16.msra.mxu1 %v1381_v59 }
 0x1ed   :  { %9106 = vmatprep.subr.bf16.mxu0 %v12941_v10  ;;  %9112 = vmatprep.subr.bf16.mxu1 %v12941_v10 }
 0x23a   :  { %v384_v2 = vpop.f32.mrb[4].mxu1 }
 0x23b   :  { %v733_v3 = vmul.f32 0.35355338, %v384_v2  ;;  %v9002_v4 = vpop.f32.mrb[5].mxu1 }
 0x23c   :  { %v387_v7 = vpop.f32.mrb[6].mxu1 }
 0x23d   :  { %v9003_v8 = vpop.f32.mrb[7].mxu1  ;;  %v10856_v9 = vadd.f32 %v733_v3, %v10853_v63 }
 0x23f   :  { %v750_v11 = vsel %vm749_vm10, %v10856_v9, -inf }
 0x240   :  { %751 = vmax.xlane.f32.xlu1 %v750_v11 }
 0x242   :  { %v433_v16 = vpop.f32.mrb[8].mxu1 }
 0x243   :  { %v734_v17 = vmul.f32 0.35355338, %v433_v16  ;;  %v9008_v20 = vpop.f32.mrb[9].mxu1 }
 0x244   :  { %v436_v21 = vpop.f32.mrb[10].mxu1 }
 0x245   :  { %v9009_v24 = vpop.f32.mrb[11].mxu1  ;;  %v10861_v25 = vadd.f32 %v734_v17, %v10853_v63 }
 0x247   :  { %v753_v33 = vsel %vm749_vm10, %v10861_v25, -inf }
 0x248   :  { %754 = vmax.xlane.f32.xlu0 %v753_v33 }
 0x24a   :  { %v482_v34 = vpop.f32.mrb[12].mxu1  ;;  %v580_v27 = vpop.f32.mrb[12].mxu0 }
 0x24b   :  { %v735_v35 = vmul.f32 0.35355338, %v482_v34  ;;  %v737_v38 = vmul.f32 0.35355338, %v580_v27  ;;  %v9014_v39 = vpop.f32.mrb[13].mxu1  ;;  %v9026_v45 = vpop.f32.mrb[13].mxu0 }
 0x24c   :  { %v485_v46 = vpop.f32.mrb[14].mxu1  ;;  %v583_v23 = vpop.f32.mrb[14].mxu0 }
 0x24d   :  { %v9015_v47 = vpop.f32.mrb[15].mxu1  ;;  %v9027_v48 = vpop.f32.mrb[15].mxu0  ;;  %v10866_v49 = vadd.f32 %v735_v35, %v10853_v63  ;;  %v10869_v50 = vadd.f32 %v737_v38, %v10853_v63 }
 0x24f   :  { %v756_v51 = vsel %vm749_vm10, %v10866_v49, -inf  ;;  %v762_v2 = vsel %vm749_vm10, %v10869_v50, -inf }
 0x250   :  { %757 = vmax.xlane.f32.xlu1 %v756_v51 }
 0x252   :  { %v531_v59 = vpop.f32.mrb[16].mxu1  ;;  %v678_v60 = vpop.f32.mrb[16].mxu0 }
 0x253   :  { %v736_v3 = vmul.f32 0.35355338, %v531_v59  ;;  %v739_v4 = vmul.f32 0.35355338, %v678_v60  ;;  %v9020_v7 = vpop.f32.mrb[17].mxu1  ;;  %v9038_v8 = vpop.f32.mrb[17].mxu0 }
 0x254   :  { %v534_v11 = vpop.f32.mrb[18].mxu1  ;;  %v681_v16 = vpop.f32.mrb[18].mxu0  ;;  %763 = vmax.xlane.f32.xlu1 %v762_v2 }
 0x255   :  { %v9021_v17 = vpop.f32.mrb[19].mxu1  ;;  %v9039_v20 = vpop.f32.mrb[19].mxu0  ;;  %v10876_v21 = vadd.f32 %v736_v3, %v10853_v63  ;;  %v10879_v24 = vadd.f32 %v739_v4, %v10853_v63 }
 0x257   :  { %v759_v33 = vsel %vm749_vm10, %v10876_v21, -inf  ;;  %v768_v35 = vsel %vm749_vm10, %v10879_v24, -inf }
 0x258   :  { %760 = vmax.xlane.f32.xlu0 %v759_v33 }
 0x25a   :  { %v629_v34 = vpop.f32.mrb[20].mxu1  ;;  %v913_v27 = vpop.f32.mrb[20].mxu0 }
 0x25b   :  { %v738_v38 = vmul.f32 0.35355338, %v629_v34  ;;  %v1220_v39 = vmul.f32 0.35355338, %v913_v27  ;;  %v9032_v45 = vpop.f32.mrb[21].mxu1  ;;  %v9050_v46 = vpop.f32.mrb[21].mxu0 }
 0x25c   :  { %v632_v23 = vpop.f32.mrb[22].mxu1  ;;  %769 = vmax.xlane.f32.xlu0 %v768_v35  ;;  %v916_v47 = vpop.f32.mrb[22].mxu0 }
 0x25d   :  { %v9033_v48 = vpop.f32.mrb[23].mxu1  ;;  %v9051_v51 = vpop.f32.mrb[23].mxu0  ;;  %v10886_v59 = vadd.f32 %v1220_v39, %v10853_v63  ;;  %v10889_v60 = vadd.f32 %v738_v38, %v10853_v63 }
 0x25f   :  { %v1236_v2 = vsel %vm749_vm10, %v10886_v59, -inf  ;;  %v765_v7 = vsel %vm749_vm10, %v10889_v60, -inf }
 0x260   :  { %1237 = vmax.xlane.f32.xlu0 %v1236_v2 }
 0x262   :  { %v727_v3 = vpop.f32.mrb[24].mxu1  ;;  %v999_v4 = vpop.f32.mrb[24].mxu0 }
 0x263   :  { %v740_v8 = vmul.f32 0.35355338, %v727_v3  ;;  %v1222_v11 = vmul.f32 0.35355338, %v999_v4  ;;  %v9044_v16 = vpop.f32.mrb[25].mxu1  ;;  %v9062_v17 = vpop.f32.mrb[25].mxu0 }
 0x264   :  { %v730_v20 = vpop.f32.mrb[26].mxu1  ;;  %766 = vmax.xlane.f32.xlu0 %v765_v7  ;;  %v1002_v33 = vpop.f32.mrb[26].mxu0 }
 0x265   :  { %v9045_v34 = vpop.f32.mrb[27].mxu1  ;;  %v9063_v27 = vpop.f32.mrb[27].mxu0  ;;  %v10896_v35 = vadd.f32 %v1222_v11, %v10853_v63  ;;  %v10899_v38 = vadd.f32 %v740_v8, %v10853_v63 }
 0x267   :  { %v1242_v39 = vsel %vm749_vm10, %v10896_v35, -inf  ;;  %v771_v23 = vsel %vm749_vm10, %v10899_v38, -inf }
 0x268   :  { %1243 = vmax.xlane.f32.xlu0 %v1242_v39 }
 0x26a   :  { %v956_v45 = vpop.f32.mrb[28].mxu1  ;;  %v1085_v46 = vpop.f32.mrb[28].mxu0 }
 0x26b   :  { %v1221_v47 = vmul.f32 0.35355338, %v956_v45  ;;  %v1224_v48 = vmul.f32 0.35355338, %v1085_v46  ;;  %v9056_v51 = vpop.f32.mrb[29].mxu1  ;;  %v9074_v2 = vpop.f32.mrb[29].mxu0 }
 0x26c   :  { %v959_v3 = vpop.f32.mrb[30].mxu1  ;;  %772 = vmax.xlane.f32.xlu0 %v771_v23  ;;  %v1088_v4 = vpop.f32.mrb[30].mxu0 }
 0x26d   :  { %v9057_v7 = vpop.f32.mrb[31].mxu1  ;;  %v9075_v11 = vpop.f32.mrb[31].mxu0  ;;  %v10906_v8 = vadd.f32 %v1221_v47, %v10853_v63  ;;  %v10909_v16 = vadd.f32 %v1224_v48, %v10853_v63 }
 0x26f   :  { %v1239_v17 = vsel %vm749_vm10, %v10906_v8, -inf  ;;  %v1248_v34 = vsel %vm749_vm10, %v10909_v16, -inf }
 0x270   :  { %1240 = vmax.xlane.f32.xlu1 %v1239_v17 }
 0x272   :  { %v1042_v20 = vpop.f32.mrb[32].mxu1  ;;  %v1171_v33 = vpop.f32.mrb[32].mxu0 }
 0x273   :  { %v1223_v27 = vmul.f32 0.35355338, %v1042_v20  ;;  %v1226_v39 = vmul.f32 0.35355338, %v1171_v33  ;;  %v9068_v45 = vpop.f32.mrb[33].mxu1  ;;  %v9086_v46 = vpop.f32.mrb[33].mxu0 }
 0x274   :  { %v1045_v23 = vpop.f32.mrb[34].mxu1  ;;  %v1174_v51 = vpop.f32.mrb[34].mxu0  ;;  %1249 = vmax.xlane.f32.xlu1 %v1248_v34 }
 0x275   :  { %v9069_v47 = vpop.f32.mrb[35].mxu1  ;;  %v9087_v2 = vpop.f32.mrb[35].mxu0  ;;  %v10916_v48 = vadd.f32 %v1223_v27, %v10853_v63  ;;  %v10919_v3 = vadd.f32 %v1226_v39, %v10853_v63 }
 0x277   :  { %v1245_v4 = vsel %vm749_vm10, %v10916_v48, -inf  ;;  %v1254_v7 = vsel %vm749_vm10, %v10919_v3, -inf }
 0x278   :  { %1246 = vmax.xlane.f32.xlu0 %v1245_v4  ;;  %1255 = vmax.xlane.f32.xlu1 %v1254_v7  ;;  %v872_v7 = vsel %vm867_vm8, %v10614_v54, 0 }
 0x27a   :  { %v1128_v11 = vpop.f32.mrb[36].mxu1 }
 0x27b   :  { %v1225_v17 = vmul.f32 0.35355338, %v1128_v11  ;;  %v9080_v20 = vpop.f32.mrb[37].mxu1  ;;  %v873_v11 = vsel %vm867_vm8, %v10612_v53, 0 }
 0x27c   :  { %v1131_v33 = vpop.f32.mrb[38].mxu1 }
 0x27d   :  { %v9081_v34 = vpop.f32.mrb[39].mxu1  ;;  %v10926_v45 = vadd.f32 %v1225_v17, %v10853_v63  ;;  %v10943_v17 = vpop.permute.xlu1 %1427 }
 0x27f   :  { %v1251_v27 = vsel %vm749_vm10, %v10926_v45, -inf }
 0x280   :  { %1252 = vmax.xlane.f32.xlu0 %v1251_v27  ;;  %v10946_v27 = vpop.permute.xlu0 %1474 }
 0x282   :  { %v1214_v39 = vpop.f32.mrb[40].mxu1 }
 0x283   :  { %v1227_v46 = vmul.f32 0.35355338, %v1214_v39  ;;  %v9092_v23 = vpop.f32.mrb[41].mxu1 }
 0x284   :  { %v1217_v51 = vpop.f32.mrb[42].mxu1 }
 0x285   :  { %v9093_v47 = vpop.f32.mrb[43].mxu1  ;;  %v10931_v2 = vadd.f32 %v1227_v46, %v10853_v63 }
 0x287   :  { %v1257_v4 = vsel %vm749_vm10, %v10931_v2, -inf }
 0x288   :  { %1258 = vmax.xlane.f32.xlu0 %v1257_v4 }
 0x289   :  { %1521 = vrot.lane.b32.xlu1 %v872_v7, %s10408_s26 }
 0x29e   :  { %1568 = vrot.lane.b32.xlu0 %v873_v11, %s10408_s26 }
 0x2cd   :  { %v752_v20 = vpop.xlane.xlu1 %751 }
 0x2ce   :  { %v774_v33 = vsub.f32 %v10856_v9, %v752_v20 }
 0x2d0   :  { %v782_v34 = vmul.f32 1.442695, %v774_v33 }
 0x2d2   :  { %10092 = vpow2.f32 %v782_v34 }
 0x2d5   :  { %v755_v39 = vpop.xlane.xlu0 %754 }
 0x2d6   :  { %v775_v46 = vsub.f32 %v10861_v25, %v755_v39 }
 0x2d8   :  { %v784_v23 = vmul.f32 1.442695, %v775_v46 }
 0x2da   :  { %10094 = vpow2.f32 %v784_v23 }
 0x2dc   :  { %v10949_v51 = vpop.eup %10092 }
 0x2dd   :  { %v758_v47 = vpop.xlane.xlu1 %757  ;;  %v798_v4 = vsel %vm749_vm10, %v10949_v51, 0.0 }
 0x2de   :  { %v776_v7 = vsub.f32 %v10866_v49, %v758_v47  ;;  %799 = vadd.xlane.f32.xlu1 %v798_v4 }
 0x2e0   :  { %v786_v11 = vmul.f32 1.442695, %v776_v7 }
 0x2e1   :  { %v764_v9 = vpop.xlane.xlu1 %763 }
 0x2e2   :  { %10096 = vpow2.f32 %v786_v11  ;;  %v778_v20 = vsub.f32 %v10869_v50, %v764_v9 }
 0x2e4   :  { %v10955_v33 = vpop.eup %10094  ;;  %v790_v34 = vmul.f32 1.442695, %v778_v20 }
 0x2e5   :  { %v761_v25 = vpop.xlane.xlu0 %760  ;;  %v801_v39 = vsel %vm749_vm10, %v10955_v33, 0.0 }
 0x2e6   :  { %10098 = vpow2.f32 %v790_v34  ;;  %v777_v46 = vsub.f32 %v10876_v21, %v761_v25  ;;  %802 = vadd.xlane.f32.xlu0 %v801_v39 }
 0x2e8   :  { %v788_v23 = vmul.f32 1.442695, %v777_v46 }
 0x2e9   :  { %v10960_v58 = vpop.xlane.xlu0 %769 }
 0x2ea   :  { %10100 = vpow2.f32 %v788_v23 }
 0x2ec   :  { %v10962_v49 = vpop.eup %10096 }
 0x2ed   :  { %v1238_v47 = vpop.xlane.xlu0 %1237  ;;  %v804_v50 = vsel %vm749_vm10, %v10962_v49, 0.0 }
 0x2ee   :  { %v1260_v4 = vsub.f32 %v10886_v59, %v1238_v47  ;;  %805 = vadd.xlane.f32.xlu1 %v804_v50 }
 0x2f0   :  { %v10967_v7 = vpop.eup %10098  ;;  %v1268_v11 = vmul.f32 1.442695, %v1260_v4 }
 0x2f1   :  { %v767_v9 = vpop.xlane.xlu0 %766  ;;  %v810_v21 = vsel %vm749_vm10, %v10967_v7, 0.0 }
 0x2f2   :  { %10102 = vpow2.f32 %v1268_v11  ;;  %v779_v20 = vsub.f32 %v10889_v60, %v767_v9  ;;  %811 = vadd.xlane.f32.xlu1 %v810_v21 }
 0x2f4   :  { %v10972_v34 = vpop.eup %10100  ;;  %v792_v25 = vmul.f32 1.442695, %v779_v20 }
 0x2f5   :  { %v1244_v39 = vpop.xlane.xlu0 %1243  ;;  %v807_v46 = vsel %vm749_vm10, %v10972_v34, 0.0 }
 0x2f6   :  { %10104 = vpow2.f32 %v792_v25  ;;  %v1262_v59 = vsub.f32 %v10896_v35, %v1244_v39  ;;  %808 = vadd.xlane.f32.xlu0 %v807_v46 }
 0x2f8   :  { %v1272_v23 = vmul.f32 1.442695, %v1262_v59 }
 0x2f9   :  { %v773_v21 = vpop.xlane.xlu0 %772 }
 0x2fa   :  { %10106 = vpow2.f32 %v1272_v23 }
 0x2fc   :  { %v10977_v47 = vpop.eup %10102 }
 0x2fd   :  { %v1241_v50 = vpop.xlane.xlu1 %1240  ;;  %v1284_v60 = vsel %vm749_vm10, %v10977_v47, 0.0 }
 0x2fe   :  { %v1261_v4 = vsub.f32 %v10906_v8, %v1241_v50  ;;  %1285 = vadd.xlane.f32.xlu1 %v1284_v60 }
 0x300   :  { %v10982_v11 = vpop.eup %10104  ;;  %v1270_v9 = vmul.f32 1.442695, %v1261_v4 }
 0x301   :  { %v1250_v20 = vpop.xlane.xlu1 %1249  ;;  %v813_v35 = vsel %vm749_vm10, %v10982_v11, 0.0 }
 0x302   :  { %10108 = vpow2.f32 %v1270_v9  ;;  %v1264_v25 = vsub.f32 %v10909_v16, %v1250_v20  ;;  %814 = vadd.xlane.f32.xlu0 %v813_v35 }
 0x304   :  { %v10987_v39 = vpop.eup %10106  ;;  %v1276_v46 = vmul.f32 1.442695, %v1264_v25 }
 0x305   :  { %v1247_v59 = vpop.xlane.xlu0 %1246  ;;  %v1290_v8 = vsel %vm749_vm10, %v10987_v39, 0.0 }
 0x306   :  { %10110 = vpow2.f32 %v1276_v46  ;;  %v1263_v23 = vsub.f32 %v10916_v48, %v1247_v59  ;;  %1291 = vadd.xlane.f32.xlu1 %v1290_v8  ;;  %v874_v8 = vsel %vm867_vm8, %v10587_v31, 0 }
 0x308   :  { %v1274_v50 = vmul.f32 1.442695, %v1263_v23  ;;  %v1256_v23 = vpop.xlane.xlu1 %1255 }
 0x30a   :  { %10112 = vpow2.f32 %v1274_v50  ;;  %v875_v50 = vsel %vm867_vm8, %v10582_v29, 0  ;;  %vm11284_vm8 = vmpackc.low %vm2956_vm5, %vm2956_vm5 }
 0x30c   :  { %v10992_v60 = vpop.eup %10108 }
 0x30d   :  { %v1253_v4 = vpop.xlane.xlu0 %1252  ;;  %v1287_v16 = vsel %vm749_vm10, %v10992_v60, 0.0 }
 0x30e   :  { %v1265_v9 = vsub.f32 %v10926_v45, %v1253_v4  ;;  %1288 = vadd.xlane.f32.xlu0 %v1287_v16  ;;  %v1266_v4 = vsub.f32 %v10919_v3, %v1256_v23  ;;  %v780_v16 = vsub.f32 %v10879_v24, %v10960_v58 }
 0x310   :  { %v10997_v20 = vpop.eup %10110  ;;  %v1278_v35 = vmul.f32 1.442695, %v1265_v9  ;;  %v1280_v9 = vmul.f32 1.442695, %v1266_v4  ;;  %v336_v4 = vsel %vm332_vm11, %v10596_v41, 0 }
 0x311   :  { %v1296_v25 = vsel %vm749_vm10, %v10997_v20, 0.0 }
 0x312   :  { %10114 = vpow2.f32 %v1278_v35  ;;  %1297 = vadd.xlane.f32.xlu1 %v1296_v25  ;;  %v794_v25 = vmul.f32 1.442695, %v780_v16  ;;  %v338_v16 = vsel %vm332_vm11, %v10612_v53, 0 }
 0x313   :  { %10116 = vpow2.f32 %v1280_v9  ;;  %v334_v9 = vsel %vm332_vm11, %v10579_v28, 0 }
 0x314   :  { %v11001_v48 = vpop.eup %10112  ;;  %10118 = vpow2.f32 %v794_v25  ;;  %v339_v25 = vsel %vm332_vm11, %v10587_v31, 0 }
 0x315   :  { %v1293_v46 = vsel %vm749_vm10, %v11001_v48, 0.0  ;;  %v1259_v35 = vpop.xlane.xlu0 %1258 }
 0x316   :  { %1294 = vadd.xlane.f32.xlu1 %v1293_v46  ;;  %v1267_v46 = vsub.f32 %v10931_v2, %v1259_v35  ;;  %v337_v35 = vsel %vm332_vm11, %v10614_v54, 0 }
 0x31c   :  { %v11005_v59 = vpop.eup %10114 }
 0x31d   :  { %v1299_v45 = vsel %vm749_vm10, %v11005_v59, 0.0  ;;  %v11022_v19 = vpop.eup %10116 }
 0x31e   :  { %1300 = vadd.xlane.f32.xlu0 %v1299_v45  ;;  %v781_v45 = vsub.f32 %v10899_v38, %v773_v21  ;;  %v1302_v3 = vsel %vm749_vm10, %v11022_v19, 0.0  ;;  %v11026_v23 = vpop.eup %10118  ;;  %v333_v21 = vsel %vm332_vm11, %v10584_v30, 0 }
 0x31f   :  { %v816_v58 = vsel %vm749_vm10, %v11026_v23, 0.0 }
 0x320   :  { %v796_v10 = vmul.f32 1.442695, %v781_v45 }
 0x327   :  { %1615 = vrot.lane.b32.xlu1 %v874_v8, %s10408_s26  ;;  %v1282_v8 = vmul.f32 1.442695, %v1267_v46  ;;  %v1522_v46 = vpop.permute.xlu1 %1521 }
 0x329   :  { %10120 = vpow2.f32 %v1282_v8 }
 0x32a   :  { %10122 = vpow2.f32 %v796_v10 }
 0x333   :  { %v11030_v24 = vpop.eup %10120 }
 0x334   :  { %1662 = vrot.lane.b32.xlu0 %v875_v50, %s10408_s26  ;;  %v1305_v38 = vsel %vm749_vm10, %v11030_v24, 0.0  ;;  %v11034_v2 = vpop.eup %10122  ;;  %v335_v50 = vsel %vm332_vm11, %v10598_v42, 0 }
 0x335   :  { %v819_v10 = vsel %vm749_vm10, %v11034_v2, 0.0 }
 0x34b   :  { %1303 = vadd.xlane.f32.xlu1 %v1302_v3 }
 0x34f   :  { %817 = vadd.xlane.f32.xlu1 %v816_v58  ;;  %v1569_v58 = vpop.permute.xlu0 %1568 }
 0x353   :  { %1306 = vadd.xlane.f32.xlu0 %v1305_v38 }
 0x357   :  { %820 = vadd.xlane.f32.xlu0 %v819_v10 }
 0x360   :  { %1709 = vrot.lane.b32.xlu1 %v333_v21, %s10408_s26 }
 0x364   :  { %1803 = vrot.lane.b32.xlu1 %v335_v50, %s10408_s26 }
 0x368   :  { %1850 = vrot.lane.b32.xlu1 %v336_v4, %s10408_s26 }
 0x36b   :  { %v11055_v45 = vpop.xlane.xlu1 %799 }
 0x36c   :  { %1944 = vrot.lane.b32.xlu1 %v338_v16, %s10408_s26 }
 0x36d   :  { %1756 = vrot.lane.b32.xlu0 %v334_v9, %s10408_s26 }
 0x370   :  { %2038 = vrot.lane.b32.xlu1 %v340_v52, %s10408_s26 }
 0x371   :  { %1897 = vrot.lane.b32.xlu0 %v337_v35, %s10408_s26 }
 0x373   :  { %v11061_v10 = vpop.xlane.xlu0 %802 }
 0x375   :  { %1991 = vrot.lane.b32.xlu0 %v339_v25, %s10408_s26  ;;  %v12972_v25 = vmov 0.0  }
 0x37b   :  { %v11057_v8 = vpop.xlane.xlu1 %805 }
 0x37f   :  { %v11059_v3 = vpop.xlane.xlu1 %811 }
 0x383   :  { %v11063_v21 = vpop.xlane.xlu0 %808 }
 0x38b   :  { %v1286_v38 = vpop.xlane.xlu1 %1285 }
 0x38c   :  { %10124 = vrcp.f32 %v1286_v38 }
 0x38f   :  { %v11065_v16 = vpop.xlane.xlu0 %814 }
 0x393   :  { %v1292_v50 = vpop.xlane.xlu1 %1291 }
 0x394   :  { %10126 = vrcp.f32 %v1292_v50 }
 0x396   :  { %v10125_v4 = vpop.eup %10124 }
 0x397   :  { %v1316_v9 = vmul.f32 %v10125_v4, %v10977_v47 }
 0x399   :  { %v1324_v52 = vpack.c.bf16 %v1316_v9, %v1316_v9 }
 0x39b   :  { %v1289_v35 = vpop.xlane.xlu0 %1288  ;;  %9097 = vmatmul.mubr.msk.bf16.vlgmr.msra.gmra.mrb[36].mxu0 %vm749_vm10, %v1324_v52 }
 0x39c   :  { %10128 = vrcp.f32 %v1289_v35  ;;  %9107 = vmatpush3.bf16.msra.mxu0 %v10943_v17  ;;  %9108 = vmatprep.mubr.msk.bf16.mxu0 %vm10405_vm1, %v12972_v25 }
 0x39d   :  { %9118 = vmatprep.subr.bf16.mxu0 %v12972_v25 }
 0x39e   :  { %v10127_v38 = vpop.eup %10126 }
 0x39f   :  { %v1298_v57 = vpop.xlane.xlu1 %1297  ;;  %v1318_v50 = vmul.f32 %v10127_v38, %v10987_v39 }
 0x3a0   :  { %10130 = vrcp.f32 %v1298_v57 }
 0x3a1   :  { %v1326_v55 = vpack.c.bf16 %v1318_v50, %v1318_v50 }
 0x3a3   :  { %9109 = vmatmul.mubr.msk.bf16.vlgmr.msra.gmra.mrb[40].mxu0 %vm749_vm10, %v1326_v55  ;;  %v1295_v47 = vpop.xlane.xlu1 %1294 }
 0x3a4   :  { %9119 = vmatpush3.bf16.msra.mxu0 %v1522_v46  ;;  %10132 = vrcp.f32 %v1295_v47  ;;  %9120 = vmatprep.mubr.msk.bf16.mxu0 %vm10405_vm1, %v12972_v25 }
 0x3a5   :  { %9130 = vmatprep.subr.bf16.mxu0 %v12972_v25 }
 0x3a6   :  { %v10129_v17 = vpop.eup %10128 }
 0x3a7   :  { %v1317_v4 = vmul.f32 %v10129_v17, %v10992_v60  ;;  %v1616_v35 = vpop.permute.xlu1 %1615 }
 0x3a9   :  { %v1325_v9 = vpack.c.bf16 %v1317_v4, %v1317_v4 }
 0x3aa   :  { %v10131_v52 = vpop.eup %10130 }
 0x3ab   :  { %9103 = vmatmul.mubr.msk.bf16.vlgmr.msra.gmra.mrb[44].mxu1 %vm749_vm10, %v1325_v9  ;;  %v1301_v39 = vpop.xlane.xlu0 %1300  ;;  %v1320_v57 = vmul.f32 %v10131_v52, %v10997_v20 }
 0x3ac   :  { %9113 = vmatpush3.bf16.msra.mxu1 %v10946_v27  ;;  %10134 = vrcp.f32 %v1301_v39  ;;  %9114 = vmatprep.mubr.msk.bf16.mxu1 %vm10405_vm1, %v12972_v25 }
 0x3ad   :  { %v1328_v55 = vpack.c.bf16 %v1320_v57, %v1320_v57  ;;  %9124 = vmatprep.subr.bf16.mxu1 %v12972_v25 }
 0x3ae   :  { %v10133_v46 = vpop.eup %10132 }
 0x3af   :  { %9121 = vmatmul.mubr.msk.bf16.vlgmr.msra.gmra.mrb[44].mxu0 %vm749_vm10, %v1328_v55  ;;  %v1319_v60 = vmul.f32 %v10133_v46, %v11001_v48  ;;  %v1663_v48 = vpop.permute.xlu0 %1662 }
 0x3b0   :  { %9131 = vmatpush3.bf16.msra.mxu0 %v1616_v35  ;;  %9132 = vmatprep.mubr.msk.bf16.mxu0 %vm10405_vm1, %v12972_v25 }
 0x3b1   :  { %v1327_v20 = vpack.c.bf16 %v1319_v60, %v1319_v60  ;;  %9142 = vmatprep.subr.bf16.mxu0 %v12972_v25 }
 0x3b3   :  { %9115 = vmatmul.mubr.msk.bf16.vlgmr.msra.gmra.mrb[48].mxu1 %vm749_vm10, %v1327_v20 }
 0x3b4   :  { %9125 = vmatpush3.bf16.msra.mxu1 %v1569_v58  ;;  %9126 = vmatprep.mubr.msk.bf16.mxu1 %vm10405_vm1, %v12972_v25 }
 0x3b5   :  { %9136 = vmatprep.subr.bf16.mxu1 %v12972_v25 }
 0x3b6   :  { %v10135_v27 = vpop.eup %10134 }
 0x3b7   :  { %v1321_v38 = vmul.f32 %v10135_v27, %v11005_v59 }
 0x3b9   :  { %v1329_v50 = vpack.c.bf16 %v1321_v38, %v1321_v38 }
 0x3bb   :  { %9127 = vmatmul.mubr.msk.bf16.vlgmr.msra.gmra.mrb[52].mxu1 %vm749_vm10, %v1329_v50 }
 0x3bc   :  { %9137 = vmatpush3.bf16.msra.mxu1 %v1663_v48  ;;  %9138 = vmatprep.mubr.msk.bf16.mxu1 %vm10405_vm1, %v12972_v25 }
 0x3bd   :  { %9148 = vmatprep.subr.bf16.mxu1 %v12972_v25 }
 0x3d8   :  { %v1304_v47 = vpop.xlane.xlu1 %1303 }
 0x3d9   :  { %10136 = vrcp.f32 %v1304_v47 }
 0x3da   :  { %10138 = vrcp.f32 %v11055_v45 }
 0x3dc   :  { %v818_v17 = vpop.xlane.xlu1 %817 }
 0x3e0   :  { %v1307_v58 = vpop.xlane.xlu0 %1306  ;;  %v1710_v39 = vpop.permute.xlu1 %1709 }
 0x3e1   :  { %10140 = vrcp.f32 %v1307_v58 }
 0x3e2   :  { %10142 = vrcp.f32 %v11061_v10 }
 0x3e3   :  { %v10137_v4 = vpop.eup %10136  ;;  %10144 = vrcp.f32 %v11057_v8 }
 0x3e4   :  { %v1322_v59 = vmul.f32 %v10137_v4, %v11022_v19  ;;  %v10139_v52 = vpop.eup %10138  ;;  %v821_v45 = vpop.xlane.xlu0 %820  ;;  %10146 = vrcp.f32 %v11059_v3 }
 0x3e5   :  { %v830_v57 = vmul.f32 %v10139_v52, %v10949_v51  ;;  %10148 = vrcp.f32 %v11063_v21  ;;  %v1804_v60 = vpop.permute.xlu1 %1803 }
 0x3e6   :  { %v1330_v9 = vpack.c.bf16 %v1322_v59, %v1322_v59  ;;  %10150 = vrcp.f32 %v11065_v16 }
 0x3e7   :  { %v838_v46 = vpack.c.bf16 %v830_v57, %v830_v57  ;;  %10152 = vrcp.f32 %v818_v17 }
 0x3e8   :  { %9133 = vmatmul.mubr.msk.bf16.vlgmr.msra.gmra.mrb[48].mxu0 %vm749_vm10, %v1330_v9  ;;  %v1757_v20 = vpop.permute.xlu0 %1756  ;;  %10154 = vrcp.f32 %v821_v45 }
 0x3e9   :  { %9143 = vmatpush3.bf16.msra.mxu0 %v1710_v39  ;;  %9144 = vmatprep.mubr.msk.bf16.mxu0 %vm10405_vm1, %v12972_v25  ;;  %v1851_v50 = vpop.permute.xlu1 %1850 }
 0x3ea   :  { %9154 = vmatprep.subr.bf16.mxu0 %v12972_v25 }
 0x3eb   :  { %v10141_v55 = vpop.eup %10140 }
 0x3ec   :  { %v1323_v19 = vmul.f32 %v10141_v55, %v11030_v24  ;;  %v10143_v8 = vpop.eup %10142  ;;  %v1898_v48 = vpop.permute.xlu0 %1897  ;;  %v2090_v55 = vsel %vm11154_vm15, %v10655_v1, 0 }
 0x3ed   :  { %v10145_v35 = vpop.eup %10144  ;;  %v831_v51 = vmul.f32 %v10143_v8, %v10955_v33  ;;  %v1945_v4 = vpop.permute.xlu1 %1944  ;;  %v2093_v8 = vsel %vm11154_vm15, %v10721_v26, 0 }
 0x3ee   :  { %v1331_v10 = vpack.c.bf16 %v1323_v19, %v1323_v19  ;;  %v832_v24 = vmul.f32 %v10145_v35, %v10962_v49  ;;  %v10147_v3 = vpop.eup %10146  ;;  %v2092_v19 = vsel %vm11154_vm15, %v10687_v14, 0  ;;  %v2096_v35 = vsel %vm11154_vm15, %v10725_v32, 0 }
 0x3ef   :  { %v839_v21 = vpack.c.bf16 %v831_v51, %v831_v51  ;;  %v10149_v38 = vpop.eup %10148  ;;  %v834_v49 = vmul.f32 %v10147_v3, %v10967_v7 }
 0x3f0   :  { %9139 = vmatmul.mubr.msk.bf16.vlgmr.msra.gmra.mrb[56].mxu1 %vm749_vm10, %v1331_v10  ;;  %9145 = vmatmul.mubr.msk.bf16.vlgmr.msra.gmra.mrb[36].mxu0 %vm749_vm10, %v838_v46  ;;  %v840_v27 = vpack.c.bf16 %v832_v24, %v832_v24  ;;  %v833_v33 = vmul.f32 %v10149_v38, %v10972_v34  ;;  %v10151_v16 = vpop.eup %10150  ;;  %v1992_v59 = vpop.permute.xlu0 %1991  ;;  %v2094_v10 = vsel %vm11154_vm15, %v10689_v15, 0  ;;  %v2095_v46 = vsel %vm11154_vm15, %v10760_v37, 0 }
 0x3f1   :  { %9149 = vmatpush3.bf16.msra.mxu1 %v1757_v20  ;;  %9155 = vmatpush3.bf16.msra.mxu0 %v1804_v60  ;;  %v842_v58 = vpack.c.bf16 %v834_v49, %v834_v49  ;;  %v10153_v17 = vpop.eup %10152  ;;  %v835_v7 = vmul.f32 %v10151_v16, %v10982_v11  ;;  %v2039_v45 = vpop.permute.xlu1 %2038  ;;  %v2097_v60 = vsel %vm11154_vm15, %v10783_v44, 0 }
 0x3f2   :  { %9150 = vmatprep.mubr.msk.bf16.mxu1 %vm10405_vm1, %v12972_v25  ;;  %9156 = vmatprep.mubr.msk.bf16.mxu0 %vm10405_vm1, %v12972_v25  ;;  %v841_v47 = vpack.c.bf16 %v833_v33, %v833_v33  ;;  %v836_v34 = vmul.f32 %v10153_v17, %v11026_v23  ;;  %v10155_v39 = vpop.eup %10154 }
 0x3f3   :  { %9160 = vmatprep.subr.bf16.mxu1 %v12972_v25  ;;  %9166 = vmatprep.subr.bf16.mxu0 %v12972_v25  ;;  %v843_v9 = vpack.c.bf16 %v835_v7, %v835_v7  ;;  %v837_v11 = vmul.f32 %v10155_v39, %v11034_v2  ;;  %v2091_v2 = vsel %vm11154_vm15, %v10670_v6, 0 }
 0x3f4   :  { %v844_v52 = vpack.c.bf16 %v836_v34, %v836_v34 }
 0x3f5   :  { %v845_v57 = vpack.c.bf16 %v837_v11, %v837_v11 }
 0x3f8   :  { %9151 = vmatmul.mubr.msk.bf16.vlgmr.msra.gmra.mrb[44].mxu1 %vm749_vm10, %v839_v21  ;;  %9157 = vmatmul.mubr.msk.bf16.vlgmr.msra.gmra.mrb[40].mxu0 %vm749_vm10, %v840_v27 }
 0x3f9   :  { %9161 = vmatpush3.bf16.msra.mxu1 %v1851_v50  ;;  %9167 = vmatpush3.bf16.msra.mxu0 %v1898_v48 }
 0x3fa   :  { %9162 = vmatprep.mubr.msk.bf16.mxu1 %vm10405_vm1, %v12972_v25  ;;  %9168 = vmatprep.mubr.msk.bf16.mxu0 %vm10405_vm1, %v12972_v25 }
 0x3fb   :  { %9172 = vmatprep.subr.bf16.mxu1 %v12972_v25  ;;  %9178 = vmatprep.subr.bf16.mxu0 %v12972_v25 }
 0x400   :  { %9163 = vmatmul.mubr.msk.bf16.vlgmr.msra.gmra.mrb[48].mxu1 %vm749_vm10, %v841_v47  ;;  %9169 = vmatmul.mubr.msk.bf16.vlgmr.msra.gmra.mrb[44].mxu0 %vm749_vm10, %v842_v58 }
 0x401   :  { %9173 = vmatpush3.bf16.msra.mxu1 %v1945_v4  ;;  %9179 = vmatpush3.bf16.msra.mxu0 %v1992_v59 }
 0x402   :  { %9174 = vmatprep.mubr.msk.bf16.mxu1 %vm10405_vm1, %v12972_v25  ;;  %9180 = vmatprep.mubr.msk.bf16.mxu0 %vm10405_vm1, %v12972_v25 }
 0x403   :  { %9184 = vmatprep.subr.bf16.mxu1 %v12972_v25  ;;  %9190 = vmatprep.subr.bf16.mxu0 %v12972_v25 }
 0x408   :  { %9175 = vmatmul.mubr.msk.bf16.vlgmr.msra.gmra.mrb[52].mxu1 %vm749_vm10, %v843_v9  ;;  %9181 = vmatmul.mubr.msk.bf16.vlgmr.msra.gmra.mrb[48].mxu0 %vm749_vm10, %v844_v52 }
 0x409   :  { %9185 = vmatpush3.bf16.msra.mxu1 %v2039_v45  ;;  %9186 = vmatprep.mubr.msk.bf16.mxu1 %vm10405_vm1, %v12972_v25 }
 0x40a   :  { %9191 = vmatpush3.bf16.xpose.msra.mxu0 %v10651_v0  ;;  %9192 = vmatprep.mubr.msk.bf16.mxu0 %vm10405_vm1, %v12972_v25 }
 0x40b   :  { %9196 = vmatprep.subr.bf16.mxu1 %v12972_v25  ;;  %9202 = vmatprep.subr.bf16.mxu0 %v12972_v25 }
 0x410   :  { %9187 = vmatmul.mubr.msk.bf16.vlgmr.msra.gmra.mrb[56].mxu1 %vm749_vm10, %v845_v57 }
 0x411   :  { %9193 = vmatmul.mubr.msk.bf16.vlgmr.msra.gmra.mrb[52].mxu0 %vm173_vm0, %v2090_v55  ;;  %9198 = vmatprep.mubr.msk.bf16.mxu1 %vm10405_vm1, %v12972_v25 }
 0x412   :  { %9197 = vmatpush3.bf16.xpose.msra.mxu1 %v10661_v5  ;;  %9203 = vmatpush3.bf16.xpose.msra.mxu0 %v10676_v12 }
 0x413   :  { %9204 = vmatprep.mubr.msk.bf16.mxu0 %vm10405_vm1, %v12972_v25  ;;  %9208 = vmatprep.subr.bf16.mxu1 %v12972_v25 }
 0x414   :  { %9214 = vmatprep.subr.bf16.mxu0 %v12972_v25 }
 0x419   :  { %9199 = vmatmul.mubr.msk.bf16.vlgmr.msra.gmra.mrb[60].mxu1 %vm173_vm0, %v2091_v2  ;;  %9205 = vmatmul.mubr.msk.bf16.vlgmr.msra.gmra.mrb[56].mxu0 %vm173_vm0, %v2092_v19 }
 0x41a   :  { %9209 = vmatpush3.bf16.xpose.msra.mxu1 %v10704_v22  ;;  %9215 = vmatpush3.bf16.xpose.msra.mxu0 %v10679_v13 }
 0x41b   :  { %9210 = vmatprep.mubr.msk.bf16.mxu1 %vm10405_vm1, %v12972_v25  ;;  %9216 = vmatprep.mubr.msk.bf16.mxu0 %vm10405_vm1, %v12972_v25 }
 0x41c   :  { %9220 = vmatprep.subr.bf16.mxu1 %v12972_v25  ;;  %9226 = vmatprep.subr.bf16.mxu0 %v12972_v25 }
 0x421   :  { %9211 = vmatmul.mubr.msk.bf16.vlgmr.msra.gmra.mrb[64].mxu1 %vm173_vm0, %v2093_v8  ;;  %9217 = vmatmul.mubr.msk.bf16.vlgmr.msra.gmra.mrb[60].mxu0 %vm173_vm0, %v2094_v10 }
 0x422   :  { %9221 = vmatpush3.bf16.xpose.msra.mxu1 %v10748_v36  ;;  %9227 = vmatpush3.bf16.xpose.msra.mxu0 %v10693_v18 }
 0x423   :  { %9222 = vmatprep.mubr.msk.bf16.mxu1 %vm10405_vm1, %v12972_v25  ;;  %9228 = vmatprep.mubr.msk.bf16.mxu0 %vm10405_vm1, %v12972_v25 }
 0x424   :  { %9232 = vmatprep.subr.bf16.mxu1 %v12972_v25  ;;  %9238 = vmatprep.subr.bf16.mxu0 %v12972_v25 }
 0x429   :  { %9223 = vmatmul.mubr.msk.bf16.vlgmr.msra.gmra.mrb[68].mxu1 %vm173_vm0, %v2095_v46  ;;  %9229 = vmatmul.mubr.msk.bf16.vlgmr.msra.gmra.mrb[64].mxu0 %vm173_vm0, %v2096_v35 }
 0x42a   :  { %9233 = vmatpush3.bf16.xpose.msra.mxu1 %v10771_v40  ;;  %9234 = vmatprep.mubr.msk.bf16.mxu1 %vm10405_vm1, %v12972_v25 }
 0x42b   :  { %9244 = vmatprep.subr.bf16.mxu1 %v12972_v25  ;;  %9240 = vmatprep.mubr.msk.bf16.mxu0 %vm10405_vm1, %v12972_v25 }
 0x431   :  { %9235 = vmatmul.mubr.msk.bf16.vlgmr.msra.gmra.mrb[72].mxu1 %vm173_vm0, %v2097_v60 }
 0x432   :  { %9246 = vmatprep.mubr.msk.bf16.mxu1 %vm10405_vm1, %v12972_v25 }
 0x4e4   :  { %v2151_v20 = vpop.f32.mrb[52].mxu0 }
 0x4e5   :  { %v2458_v51 = vmul.f32 0.35355338, %v2151_v20  ;;  %v9194_v24 = vpop.f32.mrb[53].mxu0 }
 0x4e6   :  { %v2154_v3 = vpop.f32.mrb[54].mxu0 }
 0x4e7   :  { %v9195_v21 = vpop.f32.mrb[55].mxu0  ;;  %v11224_v27 = vadd.f32 %v2458_v51, %v10853_v63 }
 0x4e9   :  { %v2474_v38 = vsel %vm749_vm10, %v11224_v27, -inf }
 0x4ea   :  { %2475 = vmax.xlane.f32.xlu0 %v2474_v38 }
 0x4ec   :  { %v2194_v50 = vpop.f32.mrb[60].mxu1  ;;  %v2237_v48 = vpop.f32.mrb[56].mxu0 }
 0x4ed   :  { %v2459_v33 = vmul.f32 0.35355338, %v2194_v50  ;;  %v2460_v49 = vmul.f32 0.35355338, %v2237_v48  ;;  %v9200_v16 = vpop.f32.mrb[61].mxu1  ;;  %v9206_v47 = vpop.f32.mrb[57].mxu0 }
 0x4ee   :  { %v2197_v58 = vpop.f32.mrb[62].mxu1  ;;  %v2240_v17 = vpop.f32.mrb[58].mxu0 }
 0x4ef   :  { %v9201_v4 = vpop.f32.mrb[63].mxu1  ;;  %v9207_v59 = vpop.f32.mrb[59].mxu0  ;;  %v11229_v7 = vadd.f32 %v2460_v49, %v10853_v63  ;;  %v11232_v34 = vadd.f32 %v2459_v33, %v10853_v63 }
 0x4f1   :  { %v2480_v9 = vsel %vm749_vm10, %v11229_v7, -inf  ;;  %v2477_v52 = vsel %vm749_vm10, %v11232_v34, -inf }
 0x4f2   :  { %2481 = vmax.xlane.f32.xlu0 %v2480_v9  ;;  %2478 = vmax.xlane.f32.xlu1 %v2477_v52  ;;  %v12975_v52 = vmov 0  }
 0x4f4   :  { %v2280_v39 = vpop.f32.mrb[64].mxu1  ;;  %v2323_v45 = vpop.f32.mrb[60].mxu0 }
 0x4f5   :  { %v2461_v11 = vmul.f32 0.35355338, %v2280_v39  ;;  %v2462_v57 = vmul.f32 0.35355338, %v2323_v45  ;;  %v9212_v55 = vpop.f32.mrb[65].mxu1  ;;  %v9218_v2 = vpop.f32.mrb[61].mxu0 }
 0x4f6   :  { %v2283_v19 = vpop.f32.mrb[66].mxu1  ;;  %v2326_v8 = vpop.f32.mrb[62].mxu0  ;;  %v2098_v39 = vsel %vm11154_vm15, 65537, %v12975_v52 }
 0x4f7   :  { %v9213_v10 = vpop.f32.mrb[67].mxu1  ;;  %v9219_v46 = vpop.f32.mrb[63].mxu0  ;;  %v2470_v35 = vadd.f32 %v2462_v57, %v10853_v63  ;;  %v11240_v60 = vadd.f32 %v2461_v11, %v10853_v63  ;;  %v11254_v45 = vrot.slane %v2098_v39, %v10624_v56 }
 0x4f9   :  { %v2486_v20 = vsel %vm749_vm10, %v2470_v35, -inf  ;;  %v2483_v51 = vsel %vm749_vm10, %v11240_v60, -inf }
 0x4fa   :  { %2487 = vmax.xlane.f32.xlu1 %v2486_v20  ;;  %2484 = vmax.xlane.f32.xlu0 %v2483_v51 }
 0x4fc   :  { %v2366_v24 = vpop.f32.mrb[68].mxu1  ;;  %v2409_v3 = vpop.f32.mrb[64].mxu0 }
 0x4fd   :  { %v2464_v21 = vmul.f32 0.35355338, %v2409_v3  ;;  %v9224_v38 = vpop.f32.mrb[69].mxu1  ;;  %v9230_v50 = vpop.f32.mrb[65].mxu0  ;;  %v2463_v51 = vmul.f32 0.35355338, %v2366_v24 }
 0x4fe   :  { %v2369_v48 = vpop.f32.mrb[70].mxu1  ;;  %v2412_v33 = vpop.f32.mrb[66].mxu0  ;;  %v2968_v24 = vsel %vm11284_vm8, 65537, %v12975_v52 }
 0x4ff   :  { %v9225_v49 = vpop.f32.mrb[71].mxu1  ;;  %v9231_v16 = vpop.f32.mrb[67].mxu0  ;;  %v11246_v47 = vadd.f32 %v2464_v21, %v10853_v63  ;;  %v11274_v3 = vadd.f32 %v2463_v51, %v10853_v63  ;;  %v11296_v33 = vrot.slane %v2968_v24, %v10624_v56 }
 0x501   :  { %v2492_v58 = vsel %vm749_vm10, %v11246_v47, -inf  ;;  %v2489_v38 = vsel %vm749_vm10, %v11274_v3, -inf  ;;  %12978 = vst [vmem:[#allocation4_spill] sm:$0xff] %v11296_v33 }
 0x502   :  { %2493 = vmax.xlane.f32.xlu1 %v2492_v58 }
 0x504   :  { %v2452_v17 = vpop.f32.mrb[72].mxu1 }
 0x505   :  { %v9236_v4 = vpop.f32.mrb[73].mxu1  ;;  %v2465_v49 = vmul.f32 0.35355338, %v2452_v17 }
 0x506   :  { %v2455_v59 = vpop.f32.mrb[74].mxu1 }
 0x507   :  { %v9237_v9 = vpop.f32.mrb[75].mxu1  ;;  %v11305_v16 = vadd.f32 %v2465_v49, %v10853_v63 }
 0x509   :  { %v2495_v58 = vsel %vm749_vm10, %v11305_v16, -inf }
 0x513   :  { %2103 = vrot.lane.b32.xlu1 %v11254_v45, %s10408_s26 }
 0x577   :  { %v2476_v4 = vpop.xlane.xlu0 %2475 }
 0x57f   :  { %v2479_v11 = vpop.xlane.xlu1 %2478  ;;  %v2482_v56 = vpop.xlane.xlu0 %2481 }
 0x587   :  { %v2488_v57 = vpop.xlane.xlu1 %2487  ;;  %v2485_v9 = vpop.xlane.xlu0 %2484 }
 0x588   :  { %v2502_v46 = vsub.f32 %v2470_v35, %v2488_v57  ;;  %v2498_v57 = vsub.f32 %v11224_v27, %v2476_v4  ;;  %v2501_v51 = vsub.f32 %v11240_v60, %v2485_v9 }
 0x58a   :  { %v2514_v20 = vmul.f32 1.442695, %v2502_v46  ;;  %v2499_v46 = vsub.f32 %v11232_v34, %v2479_v11 }
 0x58c   :  { %10156 = vpow2.f32 %v2514_v20  ;;  %v2508_v20 = vmul.f32 1.442695, %v2499_v46 }
 0x58f   :  { %v2494_v55 = vpop.xlane.xlu1 %2493 }
 0x593   :  { %v11258_v2 = vpop.permute.xlu1 %2103 }
 0x594   :  { %vm2105_vm2 = vcmp.ne.s16.totalorder %v11258_v2, 0 }
 0x595   :  { %v2108_v19 = vsel %vm2105_vm2, %v10598_v42, 0  ;;  %v2106_v8 = vsel %vm2105_vm2, %v10584_v30, 0  ;;  %v2107_v10 = vsel %vm2105_vm2, %v10579_v28, 0  ;;  %v2113_v48 = vsel %vm2105_vm2, %v10582_v29, 0 }
 0x596   :  { %2665 = vrot.lane.b32.xlu1 %v2108_v19, %s10408_s26  ;;  %2571 = vrot.lane.b32.xlu0 %v2106_v8, %s10408_s26  ;;  %v11276_v21 = vpop.eup %10156  ;;  %v2109_v43 = vsel %vm2105_vm2, %v10596_v41, 0  ;;  %v2110_v59 = vsel %vm2105_vm2, %v10614_v54, 0  ;;  %v2111_v17 = vsel %vm2105_vm2, %v10612_v53, 0  ;;  %v2506_v19 = vmul.f32 1.442695, %v2498_v57 }
 0x597   :  { %v2534_v50 = vsel %vm749_vm10, %v11276_v21, 0.0  ;;  %v2500_v8 = vsub.f32 %v11229_v7, %v2482_v56 }
 0x598   :  { %10158 = vpow2.f32 %v2506_v19 }
 0x59a   :  { %2618 = vrot.lane.b32.xlu0 %v2107_v10, %s10408_s26  ;;  %v2510_v10 = vmul.f32 1.442695, %v2500_v8 }
 0x59c   :  { %10160 = vpow2.f32 %v2510_v10 }
 0x59d   :  { %10162 = vpow2.f32 %v2508_v20 }
 0x5a2   :  { %v10159_v24 = vpop.eup %10158 }
 0x5a3   :  { %v2522_v27 = vsel %vm749_vm10, %v10159_v24, 0.0 }
 0x5b9   :  { %2490 = vmax.xlane.f32.xlu0 %v2489_v38  ;;  %v2512_v38 = vmul.f32 1.442695, %v2501_v51 }
 0x5ba   :  { %2535 = vadd.xlane.f32.xlu1 %v2534_v50  ;;  %v2504_v50 = vsub.f32 %v11246_v47, %v2494_v55 }
 0x5bb   :  { %10164 = vpow2.f32 %v2512_v38 }
 0x5cb   :  { %2900 = vrot.lane.b32.xlu1 %v2113_v48, %s10408_s26  ;;  %v2518_v48 = vmul.f32 1.442695, %v2504_v50 }
 0x5cd   :  { %10166 = vpow2.f32 %v2518_v48 }
 0x5cf   :  { %2712 = vrot.lane.b32.xlu0 %v2109_v43, %s10408_s26  ;;  %2973 = vrot.lane.b32.xlu1 %v11296_v33, %s10408_s26  ;;  %v10161_v43 = vpop.eup %10160 }
 0x5d0   :  { %v2528_v7 = vsel %vm749_vm10, %v10161_v43, 0.0  ;;  %v10163_v49 = vpop.eup %10162 }
 0x5d1   :  { %v2525_v34 = vsel %vm749_vm10, %v10163_v49, 0.0  ;;  %v11327_v11 = vpop.eup %10164 }
 0x5d2   :  { %v2531_v60 = vsel %vm749_vm10, %v11327_v11, 0.0 }
 0x5d7   :  { %v11331_v47 = vpop.eup %10166 }
 0x5d8   :  { %v2540_v55 = vsel %vm749_vm10, %v11331_v47, 0.0 }
 0x5ee   :  { %2496 = vmax.xlane.f32.xlu0 %v2495_v58 }
 0x604   :  { %2759 = vrot.lane.b32.xlu0 %v2110_v59, %s10408_s26 }
 0x608   :  { %v2572_v52 = vpop.permute.xlu0 %2571  ;;  %2806 = vrot.lane.b32.xlu0 %v2111_v17, %s10408_s26  ;;  %v2666_v58 = vpop.permute.xlu1 %2665 }
 0x609   :  { %9239 = vmatpush3.bf16.msra.mxu0 %v2572_v52 }
 0x60a   :  { %9250 = vmatprep.subr.bf16.mxu0 %v12972_v25 }
 0x60c   :  { %v2619_v39 = vpop.permute.xlu0 %2618 }
 0x60d   :  { %9245 = vmatpush3.bf16.msra.mxu1 %v2619_v39 }
 0x60e   :  { %9256 = vmatprep.subr.bf16.mxu1 %v12972_v25 }
 0x627   :  { %2523 = vadd.xlane.f32.xlu0 %v2522_v27 }
 0x62b   :  { %2529 = vadd.xlane.f32.xlu0 %v2528_v7 }
 0x62f   :  { %2526 = vadd.xlane.f32.xlu0 %v2525_v34 }
 0x633   :  { %2532 = vadd.xlane.f32.xlu0 %v2531_v60 }
 0x637   :  { %2541 = vadd.xlane.f32.xlu0 %v2540_v55 }
 0x646   :  { %v2491_v4 = vpop.xlane.xlu0 %2490 }
 0x647   :  { %v2503_v56 = vsub.f32 %v11274_v3, %v2491_v4  ;;  %v2536_v59 = vpop.xlane.xlu1 %2535 }
 0x649   :  { %v2516_v9 = vmul.f32 1.442695, %v2503_v56 }
 0x64a   :  { %v2713_v3 = vpop.permute.xlu0 %2712 }
 0x64b   :  { %10168 = vpow2.f32 %v2516_v9  ;;  %v11336_v17 = vpop.permute.xlu1 %2900 }
 0x64f   :  { %v11338_v52 = vpop.permute.xlu1 %2973 }
 0x650   :  { %vm2975_vm9 = vcmp.ne.s16.totalorder %v11338_v52, 0 }
 0x651   :  { %v2976_v39 = vsel %vm2975_vm9, %v10584_v30, 0  ;;  %v2112_v30 = vsel %vm2105_vm2, %v10587_v31, 0 }
 0x652   :  { %3441 = vrot.lane.b32.xlu1 %v2976_v39, %s10408_s26 }
 0x655   :  { %v10169_v57 = vpop.eup %10168 }
 0x656   :  { %v2537_v19 = vsel %vm749_vm10, %v10169_v57, 0.0 }
 0x657   :  { %2538 = vadd.xlane.f32.xlu0 %v2537_v19 }
 0x67b   :  { %v2497_v8 = vpop.xlane.xlu0 %2496 }
 0x67c   :  { %v2505_v10 = vsub.f32 %v11305_v16, %v2497_v8 }
 0x67e   :  { %v2520_v46 = vmul.f32 1.442695, %v2505_v10 }
 0x67f   :  { %v2760_v38 = vpop.permute.xlu0 %2759 }
 0x680   :  { %10170 = vpow2.f32 %v2520_v46 }
 0x683   :  { %v2807_v50 = vpop.permute.xlu0 %2806 }
 0x68a   :  { %v11347_v20 = vpop.eup %10170 }
 0x68b   :  { %v2543_v51 = vsel %vm749_vm10, %v11347_v20, 0.0 }
 0x68c   :  { %2544 = vadd.xlane.f32.xlu0 %v2543_v51 }
 0x6a2   :  { %2853 = vrot.lane.b32.xlu0 %v2112_v30, %s10408_s26 }
 0x6b4   :  { %v2524_v48 = vpop.xlane.xlu0 %2523 }
 0x6b5   :  { %10172 = vrcp.f32 %v2524_v48 }
 0x6b8   :  { %v2530_v27 = vpop.xlane.xlu0 %2529 }
 0x6b9   :  { %10174 = vrcp.f32 %v2530_v27 }
 0x6bc   :  { %v2527_v16 = vpop.xlane.xlu0 %2526 }
 0x6bd   :  { %10176 = vrcp.f32 %v2527_v16 }
 0x6be   :  { %10178 = vrcp.f32 %v2536_v59 }
 0x6bf   :  { %v10173_v7 = vpop.eup %10172 }
 0x6c0   :  { %v2533_v34 = vpop.xlane.xlu0 %2532  ;;  %v2554_v60 = vmul.f32 %v10173_v7, %v10159_v24 }
 0x6c1   :  { %10180 = vrcp.f32 %v2533_v34 }
 0x6c2   :  { %v2562_v55 = vpack.c.bf16 %v2554_v60, %v2554_v60 }
 0x6c3   :  { %v10175_v4 = vpop.eup %10174 }
 0x6c4   :  { %9241 = vmatmul.mubr.msk.bf16.vlgmr.msra.gmra.mrb[36].mxu0 %vm749_vm10, %v2562_v55  ;;  %v2556_v2 = vmul.f32 %v10175_v4, %v10161_v43 }
 0x6c5   :  { %9251 = vmatpush3.bf16.msra.mxu0 %v2666_v58  ;;  %9252 = vmatprep.mubr.msk.bf16.mxu0 %vm10405_vm1, %v12972_v25 }
 0x6c6   :  { %9262 = vmatprep.subr.bf16.mxu0 %v12972_v25  ;;  %v2564_v8 = vpack.c.bf16 %v2556_v2, %v2556_v2 }
 0x6c7   :  { %v10177_v56 = vpop.eup %10176 }
 0x6c8   :  { %v2555_v9 = vmul.f32 %v10177_v56, %v10163_v49  ;;  %v10179_v39 = vpop.eup %10178 }
 0x6c9   :  { %v2558_v43 = vmul.f32 %v10179_v39, %v11276_v21  ;;  %v2542_v21 = vpop.xlane.xlu0 %2541 }
 0x6ca   :  { %v2563_v19 = vpack.c.bf16 %v2555_v9, %v2555_v9 }
 0x6cb   :  { %v10181_v59 = vpop.eup %10180  ;;  %v2566_v58 = vpack.c.bf16 %v2558_v43, %v2558_v43 }
 0x6cc   :  { %9247 = vmatmul.mubr.msk.bf16.vlgmr.msra.gmra.mrb[44].mxu1 %vm749_vm10, %v2563_v19  ;;  %9253 = vmatmul.mubr.msk.bf16.vlgmr.msra.gmra.mrb[40].mxu0 %vm749_vm10, %v2564_v8  ;;  %v2557_v24 = vmul.f32 %v10181_v59, %v11327_v11 }
 0x6cd   :  { %9257 = vmatpush3.bf16.msra.mxu1 %v2713_v3  ;;  %9263 = vmatpush3.bf16.msra.mxu0 %v2760_v38 }
 0x6ce   :  { %9258 = vmatprep.mubr.msk.bf16.mxu1 %vm10405_vm1, %v12972_v25  ;;  %9264 = vmatprep.mubr.msk.bf16.mxu0 %vm10405_vm1, %v12972_v25  ;;  %v2565_v49 = vpack.c.bf16 %v2557_v24, %v2557_v24 }
 0x6cf   :  { %9268 = vmatprep.subr.bf16.mxu1 %v12972_v25  ;;  %9274 = vmatprep.subr.bf16.mxu0 %v12972_v25 }
 0x6d4   :  { %9259 = vmatmul.mubr.msk.bf16.vlgmr.msra.gmra.mrb[48].mxu1 %vm749_vm10, %v2565_v49  ;;  %9265 = vmatmul.mubr.msk.bf16.vlgmr.msra.gmra.mrb[44].mxu0 %vm749_vm10, %v2566_v58 }
 0x6d5   :  { %9269 = vmatpush3.bf16.msra.mxu1 %v2807_v50  ;;  %9270 = vmatprep.mubr.msk.bf16.mxu1 %vm10405_vm1, %v12972_v25 }
 0x6d6   :  { %9280 = vmatprep.subr.bf16.mxu1 %v12972_v25  ;;  %9276 = vmatprep.mubr.msk.bf16.mxu0 %vm10405_vm1, %v12972_v25 }
 0x6e4   :  { %v2539_v11 = vpop.xlane.xlu0 %2538 }
 0x6e5   :  { %10182 = vrcp.f32 %v2539_v11 }
 0x6e6   :  { %10184 = vrcp.f32 %v2542_v21 }
 0x6ef   :  { %v10183_v3 = vpop.eup %10182 }
 0x6f0   :  { %v2559_v10 = vmul.f32 %v10183_v3, %v10169_v57  ;;  %v10185_v51 = vpop.eup %10184 }
 0x6f1   :  { %v2560_v38 = vmul.f32 %v10185_v51, %v11331_v47  ;;  %v2960_v47 = vsel %vm11284_vm8, %v10655_v1, 0  ;;  %v2962_v1 = vsel %vm11284_vm8, %v10687_v14, 0  ;;  %v3442_v14 = vpop.permute.xlu1 %3441 }
 0x6f2   :  { %v2567_v46 = vpack.c.bf16 %v2559_v10, %v2559_v10 }
 0x6f3   :  { %v2568_v48 = vpack.c.bf16 %v2560_v38, %v2560_v38 }
 0x6f4   :  { %9271 = vmatmul.mubr.msk.bf16.vlgmr.msra.gmra.mrb[52].mxu1 %vm749_vm10, %v2567_v46 }
 0x6f5   :  { %9281 = vmatpush3.bf16.msra.mxu1 %v11336_v17  ;;  %9282 = vmatprep.mubr.msk.bf16.mxu1 %vm10405_vm1, %v12972_v25 }
 0x6f6   :  { %9292 = vmatprep.subr.bf16.mxu1 %v12972_v25 }
 0x719   :  { %v2545_v30 = vpop.xlane.xlu0 %2544 }
 0x71a   :  { %10186 = vrcp.f32 %v2545_v30 }
 0x71d   :  { %v2854_v50 = vpop.permute.xlu0 %2853 }
 0x71e   :  { %9275 = vmatpush3.bf16.msra.mxu0 %v2854_v50 }
 0x71f   :  { %9286 = vmatprep.subr.bf16.mxu0 %v12972_v25 }
 0x721   :  { %9277 = vmatmul.mubr.msk.bf16.vlgmr.msra.gmra.mrb[48].mxu0 %vm749_vm10, %v2568_v48 }
 0x722   :  { %9288 = vmatprep.mubr.msk.bf16.mxu0 %vm10405_vm1, %v12972_v25 }
 0x724   :  { %v10187_v17 = vpop.eup %10186 }
 0x725   :  { %v2561_v57 = vmul.f32 %v10187_v17, %v11347_v20 }
 0x727   :  { %9287 = vmatpush3.bf16.xpose.msra.mxu0 %v10651_v0  ;;  %v2569_v27 = vpack.c.bf16 %v2561_v57, %v2561_v57  ;;  %v2961_v0 = vsel %vm11284_vm8, %v10670_v6, 0  ;;  %v2964_v6 = vsel %vm11284_vm8, %v10689_v15, 0  ;;  %v2967_v15 = vsel %vm11284_vm8, %v10783_v44, 0 }
 0x728   :  { %9298 = vmatprep.subr.bf16.mxu0 %v12972_v25 }
 0x729   :  { %9283 = vmatmul.mubr.msk.bf16.vlgmr.msra.gmra.mrb[56].mxu1 %vm749_vm10, %v2569_v27 }
 0x72a   :  { %9293 = vmatpush3.bf16.xpose.msra.mxu1 %v10661_v5  ;;  %9294 = vmatprep.mubr.msk.bf16.mxu1 %vm10405_vm1, %v12972_v25  ;;  %v2963_v5 = vsel %vm11284_vm8, %v10721_v26, 0 }
 0x72b   :  { %9304 = vmatprep.subr.bf16.mxu1 %v12972_v25 }
 0x72e   :  { %9289 = vmatmul.mubr.msk.bf16.vlgmr.msra.gmra.mrb[68].mxu0 %vm173_vm0, %v2960_v47 }
 0x72f   :  { %9299 = vmatpush3.bf16.xpose.msra.mxu0 %v10676_v12  ;;  %9300 = vmatprep.mubr.msk.bf16.mxu0 %vm10405_vm1, %v12972_v25  ;;  %v2965_v12 = vsel %vm11284_vm8, %v10760_v37, 0 }
 0x730   :  { %9310 = vmatprep.subr.bf16.mxu0 %v12972_v25 }
 0x731   :  { %9295 = vmatmul.mubr.msk.bf16.vlgmr.msra.gmra.mrb[76].mxu1 %vm173_vm0, %v2961_v0 }
 0x732   :  { %9305 = vmatpush3.bf16.xpose.msra.mxu1 %v10704_v22  ;;  %9306 = vmatprep.mubr.msk.bf16.mxu1 %vm10405_vm1, %v12972_v25 }
 0x733   :  { %9316 = vmatprep.subr.bf16.mxu1 %v12972_v25 }
 0x736   :  { %9301 = vmatmul.mubr.msk.bf16.vlgmr.msra.gmra.mrb[72].mxu0 %vm173_vm0, %v2962_v1 }
 0x737   :  { %9311 = vmatpush3.bf16.xpose.msra.mxu0 %v10679_v13  ;;  %9312 = vmatprep.mubr.msk.bf16.mxu0 %vm10405_vm1, %v12972_v25  ;;  %v2966_v13 = vsel %vm11284_vm8, %v10725_v32, 0 }
 0x738   :  { %9322 = vmatprep.subr.bf16.mxu0 %v12972_v25 }
 0x739   :  { %9307 = vmatmul.mubr.msk.bf16.vlgmr.msra.gmra.mrb[80].mxu1 %vm173_vm0, %v2963_v5 }
 0x73a   :  { %9317 = vmatpush3.bf16.xpose.msra.mxu1 %v10748_v36  ;;  %9318 = vmatprep.mubr.msk.bf16.mxu1 %vm10405_vm1, %v12972_v25 }
 0x73b   :  { %9328 = vmatprep.subr.bf16.mxu1 %v12972_v25 }
 0x73e   :  { %9313 = vmatmul.mubr.msk.bf16.vlgmr.msra.gmra.mrb[76].mxu0 %vm173_vm0, %v2964_v6 }
 0x73f   :  { %9323 = vmatpush3.bf16.xpose.msra.mxu0 %v10693_v18  ;;  %9324 = vmatprep.mubr.msk.bf16.mxu0 %vm10405_vm1, %v12972_v25 }
 0x740   :  { %9334 = vmatprep.subr.bf16.mxu0 %v12972_v25 }
 0x741   :  { %9319 = vmatmul.mubr.msk.bf16.vlgmr.msra.gmra.mrb[84].mxu1 %vm173_vm0, %v2965_v12 }
 0x742   :  { %9329 = vmatpush3.bf16.xpose.msra.mxu1 %v10771_v40  ;;  %9330 = vmatprep.mubr.msk.bf16.mxu1 %vm10405_vm1, %v12972_v25 }
 0x743   :  { %9340 = vmatprep.subr.bf16.mxu1 %v12972_v25 }
 0x746   :  { %9325 = vmatmul.mubr.msk.bf16.vlgmr.msra.gmra.mrb[80].mxu0 %vm173_vm0, %v2966_v13 }
 0x747   :  { %9335 = vmatpush3.bf16.msra.mxu0 %v3442_v14  ;;  %9336 = vmatprep.mubr.msk.bf16.mxu0 %vm10405_vm1, %v12972_v25 }
 0x748   :  { %9346 = vmatprep.subr.bf16.mxu0 %v12972_v25 }
 0x749   :  { %9331 = vmatmul.mubr.msk.bf16.vlgmr.msra.gmra.mrb[88].mxu1 %vm173_vm0, %v2967_v15 }
 0x74a   :  { %9342 = vmatprep.mubr.msk.bf16.mxu1 %vm10405_vm1, %v12972_v25 }
 0x801   :  { %v3021_v18 = vpop.f32.mrb[68].mxu0 }
 0x802   :  { %v3328_v22 = vmul.f32 0.35355338, %v3021_v18  ;;  %v9290_v26 = vpop.f32.mrb[69].mxu0 }
 0x803   :  { %v3024_v32 = vpop.f32.mrb[70].mxu0 }
 0x804   :  { %v9291_v36 = vpop.f32.mrb[71].mxu0  ;;  %v3064_v37 = vpop.f32.mrb[76].mxu1  ;;  %v11456_v40 = vadd.f32 %v3328_v22, %v10853_v63 }
 0x805   :  { %v3329_v20 = vmul.f32 0.35355338, %v3064_v37  ;;  %v9296_v16 = vpop.f32.mrb[77].mxu1 }
 0x806   :  { %v3067_v7 = vpop.f32.mrb[78].mxu1  ;;  %v3344_v44 = vsel %vm749_vm10, %v11456_v40, -inf }
 0x807   :  { %3345 = vmax.xlane.f32.xlu0 %v3344_v44  ;;  %v9297_v34 = vpop.f32.mrb[79].mxu1  ;;  %v11461_v60 = vadd.f32 %v3329_v20, %v10853_v63  ;;  %v2978_v7 = vsel %vm2975_vm9, %v10598_v42, 0  ;;  %v2977_v44 = vsel %vm2975_vm9, %v10579_v28, 0 }
 0x809   :  { %v3107_v55 = vpop.f32.mrb[72].mxu0  ;;  %v3347_v4 = vsel %vm749_vm10, %v11461_v60, -inf }
 0x80a   :  { %v3330_v2 = vmul.f32 0.35355338, %v3107_v55  ;;  %v9302_v56 = vpop.f32.mrb[73].mxu0  ;;  %3348 = vmax.xlane.f32.xlu1 %v3347_v4 }
 0x80b   :  { %v3110_v9 = vpop.f32.mrb[74].mxu0 }
 0x80c   :  { %v9303_v39 = vpop.f32.mrb[75].mxu0  ;;  %v3150_v19 = vpop.f32.mrb[80].mxu1  ;;  %v3338_v8 = vadd.f32 %v3330_v2, %v10853_v63 }
 0x80d   :  { %v3331_v59 = vmul.f32 0.35355338, %v3150_v19  ;;  %v9308_v24 = vpop.f32.mrb[81].mxu1 }
 0x80e   :  { %v3153_v43 = vpop.f32.mrb[82].mxu1  ;;  %v3350_v49 = vsel %vm749_vm10, %v3338_v8, -inf }
 0x80f   :  { %v3339_v58 = vadd.f32 %v3331_v59, %v10853_v63  ;;  %3351 = vmax.xlane.f32.xlu0 %v3350_v49  ;;  %v9309_v21 = vpop.f32.mrb[83].mxu1 }
 0x811   :  { %v3193_v11 = vpop.f32.mrb[76].mxu0  ;;  %v3353_v3 = vsel %vm749_vm10, %v3339_v58, -inf }
 0x812   :  { %v3332_v10 = vmul.f32 0.35355338, %v3193_v11  ;;  %v9314_v46 = vpop.f32.mrb[77].mxu0 }
 0x813   :  { %v3196_v51 = vpop.f32.mrb[78].mxu0  ;;  %3354 = vmax.xlane.f32.xlu0 %v3353_v3 }
 0x814   :  { %v9315_v30 = vpop.f32.mrb[79].mxu0  ;;  %v3236_v38 = vpop.f32.mrb[84].mxu1  ;;  %v3340_v50 = vadd.f32 %v3332_v10, %v10853_v63 }
 0x815   :  { %v3333_v48 = vmul.f32 0.35355338, %v3236_v38  ;;  %v9320_v17 = vpop.f32.mrb[85].mxu1 }
 0x816   :  { %v3239_v57 = vpop.f32.mrb[86].mxu1  ;;  %v3356_v27 = vsel %vm749_vm10, %v3340_v50, -inf  ;;  %v2980_v17 = vsel %vm2975_vm9, %v10614_v54, 0 }
 0x817   :  { %v11472_v47 = vadd.f32 %v3333_v48, %v10853_v63  ;;  %3357 = vmax.xlane.f32.xlu1 %v3356_v27  ;;  %v9321_v0 = vpop.f32.mrb[87].mxu1  ;;  %v2979_v57 = vsel %vm2975_vm9, %v10596_v41, 0 }
 0x819   :  { %v3279_v1 = vpop.f32.mrb[80].mxu0  ;;  %v3359_v5 = vsel %vm749_vm10, %v11472_v47, -inf }
 0x81a   :  { %v3334_v6 = vmul.f32 0.35355338, %v3279_v1  ;;  %v9326_v12 = vpop.f32.mrb[81].mxu0  ;;  %3360 = vmax.xlane.f32.xlu0 %v3359_v5 }
 0x81b   :  { %v3282_v13 = vpop.f32.mrb[82].mxu0 }
 0x81c   :  { %v9327_v14 = vpop.f32.mrb[83].mxu0  ;;  %v3322_v15 = vpop.f32.mrb[88].mxu1  ;;  %v3342_v18 = vadd.f32 %v3334_v6, %v10853_v63 }
 0x81d   :  { %v3335_v22 = vmul.f32 0.35355338, %v3322_v15  ;;  %v9332_v26 = vpop.f32.mrb[89].mxu1 }
 0x81e   :  { %v3325_v32 = vpop.f32.mrb[90].mxu1  ;;  %v3362_v36 = vsel %vm749_vm10, %v3342_v18, -inf  ;;  %v2983_v26 = vsel %vm2975_vm9, %v10582_v29, 0 }
 0x81f   :  { %v3343_v37 = vadd.f32 %v3335_v22, %v10853_v63  ;;  %3363 = vmax.xlane.f32.xlu1 %v3362_v36  ;;  %v9333_v20 = vpop.f32.mrb[91].mxu1  ;;  %v2981_v32 = vsel %vm2975_vm9, %v10612_v53, 0 }
 0x821   :  { %v3365_v16 = vsel %vm749_vm10, %v3343_v37, -inf }
 0x822   :  { %3366 = vmax.xlane.f32.xlu0 %v3365_v16 }
 0x830   :  { %3535 = vrot.lane.b32.xlu1 %v2978_v7, %s10408_s26 }
 0x838   :  { %3488 = vrot.lane.b32.xlu0 %v2977_v44, %s10408_s26 }
 0x894   :  { %v3346_v34 = vpop.xlane.xlu0 %3345 }
 0x895   :  { %v3368_v55 = vsub.f32 %v11456_v40, %v3346_v34 }
 0x897   :  { %v3376_v4 = vmul.f32 1.442695, %v3368_v55  ;;  %v3349_v2 = vpop.xlane.xlu1 %3348 }
 0x898   :  { %v3369_v56 = vsub.f32 %v11461_v60, %v3349_v2 }
 0x899   :  { %10188 = vpow2.f32 %v3376_v4 }
 0x89a   :  { %v3378_v19 = vmul.f32 1.442695, %v3369_v56 }
 0x89c   :  { %v3352_v9 = vpop.xlane.xlu0 %3351 }
 0x89d   :  { %v3370_v39 = vsub.f32 %v3338_v8, %v3352_v9 }
 0x89f   :  { %v3380_v42 = vmul.f32 1.442695, %v3370_v39 }
 0x8a0   :  { %v3355_v59 = vpop.xlane.xlu0 %3354 }
 0x8a1   :  { %10190 = vpow2.f32 %v3380_v42  ;;  %v3371_v24 = vsub.f32 %v3339_v58, %v3355_v59 }
 0x8a2   :  { %10192 = vpow2.f32 %v3378_v19 }
 0x8a3   :  { %v11490_v43 = vpop.eup %10188  ;;  %v3382_v28 = vmul.f32 1.442695, %v3371_v24 }
 0x8a4   :  { %v3358_v49 = vpop.xlane.xlu1 %3357  ;;  %v3392_v40 = vsel %vm749_vm10, %v11490_v43, 0.0 }
 0x8a5   :  { %v3372_v21 = vsub.f32 %v3340_v50, %v3358_v49  ;;  %3393 = vadd.xlane.f32.xlu0 %v3392_v40  ;;  %10194 = vpow2.f32 %v3382_v28 }
 0x8a7   :  { %v3384_v11 = vmul.f32 1.442695, %v3372_v21  ;;  %v3361_v8 = vpop.xlane.xlu0 %3360 }
 0x8a8   :  { %v3373_v0 = vsub.f32 %v11472_v47, %v3361_v8 }
 0x8a9   :  { %10196 = vpow2.f32 %v3384_v11 }
 0x8aa   :  { %v3386_v5 = vmul.f32 1.442695, %v3373_v0 }
 0x8ab   :  { %v11494_v60 = vpop.eup %10190 }
 0x8ac   :  { %v3398_v3 = vsel %vm749_vm10, %v11494_v60, 0.0  ;;  %v11498_v58 = vpop.eup %10192  ;;  %v3364_v27 = vpop.xlane.xlu1 %3363  ;;  %10198 = vpow2.f32 %v3386_v5 }
 0x8ad   :  { %3399 = vadd.xlane.f32.xlu0 %v3398_v3  ;;  %v3395_v46 = vsel %vm749_vm10, %v11498_v58, 0.0  ;;  %v3374_v1 = vsub.f32 %v3342_v18, %v3364_v27  ;;  %v2982_v18 = vsel %vm2975_vm9, %v10587_v31, 0 }
 0x8af   :  { %v3367_v10 = vpop.xlane.xlu0 %3366  ;;  %v11502_v51 = vpop.eup %10194  ;;  %v3388_v6 = vmul.f32 1.442695, %v3374_v1 }
 0x8b0   :  { %v3401_v48 = vsel %vm749_vm10, %v11502_v51, 0.0  ;;  %v3375_v12 = vsub.f32 %v3343_v37, %v3367_v10  ;;  %v3536_v31 = vpop.permute.xlu1 %3535 }
 0x8b1   :  { %3396 = vadd.xlane.f32.xlu0 %v3395_v46  ;;  %10200 = vpow2.f32 %v3388_v6 }
 0x8b2   :  { %v3390_v13 = vmul.f32 1.442695, %v3375_v12 }
 0x8b3   :  { %v11504_v30 = vpop.eup %10196  ;;  %v3489_v38 = vpop.permute.xlu0 %3488 }
 0x8b4   :  { %9341 = vmatpush3.bf16.msra.mxu1 %v3489_v38  ;;  %v3404_v50 = vsel %vm749_vm10, %v11504_v30, 0.0  ;;  %10202 = vpow2.f32 %v3390_v13 }
 0x8b5   :  { %3405 = vadd.xlane.f32.xlu1 %v3404_v50  ;;  %3402 = vadd.xlane.f32.xlu0 %v3401_v48 }
 0x8b6   :  { %9352 = vmatprep.subr.bf16.mxu1 %v12972_v25  ;;  %v11520_v54 = vpop.eup %10198 }
 0x8b7   :  { %v3407_v15 = vsel %vm749_vm10, %v11520_v54, 0.0 }
 0x8bb   :  { %v11522_v14 = vpop.eup %10200 }
 0x8bc   :  { %v3410_v41 = vsel %vm749_vm10, %v11522_v14, 0.0 }
 0x8be   :  { %v11528_v22 = vpop.eup %10202 }
 0x8bf   :  { %v3413_v47 = vsel %vm749_vm10, %v11528_v22, 0.0 }
 0x8c6   :  { %3629 = vrot.lane.b32.xlu1 %v2980_v17, %s10408_s26  ;;  %v10062_v17 = vld [vmem:[%s12979_s4] sm:$0xff]  }
 0x8cb   :  { %3582 = vrot.lane.b32.xlu0 %v2979_v57, %s10408_s26  ;;  %v10063_v57 = vld [vmem:[%s12979_s4 + $0x8] sm:$0xff]  }
 0x8ea   :  { %3411 = vadd.xlane.f32.xlu1 %v3410_v41  ;;  %3408 = vadd.xlane.f32.xlu0 %v3407_v15 }
 0x8ee   :  { %3414 = vadd.xlane.f32.xlu0 %v3413_v47 }
 0x8fb   :  { %3723 = vrot.lane.b32.xlu1 %v2982_v18, %s10408_s26 }
 0x8ff   :  { %3770 = vrot.lane.b32.xlu1 %v2983_v26, %s10408_s26 }
 0x904   :  { %3676 = vrot.lane.b32.xlu0 %v2981_v32, %s10408_s26  ;;  %s12981_s26 = sld [smem:[#allocation18_spill]] }
 0x932   :  { %v3394_v36 = vpop.xlane.xlu0 %3393 }
 0x933   :  { %10204 = vrcp.f32 %v3394_v36 }
 0x93a   :  { %v3400_v37 = vpop.xlane.xlu0 %3399 }
 0x93b   :  { %10206 = vrcp.f32 %v3400_v37 }
 0x93d   :  { %v10205_v20 = vpop.eup %10204 }
 0x93e   :  { %v3397_v16 = vpop.xlane.xlu0 %3396  ;;  %v3424_v7 = vmul.f32 %v10205_v20, %v11490_v43 }
 0x93f   :  { %10208 = vrcp.f32 %v3397_v16 }
 0x940   :  { %v3432_v44 = vpack.c.bf16 %v3424_v7, %v3424_v7 }
 0x942   :  { %v3406_v29 = vpop.xlane.xlu1 %3405  ;;  %9337 = vmatmul.mubr.msk.bf16.vlgmr.msra.gmra.mrb[36].mxu0 %vm749_vm10, %v3432_v44  ;;  %v3403_v34 = vpop.xlane.xlu0 %3402 }
 0x943   :  { %10210 = vrcp.f32 %v3406_v29  ;;  %9347 = vmatpush3.bf16.msra.mxu0 %v3536_v31  ;;  %9348 = vmatprep.mubr.msk.bf16.mxu0 %vm10405_vm1, %v12972_v25 }
 0x944   :  { %10212 = vrcp.f32 %v3403_v34  ;;  %9358 = vmatprep.subr.bf16.mxu0 %v12972_v25 }
 0x945   :  { %v10207_v53 = vpop.eup %10206 }
 0x946   :  { %v3426_v52 = vmul.f32 %v10207_v53, %v11494_v60  ;;  %v3630_v2 = vpop.permute.xlu1 %3629  ;;  %v3583_v42 = vpop.permute.xlu0 %3582 }
 0x948   :  { %v3434_v55 = vpack.c.bf16 %v3426_v52, %v3426_v52 }
 0x949   :  { %v10209_v4 = vpop.eup %10208 }
 0x94a   :  { %9349 = vmatmul.mubr.msk.bf16.vlgmr.msra.gmra.mrb[40].mxu0 %vm749_vm10, %v3434_v55  ;;  %v3425_v56 = vmul.f32 %v10209_v4, %v11498_v58 }
 0x94b   :  { %9359 = vmatpush3.bf16.msra.mxu0 %v3630_v2  ;;  %9360 = vmatprep.mubr.msk.bf16.mxu0 %vm10405_vm1, %v12972_v25 }
 0x94c   :  { %v3433_v9 = vpack.c.bf16 %v3425_v56, %v3425_v56  ;;  %9370 = vmatprep.subr.bf16.mxu0 %v12972_v25 }
 0x94d   :  { %v10211_v39 = vpop.eup %10210 }
 0x94e   :  { %v10213_v19 = vpop.eup %10212  ;;  %9343 = vmatmul.mubr.msk.bf16.vlgmr.msra.gmra.mrb[44].mxu1 %vm749_vm10, %v3433_v9  ;;  %v3428_v59 = vmul.f32 %v10211_v39, %v11504_v30 }
 0x94f   :  { %9353 = vmatpush3.bf16.msra.mxu1 %v3583_v42  ;;  %9354 = vmatprep.mubr.msk.bf16.mxu1 %vm10405_vm1, %v12972_v25  ;;  %v3427_v43 = vmul.f32 %v10213_v19, %v11502_v51 }
 0x950   :  { %v3436_v24 = vpack.c.bf16 %v3428_v59, %v3428_v59  ;;  %9364 = vmatprep.subr.bf16.mxu1 %v12972_v25 }
 0x951   :  { %v3435_v28 = vpack.c.bf16 %v3427_v43, %v3427_v43  ;;  %v10396_v43 = vld [vmem:[%s12964_s0] sm:$0xff]  }
 0x952   :  { %9361 = vmatmul.mubr.msk.bf16.vlgmr.msra.gmra.mrb[44].mxu0 %vm749_vm10, %v3436_v24  ;;  %v8544_v24 = vld [vmem:[%s12980_s2] ss:$0 sm:$0xff] }
 0x953   :  { %9372 = vmatprep.mubr.msk.bf16.mxu0 %vm10405_vm1, %v12972_v25 }
 0x956   :  { %9355 = vmatmul.mubr.msk.bf16.vlgmr.msra.gmra.mrb[48].mxu1 %vm749_vm10, %v3435_v28  ;;  %v3928_v28 = vunpack.c.h.bf16 %v10396_v43 }
 0x957   :  { %9366 = vmatprep.mubr.msk.bf16.mxu1 %vm10405_vm1, %v12972_v25 }
 0x977   :  { %v3412_v49 = vpop.xlane.xlu1 %3411  ;;  %v3409_v40 = vpop.xlane.xlu0 %3408 }
 0x978   :  { %10214 = vrcp.f32 %v3412_v49 }
 0x979   :  { %10216 = vrcp.f32 %v3409_v40 }
 0x97b   :  { %v3724_v21 = vpop.permute.xlu1 %3723  ;;  %v3415_v11 = vpop.xlane.xlu0 %3414 }
 0x97c   :  { %9371 = vmatpush3.bf16.msra.mxu0 %v3724_v21  ;;  %10218 = vrcp.f32 %v3415_v11 }
 0x97d   :  { %9382 = vmatprep.subr.bf16.mxu0 %v10062_v17 }
 0x97f   :  { %v3677_v60 = vpop.permute.xlu0 %3676  ;;  %v3771_v38 = vpop.permute.xlu1 %3770 }
 0x980   :  { %9365 = vmatpush3.bf16.msra.mxu1 %v3677_v60 }
 0x981   :  { %9376 = vmatprep.subr.bf16.mxu1 %v12972_v25 }
 0x982   :  { %v10215_v8 = vpop.eup %10214 }
 0x983   :  { %v10217_v3 = vpop.eup %10216  ;;  %v3430_v58 = vmul.f32 %v10215_v8, %v11522_v14  ;;  %v10397_v8 = vld [vmem:[%s12964_s0 + $0x8] sm:$0xff]  }
 0x984   :  { %v3429_v10 = vmul.f32 %v10217_v3, %v11520_v54  ;;  %v3929_v3 = vunpack.c.h.bf16 %v10397_v8 }
 0x985   :  { %v3438_v46 = vpack.c.bf16 %v3430_v58, %v3430_v58  ;;  %v10398_v58 = vld [vmem:[%s12964_s0 + $0x10] sm:$0xff]  }
 0x986   :  { %v3437_v51 = vpack.c.bf16 %v3429_v10, %v3429_v10  ;;  %v10219_v30 = vpop.eup %10218  ;;  %v3930_v10 = vunpack.c.h.bf16 %v10398_v58 }
 0x987   :  { %9373 = vmatmul.mubr.msk.bf16.vlgmr.msra.gmra.mrb[48].mxu0 %vm749_vm10, %v3438_v46  ;;  %v3431_v50 = vmul.f32 %v10219_v30, %v11528_v22 }
 0x988   :  { %9367 = vmatmul.mubr.msk.bf16.vlgmr.msra.gmra.mrb[52].mxu1 %vm749_vm10, %v3437_v51  ;;  %9383 = vmatpush3.bf16.msra.mxu0 %v10062_v17 }
 0x989   :  { %9377 = vmatpush3.bf16.msra.mxu1 %v3771_v38  ;;  %9378 = vmatprep.mubr.msk.bf16.mxu1 %vm10405_vm1, %v12972_v25  ;;  %v3439_v48 = vpack.c.bf16 %v3431_v50, %v3431_v50  ;;  %v10399_v38 = vld [vmem:[%s12964_s0 + $0x18] sm:$0xff]  }
 0x98a   :  { %9384 = vmatprep.subr.bf16.mxu0 %v10063_v57  ;;  %v3931_v50 = vunpack.c.h.bf16 %v10399_v38  ;;  %v10066_v38 = vld [vmem:[%s12982_s29] sm:$0xff]  }
 0x98c   :  { %9385 = vmatpush3.bf16.msra.mxu0 %v10063_v57 }
 0x990   :  { %9379 = vmatmul.mubr.msk.bf16.vlgmr.msra.gmra.mrb[56].mxu1 %vm749_vm10, %v3439_v48 }
 0xa15   :  { %v3481_v27 = vpop.f32.mrb[36].mxu0 }
 0xa16   :  { %v9338_v0 = vpop.f32.mrb[37].mxu0 }
 0xa17   :  { %v3484_v1 = vpop.f32.mrb[38].mxu0 }
 0xa18   :  { %v9339_v5 = vpop.f32.mrb[39].mxu0 }
 0xa1d   :  { %v3575_v6 = vpop.f32.mrb[40].mxu0 }
 0xa1e   :  { %v9350_v12 = vpop.f32.mrb[41].mxu0 }
 0xa1f   :  { %v3578_v13 = vpop.f32.mrb[42].mxu0  ;;  %v10400_v12 = vld [vmem:[%s12964_s0 + $0x30] sm:$0xff]  }
 0xa20   :  { %v9351_v54 = vpop.f32.mrb[43].mxu0  ;;  %v3934_v13 = vunpack.c.h.bf16 %v10400_v12 }
 0xa21   :  { %v3528_v14 = vpop.f32.mrb[44].mxu1 }
 0xa22   :  { %v3824_v41 = vpack.c.bf16 %v3528_v14, %v3481_v27  ;;  %v9344_v15 = vpop.f32.mrb[45].mxu1  ;;  %v10401_v14 = vld [vmem:[%s12964_s0 + $0x20] sm:$0xff]  }
 0xa23   :  { %v3531_v22 = vpop.f32.mrb[46].mxu1 }
 0xa24   :  { %v9345_v47 = vpop.f32.mrb[47].mxu1  ;;  %9386 = vmatprep.mubr.msk.bf16.mxu0 %vm173_vm0, %v3824_v41  ;;  %v3932_v41 = vunpack.c.h.bf16 %v10401_v14 }
 0xa25   :  { %v3669_v18 = vpop.f32.mrb[44].mxu0 }
 0xa26   :  { %v9362_v26 = vpop.f32.mrb[45].mxu0 }
 0xa27   :  { %v3672_v32 = vpop.f32.mrb[46].mxu0  ;;  %v10402_v26 = vld [vmem:[%s12964_s0 + $0x28] sm:$0xff]  }
 0xa28   :  { %v9363_v36 = vpop.f32.mrb[47].mxu0  ;;  %v3933_v32 = vunpack.c.h.bf16 %v10402_v26 }
 0xa29   :  { %v3622_v37 = vpop.f32.mrb[48].mxu1 }
 0xa2a   :  { %v3825_v20 = vpack.c.bf16 %v3622_v37, %v3575_v6  ;;  %v9356_v31 = vpop.f32.mrb[49].mxu1 }
 0xa2b   :  { %v3625_v16 = vpop.f32.mrb[50].mxu1 }
 0xa2c   :  { %v9357_v7 = vpop.f32.mrb[51].mxu1  ;;  %9387 = vmatmul.mubr.msk.bf16.vlgmr.msra.gmra.mrb[84].mxu0 %vm173_vm0, %v3825_v20  ;;  %v10403_v16 = vld [vmem:[%s12964_s0 + $0x38] sm:$0xff]  }
 0xa2d   :  { %v3935_v7 = vunpack.c.h.bf16 %v10403_v16 }
 0xa5a   :  { %v3763_v44 = vpop.f32.mrb[48].mxu0 }
 0xa5b   :  { %v3716_v29 = vpop.f32.mrb[52].mxu1  ;;  %v9374_v34 = vpop.f32.mrb[49].mxu0 }
 0xa5c   :  { %v3826_v53 = vpack.c.bf16 %v3716_v29, %v3669_v18  ;;  %v9368_v52 = vpop.f32.mrb[53].mxu1  ;;  %v3766_v55 = vpop.f32.mrb[50].mxu0 }
 0xa5d   :  { %v3719_v4 = vpop.f32.mrb[54].mxu1  ;;  %v9375_v2 = vpop.f32.mrb[51].mxu0 }
 0xa5e   :  { %v9369_v56 = vpop.f32.mrb[55].mxu1  ;;  %9390 = vmatprep.mubr.msk.bf16.mxu0 %vm173_vm0, %v3826_v53 }
 0xa63   :  { %v3810_v9 = vpop.f32.mrb[56].mxu1 }
 0xa64   :  { %v3827_v39 = vpack.c.bf16 %v3810_v9, %v3763_v44  ;;  %v9380_v19 = vpop.f32.mrb[57].mxu1 }
 0xa65   :  { %v3813_v42 = vpop.f32.mrb[58].mxu1 }
 0xa66   :  { %v9381_v59 = vpop.f32.mrb[59].mxu1  ;;  %9391 = vmatmul.mubr.msk.bf16.gmra.mrb[88].mxu0 %vm173_vm0, %v3827_v39 }
 0xa67   :  { %9410 = vmatprep.mubr.msk.bf16.mxu0 %vm173_vm0, %v10066_v38 }
 0xaff   :  { %v9388_v49 = vpop.f32.mrb[84].mxu0 }
 0xb00   :  { %v3897_v40 = vpop.f32.mrb[85].mxu0  ;;  %v3906_v21 = vadd.f32 %v9388_v49, %v8544_v24 }
 0xb01   :  { %v3898_v11 = vadd.f32 %v8544_v24, %v3897_v40  ;;  %v9389_v60 = vpop.f32.mrb[86].mxu0 }
 0xb02   :  { %v3900_v46 = vpop.f32.mrb[87].mxu0  ;;  %v3909_v48 = vadd.f32 %v9389_v60, %v8544_v24  ;;  %v3938_v27 = vadd.f32 %v3930_v10, %v3906_v21 }
 0xb03   :  { %v3901_v51 = vadd.f32 %v8544_v24, %v3900_v46  ;;  %v3936_v30 = vadd.f32 %v3928_v28, %v3898_v11 }
 0xb04   :  { %v3939_v1 = vadd.f32 %v3931_v50, %v3909_v48  ;;  %v3950_v5 = vsel %vm173_vm0, %v3938_v27, 0.0  ;;  %v10067_v50 = vld [vmem:[%s12982_s29 + $0x8] sm:$0xff]   ;;  %v10068_v48 = vld [vmem:[%s12918_s6] sm:$0xff]  }
 0xb05   :  { %v3937_v17 = vadd.f32 %v3929_v3, %v3901_v51  ;;  %v3944_v57 = vsel %vm173_vm0, %v3936_v30, 0.0  ;;  %v10064_v51 = vld [vmem:[%s12981_s26] sm:$0xff]   ;;  %9394 = vmatprep.subr.bf16.mxu1 %v10068_v48 }
 0xb06   :  { %3945 = vadd.xlane.f32.xlu1 %v3944_v57  ;;  %v3953_v6 = vsel %vm173_vm0, %v3939_v1, 0.0  ;;  %9406 = vmatprep.subr.bf16.mxu0 %v10064_v51  ;;  %v10070_v57 = vld [vmem:[%s12982_s29 + $0x10] sm:$0xff]  }
 0xb07   :  { %v3947_v0 = vsel %vm173_vm0, %v3937_v17, 0.0  ;;  %9407 = vmatpush3.bf16.msra.mxu0 %v10064_v51  ;;  %9395 = vmatpush3.bf16.msra.mxu1 %v10068_v48 }
 0xb08   :  { %3948 = vadd.xlane.f32.xlu0 %v3947_v0 }
 0xb0a   :  { %3951 = vadd.xlane.f32.xlu1 %v3950_v5 }
 0xb0e   :  { %3954 = vadd.xlane.f32.xlu1 %v3953_v6 }
 0xb39   :  { %v9392_v54 = vpop.f32.mrb[88].mxu0 }
 0xb3a   :  { %v3922_v15 = vadd.f32 %v9392_v54, %v8544_v24  ;;  %v3913_v22 = vpop.f32.mrb[89].mxu0 }
 0xb3b   :  { %v3914_v47 = vadd.f32 %v8544_v24, %v3913_v22  ;;  %v9393_v18 = vpop.f32.mrb[90].mxu0 }
 0xb3c   :  { %v11614_v36 = vadd.f32 %v3934_v13, %v3922_v15  ;;  %v3925_v37 = vadd.f32 %v9393_v18, %v8544_v24  ;;  %v3916_v20 = vpop.f32.mrb[91].mxu0 }
 0xb3d   :  { %v11616_v31 = vadd.f32 %v3932_v41, %v3914_v47  ;;  %v3917_v44 = vadd.f32 %v8544_v24, %v3916_v20 }
 0xb3e   :  { %v11625_v53 = vadd.f32 %v3935_v7, %v3925_v37  ;;  %v3962_v55 = vsel %vm173_vm0, %v11614_v36, 0.0  ;;  %v10072_v7 = vld [vmem:[%s12982_s29 + $0x20] sm:$0xff]  }
 0xb3f   :  { %v11621_v29 = vadd.f32 %v3933_v32, %v3917_v44  ;;  %v3956_v34 = vsel %vm173_vm0, %v11616_v31, 0.0  ;;  %v10073_v44 = vld [vmem:[%s12982_s29 + $0x28] sm:$0xff]  }
 0xb40   :  { %3957 = vadd.xlane.f32.xlu0 %v3956_v34  ;;  %v3965_v4 = vsel %vm173_vm0, %v11625_v53, 0.0  ;;  %v10075_v34 = vld [vmem:[%s12982_s29 + $0x38] sm:$0xff]  }
 0xb41   :  { %v3959_v52 = vsel %vm173_vm0, %v11621_v29, 0.0 }
 0xb42   :  { %3960 = vadd.xlane.f32.xlu1 %v3959_v52 }
 0xb44   :  { %3963 = vadd.xlane.f32.xlu0 %v3962_v55 }
 0xb46   :  { %3966 = vadd.xlane.f32.xlu1 %v3965_v4 }
 0xb93   :  { %v3946_v2 = vpop.xlane.xlu1 %3945 }
 0xb94   :  { %v3969_v56 = vmul.f32 0.03125, %v3946_v2 }
 0xb95   :  { %v3949_v9 = vpop.xlane.xlu0 %3948 }
 0xb96   :  { %v11633_v39 = vsub.f32 %v3936_v30, %v3969_v56  ;;  %v3970_v19 = vmul.f32 0.03125, %v3949_v9  ;;  %v10065_v30 = vld [vmem:[%s12981_s26 + $0x8] sm:$0xff]  }
 0xb97   :  { %v3952_v42 = vpop.xlane.xlu1 %3951  ;;  %9408 = vmatprep.subr.bf16.mxu0 %v10065_v30 }
 0xb98   :  { %v11635_v59 = vsub.f32 %v3937_v17, %v3970_v19  ;;  %v3971_v24 = vmul.f32 0.03125, %v3952_v42  ;;  %v3985_v43 = vmul.f32 %v11633_v39, %v11633_v39  ;;  %9409 = vmatpush3.bf16.msra.mxu0 %v10065_v30  ;;  %v10069_v17 = vld [vmem:[%s12918_s6 + $0x8] sm:$0xff]  }
 0xb99   :  { %9450 = vmatprep.subr.bf16.mxu0 %v12972_v25  ;;  %9396 = vmatprep.subr.bf16.mxu1 %v10069_v17 }
 0xb9a   :  { %v11639_v28 = vsub.f32 %v3938_v27, %v3971_v24  ;;  %v3993_v49 = vsel %vm173_vm0, %v3985_v43, 0.0  ;;  %v3986_v40 = vmul.f32 %v11635_v59, %v11635_v59  ;;  %9397 = vmatpush3.bf16.msra.mxu1 %v10069_v17  ;;  %v10071_v27 = vld [vmem:[%s12982_s29 + $0x18] sm:$0xff]  }
 0xb9b   :  { %v3955_v21 = vpop.xlane.xlu1 %3954  ;;  %3994 = vadd.xlane.f32.xlu0 %v3993_v49  ;;  %9411 = vmatmul.mubr.msk.bf16.vlgmr.msra.gmra.mrb[92].mxu0 %vm173_vm0, %v10067_v50 }
 0xb9c   :  { %v3972_v11 = vmul.f32 0.03125, %v3955_v21  ;;  %v3996_v60 = vsel %vm173_vm0, %v3986_v40, 0.0  ;;  %v3987_v8 = vmul.f32 %v11639_v28, %v11639_v28  ;;  %9426 = vmatprep.subr.bf16.mxu1 %v12972_v25  ;;  %9414 = vmatprep.mubr.msk.bf16.mxu0 %vm173_vm0, %v10070_v57 }
 0xb9d   :  { %3997 = vadd.xlane.f32.xlu1 %v3996_v60 }
 0xb9e   :  { %v11647_v3 = vsub.f32 %v3939_v1, %v3972_v11  ;;  %v3999_v58 = vsel %vm173_vm0, %v3987_v8, 0.0 }
 0xb9f   :  { %4000 = vadd.xlane.f32.xlu0 %v3999_v58  ;;  %v8552_v58 = vld [vmem:[%s12920_s13] ss:$0 sm:$0xff] }
 0xba0   :  { %v3988_v10 = vmul.f32 %v11647_v3, %v11647_v3 }
 0xba2   :  { %v4002_v46 = vsel %vm173_vm0, %v3988_v10, 0.0 }
 0xba3   :  { %4003 = vadd.xlane.f32.xlu1 %v4002_v46  ;;  %9415 = vmatmul.mubr.msk.bf16.gmra.mrb[96].mxu0 %vm173_vm0, %v10071_v27 }
 0xba4   :  { %9418 = vmatprep.mubr.msk.bf16.mxu0 %vm173_vm0, %v10072_v7 }
 0xbab   :  { %9419 = vmatmul.mubr.msk.bf16.gmra.mrb[100].mxu0 %vm173_vm0, %v10073_v44 }
 0xbcd   :  { %v3958_v0 = vpop.xlane.xlu0 %3957 }
 0xbce   :  { %v3973_v1 = vmul.f32 0.03125, %v3958_v0 }
 0xbcf   :  { %v3961_v5 = vpop.xlane.xlu1 %3960 }
 0xbd0   :  { %v11684_v6 = vsub.f32 %v11616_v31, %v3973_v1  ;;  %v3974_v12 = vmul.f32 0.03125, %v3961_v5 }
 0xbd1   :  { %v3964_v13 = vpop.xlane.xlu0 %3963 }
 0xbd2   :  { %v11687_v54 = vsub.f32 %v11621_v29, %v3974_v12  ;;  %v3975_v14 = vmul.f32 0.03125, %v3964_v13  ;;  %v3989_v41 = vmul.f32 %v11684_v6, %v11684_v6  ;;  %v10074_v29 = vld [vmem:[%s12982_s29 + $0x30] sm:$0xff]  }
 0xbd3   :  { %v3967_v15 = vpop.xlane.xlu1 %3966  ;;  %9422 = vmatprep.mubr.msk.bf16.mxu0 %vm173_vm0, %v10074_v29 }
 0xbd4   :  { %v11692_v22 = vsub.f32 %v11614_v36, %v3975_v14  ;;  %v3976_v47 = vmul.f32 0.03125, %v3967_v15  ;;  %v4005_v18 = vsel %vm173_vm0, %v3989_v41, 0.0  ;;  %v3990_v26 = vmul.f32 %v11687_v54, %v11687_v54  ;;  %9423 = vmatmul.mubr.msk.bf16.gmra.mrb[104].mxu0 %vm173_vm0, %v10075_v34 }
 0xbd5   :  { %4006 = vadd.xlane.f32.xlu0 %v4005_v18  ;;  %9452 = vmatprep.mubr.msk.bf16.mxu0 %vm10405_vm1, %v12972_v25 }
 0xbd6   :  { %v11698_v32 = vsub.f32 %v11625_v53, %v3976_v47  ;;  %v4008_v37 = vsel %vm173_vm0, %v3990_v26, 0.0  ;;  %v3991_v20 = vmul.f32 %v11692_v22, %v11692_v22 }
 0xbd7   :  { %4009 = vadd.xlane.f32.xlu1 %v4008_v37 }
 0xbd8   :  { %v4011_v31 = vsel %vm173_vm0, %v3991_v20, 0.0  ;;  %v3992_v36 = vmul.f32 %v11698_v32, %v11698_v32 }
 0xbd9   :  { %4012 = vadd.xlane.f32.xlu0 %v4011_v31 }
 0xbda   :  { %v4014_v16 = vsel %vm173_vm0, %v3992_v36, 0.0 }
 0xbdb   :  { %4015 = vadd.xlane.f32.xlu1 %v4014_v16 }
 0xbec   :  { %4391 = vrot.lane.b32.xlu1 %v10644_v62, %s10409_s8 }
 0xbef   :  { %4890 = vrot.lane.b32.xlu0 %v10641_v61, %s10409_s8  ;;  %v8551_v61 = vld [vmem:[%s12919_s12] ss:$0 sm:$0xff] }
 0xc28   :  { %v3995_v53 = vpop.xlane.xlu0 %3994 }
 0xc29   :  { %v4017_v52 = vmul.f32 0.03125, %v3995_v53 }
 0xc2a   :  { %v3998_v55 = vpop.xlane.xlu1 %3997 }
 0xc2b   :  { %v4025_v4 = vadd.f32 1e-05, %v4017_v52  ;;  %v4018_v2 = vmul.f32 0.03125, %v3998_v55 }
 0xc2c   :  { %v4001_v56 = vpop.xlane.xlu0 %4000 }
 0xc2d   :  { %10220 = vrsqrt.f32 %v4025_v4  ;;  %v4026_v9 = vadd.f32 1e-05, %v4018_v2  ;;  %v4019_v19 = vmul.f32 0.03125, %v4001_v56 }
 0xc2f   :  { %10222 = vrsqrt.f32 %v4026_v9  ;;  %v4027_v42 = vadd.f32 1e-05, %v4019_v19 }
 0xc30   :  { %v4004_v24 = vpop.xlane.xlu1 %4003 }
 0xc31   :  { %10224 = vrsqrt.f32 %v4027_v42  ;;  %v4020_v43 = vmul.f32 0.03125, %v4004_v24 }
 0xc33   :  { %v4028_v49 = vadd.f32 1e-05, %v4020_v43 }
 0xc35   :  { %10226 = vrsqrt.f32 %v4028_v49 }
 0xc37   :  { %v10221_v62 = vpop.eup %10220 }
 0xc38   :  { %v4041_v40 = vmul.f32 %v10221_v62, %v11633_v39 }
 0xc39   :  { %v10223_v21 = vpop.eup %10222 }
 0xc3a   :  { %v4042_v11 = vmul.f32 %v10223_v21, %v11635_v59  ;;  %v4056_v60 = vmul.f32 %v8551_v61, %v4041_v40 }
 0xc3b   :  { %v10225_v8 = vpop.eup %10224 }
 0xc3c   :  { %v4043_v10 = vmul.f32 %v10225_v8, %v11639_v28  ;;  %v4057_v46 = vmul.f32 %v8551_v61, %v4042_v11  ;;  %v11738_v51 = vadd.f32 %v8552_v58, %v4056_v60 }
 0xc3e   :  { %12983 = vst [vmem:[#allocation5_spill] sm:$0xff] %v11738_v51  ;;  %v11740_v30 = vadd.f32 %v8552_v58, %v4057_v46  ;;  %v4058_v50 = vmul.f32 %v8551_v61, %v4043_v10 }
 0xc3f   :  { %v10227_v38 = vpop.eup %10226 }
 0xc40   :  { %12984 = vst [vmem:[#allocation6_spill] sm:$0xff] %v11740_v30  ;;  %v4044_v39 = vmul.f32 %v10227_v38, %v11647_v3  ;;  %v4079_v59 = vpack.c.bf16 %v11740_v30, %v11738_v51  ;;  %v11746_v17 = vadd.f32 %v8552_v58, %v4058_v50 }
 0xc42   :  { %v4059_v48 = vmul.f32 %v8551_v61, %v4044_v39  ;;  %9398 = vmatprep.mubr.msk.bf16.mxu1 %vm173_vm0, %v4079_v59  ;;  %12985 = vst [vmem:[#allocation7_spill] sm:$0xff] %v11746_v17 }
 0xc44   :  { %v11748_v57 = vadd.f32 %v8552_v58, %v4059_v48 }
 0xc46   :  { %12986 = vst [vmem:[#allocation8_spill] sm:$0xff] %v11748_v57  ;;  %v4080_v28 = vpack.c.bf16 %v11748_v57, %v11746_v17 }
 0xc48   :  { %9399 = vmatmul.mubr.msk.bf16.vlgmr.msra.gmra.mrb[92].mxu1 %vm173_vm0, %v4080_v28 }
 0xc62   :  { %v4007_v27 = vpop.xlane.xlu0 %4006 }
 0xc63   :  { %v4021_v0 = vmul.f32 0.03125, %v4007_v27 }
 0xc64   :  { %v4010_v1 = vpop.xlane.xlu1 %4009 }
 0xc65   :  { %v4029_v5 = vadd.f32 1e-05, %v4021_v0  ;;  %v4022_v3 = vmul.f32 0.03125, %v4010_v1 }
 0xc66   :  { %v4013_v12 = vpop.xlane.xlu0 %4012 }
 0xc67   :  { %10228 = vrsqrt.f32 %v4029_v5  ;;  %v4030_v13 = vadd.f32 1e-05, %v4022_v3  ;;  %v4023_v14 = vmul.f32 0.03125, %v4013_v12 }
 0xc68   :  { %v4016_v41 = vpop.xlane.xlu1 %4015 }
 0xc69   :  { %10230 = vrsqrt.f32 %v4030_v13  ;;  %v4031_v15 = vadd.f32 1e-05, %v4023_v14  ;;  %v4024_v47 = vmul.f32 0.03125, %v4016_v41 }
 0xc6a   :  { %v11790_v48 = vpop.permute.xlu0 %4890 }
 0xc6b   :  { %10232 = vrsqrt.f32 %v4031_v15  ;;  %v4032_v18 = vadd.f32 1e-05, %v4024_v47  ;;  %vm4892_vm11 = vcmp.ne.s16.totalorder %v11790_v48, 0 }
 0xc6d   :  { %10234 = vrsqrt.f32 %v4032_v18 }
 0xc6e   :  { %v9412_v56 = vpop.f32.mrb[92].mxu0 }
 0xc6f   :  { %v4304_v19 = vpop.f32.mrb[93].mxu0 }
 0xc70   :  { %v9413_v24 = vpop.f32.mrb[94].mxu0 }
 0xc71   :  { %v10229_v26 = vpop.eup %10228  ;;  %v4307_v49 = vpop.f32.mrb[95].mxu0 }
 0xc72   :  { %v4045_v37 = vmul.f32 %v10229_v26, %v11684_v6 }
 0xc73   :  { %v10231_v20 = vpop.eup %10230 }
 0xc74   :  { %v4046_v31 = vmul.f32 %v10231_v20, %v11687_v54  ;;  %v4060_v36 = vmul.f32 %v8551_v61, %v4045_v37 }
 0xc75   :  { %v10233_v16 = vpop.eup %10232 }
 0xc76   :  { %v4061_v7 = vmul.f32 %v8551_v61, %v4046_v31  ;;  %v4047_v44 = vmul.f32 %v10233_v16, %v11692_v22  ;;  %v11756_v34 = vadd.f32 %v8552_v58, %v4060_v36  ;;  %v9416_v11 = vpop.f32.mrb[96].mxu0 }
 0xc77   :  { %v10235_v29 = vpop.eup %10234  ;;  %v4320_v8 = vpop.f32.mrb[97].mxu0 }
 0xc78   :  { %12987 = vst [vmem:[#allocation9_spill] sm:$0xff] %v11756_v34  ;;  %v11758_v53 = vadd.f32 %v8552_v58, %v4061_v7  ;;  %v4048_v52 = vmul.f32 %v10235_v29, %v11698_v32  ;;  %v4062_v55 = vmul.f32 %v8551_v61, %v4047_v44  ;;  %v8560_v32 = vld [vmem:[%s12921_s9] ss:$0 sm:$0xff]  ;;  %v9417_v10 = vpop.f32.mrb[98].mxu0 }
 0xc79   :  { %v4313_v9 = vadd.f32 %v9412_v56, %v8560_v32  ;;  %v4305_v42 = vadd.f32 %v8560_v32, %v4304_v19  ;;  %v4316_v43 = vadd.f32 %v9413_v24, %v8560_v32  ;;  %v4308_v62 = vadd.f32 %v8560_v32, %v4307_v49  ;;  %v4323_v38 = vpop.f32.mrb[99].mxu0 }
 0xc7a   :  { %12988 = vst [vmem:[#allocation10_spill] sm:$0xff] %v11758_v53  ;;  %v4081_v4 = vpack.c.bf16 %v11758_v53, %v11756_v34  ;;  %v4063_v6 = vmul.f32 %v8551_v61, %v4048_v52  ;;  %v11764_v54 = vadd.f32 %v8552_v58, %v4062_v55  ;;  %v4329_v60 = vadd.f32 %v9416_v11, %v8560_v32 }
 0xc7b   :  { %v11776_v61 = vpack.c.bf16 %v4316_v43, %v4313_v9  ;;  %v11778_v40 = vpack.c.bf16 %v4308_v62, %v4305_v42  ;;  %v4332_v46 = vadd.f32 %v9417_v10, %v8560_v32  ;;  %v4324_v50 = vadd.f32 %v8560_v32, %v4323_v38 }
 0xc7c   :  { %9402 = vmatprep.mubr.msk.bf16.mxu1 %vm173_vm0, %v4081_v4  ;;  %12989 = vst [vmem:[#allocation11_spill] sm:$0xff] %v11764_v54  ;;  %v11766_v2 = vadd.f32 %v8552_v58, %v4063_v6  ;;  %v4321_v58 = vadd.f32 %v8560_v32, %v4320_v8  ;;  %v8553_v6 = vld [vmem:[%s12922_s7] ss:$0 sm:$0xff] }
 0xc7d   :  { %v11782_v21 = vsel %vm173_vm0, %v11778_v40, 0  ;;  %v11786_v39 = vpack.c.bf16 %v4332_v46, %v4329_v60  ;;  %v4894_v28 = vsel %vm4892_vm11, %v11776_v61, 0  ;;  %v4893_v27 = vsel %vm4892_vm11, %v11778_v40, 0 }
 0xc7e   :  { %12990 = vst [vmem:[#allocation12_spill] sm:$0xff] %v11766_v2  ;;  %v4082_v22 = vpack.c.bf16 %v11766_v2, %v11764_v54  ;;  %9427 = vmatpush3.bf16.xpose.msra.mxu1 %v11782_v21  ;;  %v11788_v59 = vpack.c.bf16 %v4324_v50, %v4321_v58  ;;  %5405 = vrot.lane.b32.xlu1 %v4894_v28, %s10406_s25  ;;  %v9420_v5 = vpop.f32.mrb[100].mxu0  ;;  %v11830_v43 = vsel %vm173_vm0, %v11776_v61, 0 }
 0xc7f   :  { %9432 = vmatprep.subr.bf16.mxu1 %v12972_v25  ;;  %5358 = vrot.lane.b32.xlu0 %v4893_v27, %s10406_s25  ;;  %v4896_v0 = vsel %vm4892_vm11, %v11786_v39, 0  ;;  %v4345_v3 = vadd.f32 %v9420_v5, %v8560_v32  ;;  %v4336_v12 = vpop.f32.mrb[101].mxu0  ;;  %v11858_v46 = vsel %vm173_vm0, %v11786_v39, 0 }
 0xc80   :  { %9403 = vmatmul.mubr.msk.bf16.gmra.mrb[96].mxu1 %vm173_vm0, %v4082_v22  ;;  %v4895_v1 = vsel %vm4892_vm11, %v11788_v59, 0  ;;  %v4337_v13 = vadd.f32 %v8560_v32, %v4336_v12  ;;  %v9421_v14 = vpop.f32.mrb[102].mxu0  ;;  %v11844_v60 = vsel %vm173_vm0, %v11788_v59, 0 }
 0xc81   :  { %9428 = vmatprep.mubr.msk.bf16.mxu1 %vm10405_vm1, %v12972_v25  ;;  %v4348_v41 = vadd.f32 %v9421_v14, %v8560_v32  ;;  %v4339_v15 = vpop.f32.mrb[103].mxu0 }
 0xc82   :  { %5499 = vrot.lane.b32.xlu1 %v4896_v0, %s10406_s25  ;;  %v4340_v47 = vadd.f32 %v8560_v32, %v4339_v15 }
 0xc83   :  { %5452 = vrot.lane.b32.xlu0 %v4895_v1, %s10406_s25  ;;  %v11809_v18 = vpack.c.bf16 %v4348_v41, %v4345_v3 }
 0xc84   :  { %v11811_v26 = vpack.c.bf16 %v4340_v47, %v4337_v13 }
 0xc85   :  { %v11872_v27 = vsel %vm173_vm0, %v11809_v18, 0 }
 0xc86   :  { %v11815_v37 = vsel %vm173_vm0, %v11811_v26, 0 }
 0xc87   :  { %9451 = vmatpush3.bf16.xpose.msra.mxu0 %v11815_v37 }
 0xc88   :  { %9462 = vmatprep.subr.bf16.mxu0 %v12972_v25 }
 0xca7   :  { %v9424_v20 = vpop.f32.mrb[104].mxu0 }
 0xca8   :  { %v4361_v31 = vadd.f32 %v9424_v20, %v8560_v32  ;;  %v4352_v36 = vpop.f32.mrb[105].mxu0 }
 0xca9   :  { %v4353_v16 = vadd.f32 %v8560_v32, %v4352_v36  ;;  %v9425_v7 = vpop.f32.mrb[106].mxu0 }
 0xcaa   :  { %v4355_v44 = vpop.f32.mrb[107].mxu0  ;;  %v4364_v29 = vadd.f32 %v9425_v7, %v8560_v32 }
 0xcab   :  { %v4356_v52 = vadd.f32 %v8560_v32, %v4355_v44 }
 0xcac   :  { %v11819_v55 = vpack.c.bf16 %v4364_v29, %v4361_v31 }
 0xcad   :  { %v11821_v4 = vpack.c.bf16 %v4356_v52, %v4353_v16 }
 0xcae   :  { %v11903_v7 = vsel %vm173_vm0, %v11819_v55, 0 }
 0xcaf   :  { %v11892_v36 = vsel %vm173_vm0, %v11821_v4, 0 }
 0xd1b   :  { %v9400_v22 = vpop.f32.mrb[92].mxu1 }
 0xd1c   :  { %v4152_v56 = vpop.f32.mrb[93].mxu1  ;;  %v4161_v8 = vadd.f32 %v9400_v22, %v8553_v6 }
 0xd1d   :  { %v4153_v9 = vadd.f32 %v8553_v6, %v4152_v56  ;;  %v9401_v19 = vpop.f32.mrb[94].mxu1 }
 0xd1e   :  { %v4155_v42 = vpop.f32.mrb[95].mxu1  ;;  %v11854_v10 = vpack.c.bf16 %v4161_v8, %v4161_v8  ;;  %v4164_v38 = vadd.f32 %v9401_v19, %v8553_v6  ;;  %v5359_v8 = vpop.permute.xlu0 %5358 }
 0xd1f   :  { %v11826_v24 = vpack.c.bf16 %v4153_v9, %v4153_v9  ;;  %v4156_v32 = vadd.f32 %v8553_v6, %v4155_v42 }
 0xd20   :  { %v4385_v50 = vsel %vm10616_vm6, %v11854_v10, 0  ;;  %v11868_v28 = vpack.c.bf16 %v4164_v38, %v4164_v38  ;;  %v4884_v19 = vsel %vm10626_vm7, %v11854_v10, 0 }
 0xd21   :  { %v4383_v62 = vsel %vm10616_vm6, %v11826_v24, 0  ;;  %v11840_v11 = vpack.c.bf16 %v4156_v32, %v4156_v32  ;;  %v4882_v56 = vsel %vm10626_vm7, %v11826_v24, 0 }
 0xd22   :  { %9429 = vmatmul.mubr.msk.bf16.vlgmr.msra.gmra.mrb[100].mxu1 %vm173_vm0, %v4383_v62  ;;  %v4386_v0 = vsel %vm10616_vm6, %v11868_v28, 0  ;;  %v4885_v42 = vsel %vm10626_vm7, %v11868_v28, 0  ;;  %v11977_v62 = vpop.permute.xlu1 %4391 }
 0xd23   :  { %9433 = vmatpush3.bf16.xpose.msra.mxu1 %v11830_v43  ;;  %9434 = vmatprep.mubr.msk.bf16.mxu1 %vm10405_vm1, %v12972_v25  ;;  %v4384_v58 = vsel %vm10616_vm6, %v11840_v11, 0  ;;  %v4883_v9 = vsel %vm10626_vm7, %v11840_v11, 0 }
 0xd24   :  { %9438 = vmatprep.subr.bf16.mxu1 %v12972_v25 }
 0xd26   :  { %v5406_v38 = vpop.permute.xlu1 %5405 }
 0xd2a   :  { %9435 = vmatmul.mubr.msk.bf16.vlgmr.msra.gmra.mrb[104].mxu1 %vm173_vm0, %v4384_v58 }
 0xd2b   :  { %9439 = vmatpush3.bf16.xpose.msra.mxu1 %v11844_v60  ;;  %9440 = vmatprep.mubr.msk.bf16.mxu1 %vm10405_vm1, %v12972_v25 }
 0xd2c   :  { %9444 = vmatprep.subr.bf16.mxu1 %v12972_v25 }
 0xd32   :  { %9441 = vmatmul.mubr.msk.bf16.vlgmr.msra.gmra.mrb[108].mxu1 %vm173_vm0, %v4385_v50 }
 0xd33   :  { %9445 = vmatpush3.bf16.xpose.msra.mxu1 %v11858_v46  ;;  %9446 = vmatprep.mubr.msk.bf16.mxu1 %vm10405_vm1, %v12972_v25 }
 0xd34   :  { %9456 = vmatprep.subr.bf16.mxu1 %v12972_v25 }
 0xd3a   :  { %9447 = vmatmul.mubr.msk.bf16.vlgmr.msra.gmra.mrb[112].mxu1 %vm173_vm0, %v4386_v0 }
 0xd3b   :  { %9457 = vmatpush3.bf16.xpose.msra.mxu1 %v11872_v27  ;;  %9458 = vmatprep.mubr.msk.bf16.mxu1 %vm10405_vm1, %v12972_v25 }
 0xd3c   :  { %9468 = vmatprep.subr.bf16.mxu1 %v12972_v25 }
 0xd53   :  { %v9404_v1 = vpop.f32.mrb[96].mxu1 }
 0xd54   :  { %v4177_v5 = vadd.f32 %v9404_v1, %v8553_v6  ;;  %v4168_v3 = vpop.f32.mrb[97].mxu1 }
 0xd55   :  { %v4169_v12 = vadd.f32 %v8553_v6, %v4168_v3  ;;  %v9405_v13 = vpop.f32.mrb[98].mxu1 }
 0xd56   :  { %v4180_v14 = vadd.f32 %v9405_v13, %v8553_v6  ;;  %v4171_v41 = vpop.f32.mrb[99].mxu1  ;;  %v11906_v44 = vpack.c.bf16 %v4177_v5, %v4177_v5 }
 0xd57   :  { %v11882_v15 = vpack.c.bf16 %v4169_v12, %v4169_v12  ;;  %v4172_v47 = vadd.f32 %v8553_v6, %v4171_v41 }
 0xd58   :  { %v11912_v29 = vpack.c.bf16 %v4180_v14, %v4180_v14  ;;  %v4389_v52 = vsel %vm10616_vm6, %v11906_v44, 0  ;;  %v4888_v58 = vsel %vm10626_vm7, %v11906_v44, 0 }
 0xd59   :  { %v11884_v20 = vpack.c.bf16 %v4172_v47, %v4172_v47  ;;  %v4387_v31 = vsel %vm10616_vm6, %v11882_v15, 0  ;;  %v4886_v32 = vsel %vm10626_vm7, %v11882_v15, 0 }
 0xd5a   :  { %9453 = vmatmul.mubr.msk.bf16.vlgmr.msra.gmra.mrb[108].mxu0 %vm173_vm0, %v4387_v31  ;;  %v4390_v6 = vsel %vm10616_vm6, %v11912_v29, 0  ;;  %v4889_v50 = vsel %vm10626_vm7, %v11912_v29, 0 }
 0xd5b   :  { %9463 = vmatpush3.bf16.xpose.msra.mxu0 %v11892_v36  ;;  %v4388_v16 = vsel %vm10616_vm6, %v11884_v20, 0  ;;  %9464 = vmatprep.mubr.msk.bf16.mxu0 %vm10405_vm1, %v12972_v25  ;;  %v4887_v49 = vsel %vm10626_vm7, %v11884_v20, 0  ;;  %vm4393_vm6 = vcmp.ne.s16.totalorder %v11977_v62, 0 }
 0xd5c   :  { %9459 = vmatmul.mubr.msk.bf16.vlgmr.msra.gmra.mrb[116].mxu1 %vm173_vm0, %v4388_v16  ;;  %9474 = vmatprep.subr.bf16.mxu0 %v12972_v25  ;;  %v4397_v62 = vsel %vm4393_vm6, %v11786_v39, 0 }
 0xd5d   :  { %9469 = vmatpush3.bf16.xpose.msra.mxu1 %v11903_v7  ;;  %9470 = vmatprep.mubr.msk.bf16.mxu1 %vm10405_vm1, %v12972_v25 }
 0xd5e   :  { %9480 = vmatprep.subr.bf16.mxu1 %v12972_v25 }
 0xd62   :  { %9465 = vmatmul.mubr.msk.bf16.vlgmr.msra.gmra.mrb[112].mxu0 %vm173_vm0, %v4389_v52 }
 0xd63   :  { %9475 = vmatpush3.bf16.xpose.msra.mxu0 %v11782_v21  ;;  %9476 = vmatprep.mubr.msk.bf16.mxu0 %vm10405_vm1, %v12972_v25 }
 0xd64   :  { %9471 = vmatmul.mubr.msk.bf16.vlgmr.msra.gmra.mrb[120].mxu1 %vm173_vm0, %v4390_v6  ;;  %9486 = vmatprep.subr.bf16.mxu0 %v12972_v25 }
 0xd65   :  { %9481 = vmatpush3.bf16.xpose.msra.mxu1 %v11830_v43  ;;  %9482 = vmatprep.mubr.msk.bf16.mxu1 %vm10405_vm1, %v12972_v25 }
 0xd66   :  { %9492 = vmatprep.subr.bf16.mxu1 %v12972_v25 }
 0xd6a   :  { %9477 = vmatmul.mubr.msk.bf16.vlgmr.msra.gmra.mrb[116].mxu0 %vm173_vm0, %v4882_v56 }
 0xd6b   :  { %9487 = vmatpush3.bf16.xpose.msra.mxu0 %v11844_v60  ;;  %9488 = vmatprep.mubr.msk.bf16.mxu0 %vm10405_vm1, %v12972_v25 }
 0xd6c   :  { %9483 = vmatmul.mubr.msk.bf16.vlgmr.msra.gmra.mrb[124].mxu1 %vm173_vm0, %v4883_v9  ;;  %9498 = vmatprep.subr.bf16.mxu0 %v12972_v25 }
 0xd6d   :  { %9493 = vmatpush3.bf16.xpose.msra.mxu1 %v11858_v46  ;;  %9494 = vmatprep.mubr.msk.bf16.mxu1 %vm10405_vm1, %v12972_v25 }
 0xd6e   :  { %9504 = vmatprep.subr.bf16.mxu1 %v12972_v25 }
 0xd72   :  { %9489 = vmatmul.mubr.msk.bf16.vlgmr.msra.gmra.mrb[120].mxu0 %vm173_vm0, %v4884_v19 }
 0xd73   :  { %9499 = vmatpush3.bf16.xpose.msra.mxu0 %v11815_v37  ;;  %9500 = vmatprep.mubr.msk.bf16.mxu0 %vm10405_vm1, %v12972_v25 }
 0xd74   :  { %9495 = vmatmul.mubr.msk.bf16.vlgmr.msra.gmra.mrb[128].mxu1 %vm173_vm0, %v4885_v42  ;;  %9510 = vmatprep.subr.bf16.mxu0 %v12972_v25 }
 0xd75   :  { %9505 = vmatpush3.bf16.xpose.msra.mxu1 %v11872_v27  ;;  %9506 = vmatprep.mubr.msk.bf16.mxu1 %vm10405_vm1, %v12972_v25 }
 0xd76   :  { %9516 = vmatprep.subr.bf16.mxu1 %v12972_v25 }
 0xd7a   :  { %9501 = vmatmul.mubr.msk.bf16.vlgmr.msra.gmra.mrb[124].mxu0 %vm173_vm0, %v4886_v32 }
 0xd7b   :  { %9511 = vmatpush3.bf16.xpose.msra.mxu0 %v11892_v36  ;;  %9512 = vmatprep.mubr.msk.bf16.mxu0 %vm10405_vm1, %v12972_v25 }
 0xd7c   :  { %9507 = vmatmul.mubr.msk.bf16.vlgmr.msra.gmra.mrb[132].mxu1 %vm173_vm0, %v4887_v49  ;;  %9522 = vmatprep.subr.bf16.mxu0 %v12972_v25 }
 0xd7d   :  { %9517 = vmatpush3.bf16.xpose.msra.mxu1 %v11903_v7  ;;  %9518 = vmatprep.mubr.msk.bf16.mxu1 %vm10405_vm1, %v12972_v25 }
 0xd7e   :  { %9528 = vmatprep.subr.bf16.mxu1 %v12972_v25 }
 0xd82   :  { %9513 = vmatmul.mubr.msk.bf16.vlgmr.msra.gmra.mrb[128].mxu0 %vm173_vm0, %v4888_v58 }
 0xd83   :  { %9523 = vmatpush3.bf16.msra.mxu0 %v5359_v8  ;;  %9524 = vmatprep.mubr.msk.bf16.mxu0 %vm10405_vm1, %v12972_v25 }
 0xd84   :  { %9519 = vmatmul.mubr.msk.bf16.vlgmr.msra.gmra.mrb[136].mxu1 %vm173_vm0, %v4889_v50  ;;  %9534 = vmatprep.subr.bf16.mxu0 %v12972_v25 }
 0xd85   :  { %9529 = vmatpush3.bf16.msra.mxu1 %v5406_v38  ;;  %9530 = vmatprep.mubr.msk.bf16.mxu1 %vm10405_vm1, %v12972_v25 }
 0xd86   :  { %9540 = vmatprep.subr.bf16.mxu1 %v12972_v25 }
 0xdf5   :  { %v4442_v0 = vpop.f32.mrb[100].mxu1 }
 0xdf6   :  { %v4770_v1 = vmul.f32 0.35355338, %v4442_v0  ;;  %v9430_v5 = vpop.f32.mrb[101].mxu1 }
 0xdf7   :  { %v4445_v3 = vpop.f32.mrb[102].mxu1 }
 0xdf8   :  { %v11995_v12 = vadd.f32 %v4770_v1, %v10853_v63  ;;  %v9431_v13 = vpop.f32.mrb[103].mxu1 }
 0xdfa   :  { %v4786_v14 = vsel %vm749_vm10, %v11995_v12, -inf }
 0xdfb   :  { %4787 = vmax.xlane.f32.xlu0 %v4786_v14 }
 0xdfd   :  { %v4488_v41 = vpop.f32.mrb[104].mxu1 }
 0xdfe   :  { %v4771_v47 = vmul.f32 0.35355338, %v4488_v41  ;;  %v9436_v31 = vpop.f32.mrb[105].mxu1 }
 0xdff   :  { %v4491_v16 = vpop.f32.mrb[106].mxu1 }
 0xe00   :  { %v12000_v52 = vadd.f32 %v4771_v47, %v10853_v63  ;;  %v9437_v6 = vpop.f32.mrb[107].mxu1 }
 0xe02   :  { %v4789_v22 = vsel %vm749_vm10, %v12000_v52, -inf }
 0xe03   :  { %4790 = vmax.xlane.f32.xlu1 %v4789_v22 }
 0xe05   :  { %v4534_v56 = vpop.f32.mrb[108].mxu1 }
 0xe06   :  { %v4772_v9 = vmul.f32 0.35355338, %v4534_v56  ;;  %v9442_v19 = vpop.f32.mrb[109].mxu1 }
 0xe07   :  { %v4537_v42 = vpop.f32.mrb[110].mxu1 }
 0xe08   :  { %v12005_v32 = vadd.f32 %v4772_v9, %v10853_v63  ;;  %v9443_v49 = vpop.f32.mrb[111].mxu1 }
 0xe0a   :  { %v4792_v8 = vsel %vm749_vm10, %v12005_v32, -inf }
 0xe0b   :  { %4793 = vmax.xlane.f32.xlu0 %v4792_v8 }
 0xe0d   :  { %v4580_v58 = vpop.f32.mrb[112].mxu1 }
 0xe0e   :  { %v4773_v38 = vmul.f32 0.35355338, %v4580_v58  ;;  %v9448_v50 = vpop.f32.mrb[113].mxu1 }
 0xe0f   :  { %v4583_v0 = vpop.f32.mrb[114].mxu1 }
 0xe10   :  { %v12010_v1 = vadd.f32 %v4773_v38, %v10853_v63  ;;  %v9449_v5 = vpop.f32.mrb[115].mxu1 }
 0xe12   :  { %v4795_v3 = vsel %vm749_vm10, %v12010_v1, -inf }
 0xe13   :  { %4796 = vmax.xlane.f32.xlu1 %v4795_v3 }
 0xe2d   :  { %v4626_v13 = vpop.f32.mrb[108].mxu0 }
 0xe2e   :  { %v4774_v14 = vmul.f32 0.35355338, %v4626_v13  ;;  %v9454_v41 = vpop.f32.mrb[109].mxu0 }
 0xe2f   :  { %v4629_v47 = vpop.f32.mrb[110].mxu0  ;;  %v4672_v31 = vpop.f32.mrb[116].mxu1 }
 0xe30   :  { %v12015_v16 = vadd.f32 %v4774_v14, %v10853_v63  ;;  %v9455_v6 = vpop.f32.mrb[111].mxu0  ;;  %v9460_v22 = vpop.f32.mrb[117].mxu1  ;;  %v4775_v49 = vmul.f32 0.35355338, %v4672_v31 }
 0xe31   :  { %v4675_v56 = vpop.f32.mrb[118].mxu1 }
 0xe32   :  { %v9461_v9 = vpop.f32.mrb[119].mxu1  ;;  %v4798_v19 = vsel %vm749_vm10, %v12015_v16, -inf  ;;  %v12023_v14 = vadd.f32 %v4775_v49, %v10853_v63 }
 0xe33   :  { %4799 = vmax.xlane.f32.xlu0 %v4798_v19 }
 0xe34   :  { %v4801_v19 = vsel %vm749_vm10, %v12023_v14, -inf }
 0xe35   :  { %v4718_v42 = vpop.f32.mrb[112].mxu0 }
 0xe36   :  { %v4776_v8 = vmul.f32 0.35355338, %v4718_v42  ;;  %v9466_v58 = vpop.f32.mrb[113].mxu0 }
 0xe37   :  { %v4721_v38 = vpop.f32.mrb[114].mxu0  ;;  %v4764_v50 = vpop.f32.mrb[120].mxu1 }
 0xe38   :  { %v12020_v0 = vadd.f32 %v4776_v8, %v10853_v63  ;;  %v9467_v5 = vpop.f32.mrb[115].mxu0  ;;  %v9472_v3 = vpop.f32.mrb[121].mxu1  ;;  %v4777_v41 = vmul.f32 0.35355338, %v4764_v50 }
 0xe39   :  { %v4767_v13 = vpop.f32.mrb[122].mxu1 }
 0xe3a   :  { %v9473_v47 = vpop.f32.mrb[123].mxu1  ;;  %v4804_v6 = vsel %vm749_vm10, %v12020_v0, -inf  ;;  %v12028_v22 = vadd.f32 %v4777_v41, %v10853_v63 }
 0xe3b   :  { %4805 = vmax.xlane.f32.xlu1 %v4804_v6 }
 0xe3c   :  { %v4807_v47 = vsel %vm749_vm10, %v12028_v22, -inf }
 0xe3d   :  { %v4938_v31 = vpop.f32.mrb[116].mxu0 }
 0xe3e   :  { %v5245_v56 = vmul.f32 0.35355338, %v4938_v31  ;;  %v9478_v9 = vpop.f32.mrb[117].mxu0 }
 0xe3f   :  { %v4941_v42 = vpop.f32.mrb[118].mxu0  ;;  %4802 = vmax.xlane.f32.xlu1 %v4801_v19  ;;  %v4981_v8 = vpop.f32.mrb[124].mxu1 }
 0xe40   :  { %v12033_v49 = vadd.f32 %v5245_v56, %v10853_v63  ;;  %v5246_v58 = vmul.f32 0.35355338, %v4981_v8  ;;  %v9479_v38 = vpop.f32.mrb[119].mxu0  ;;  %v9484_v50 = vpop.f32.mrb[125].mxu1 }
 0xe41   :  { %v4984_v5 = vpop.f32.mrb[126].mxu1 }
 0xe42   :  { %v12036_v3 = vadd.f32 %v5246_v58, %v10853_v63  ;;  %v9485_v13 = vpop.f32.mrb[127].mxu1  ;;  %v5261_v41 = vsel %vm749_vm10, %v12033_v49, -inf }
 0xe43   :  { %5262 = vmax.xlane.f32.xlu0 %v5261_v41  ;;  %4808 = vmax.xlane.f32.xlu1 %v4807_v47 }
 0xe44   :  { %v5264_v9 = vsel %vm749_vm10, %v12036_v3, -inf }
 0xe45   :  { %v5024_v6 = vpop.f32.mrb[120].mxu0 }
 0xe46   :  { %v5247_v31 = vmul.f32 0.35355338, %v5024_v6  ;;  %v9490_v56 = vpop.f32.mrb[121].mxu0 }
 0xe47   :  { %v5027_v19 = vpop.f32.mrb[122].mxu0  ;;  %5265 = vmax.xlane.f32.xlu1 %v5264_v9  ;;  %v5067_v42 = vpop.f32.mrb[128].mxu1 }
 0xe48   :  { %v12045_v8 = vadd.f32 %v5247_v31, %v10853_v63  ;;  %v5248_v58 = vmul.f32 0.35355338, %v5067_v42  ;;  %v9491_v38 = vpop.f32.mrb[123].mxu0  ;;  %v9496_v50 = vpop.f32.mrb[129].mxu1 }
 0xe49   :  { %v5070_v5 = vpop.f32.mrb[130].mxu1 }
 0xe4a   :  { %v12048_v13 = vadd.f32 %v5248_v58, %v10853_v63  ;;  %v9497_v41 = vpop.f32.mrb[131].mxu1  ;;  %v5267_v47 = vsel %vm749_vm10, %v12045_v8, -inf }
 0xe4b   :  { %5268 = vmax.xlane.f32.xlu0 %v5267_v47 }
 0xe4c   :  { %v5270_v6 = vsel %vm749_vm10, %v12048_v13, -inf }
 0xe4d   :  { %v5110_v56 = vpop.f32.mrb[124].mxu0  ;;  %5271 = vmax.xlane.f32.xlu1 %v5270_v6 }
 0xe4e   :  { %v5249_v9 = vmul.f32 0.35355338, %v5110_v56  ;;  %v9502_v31 = vpop.f32.mrb[125].mxu0 }
 0xe4f   :  { %v5113_v19 = vpop.f32.mrb[126].mxu0  ;;  %v5153_v42 = vpop.f32.mrb[132].mxu1 }
 0xe50   :  { %v12055_v38 = vadd.f32 %v5249_v9, %v10853_v63  ;;  %v5250_v50 = vmul.f32 0.35355338, %v5153_v42  ;;  %v9503_v58 = vpop.f32.mrb[127].mxu0  ;;  %v9508_v5 = vpop.f32.mrb[133].mxu1 }
 0xe51   :  { %v5156_v41 = vpop.f32.mrb[134].mxu1 }
 0xe52   :  { %v12058_v2 = vadd.f32 %v5250_v50, %v10853_v63  ;;  %v9509_v47 = vpop.f32.mrb[135].mxu1  ;;  %v5273_v53 = vsel %vm749_vm10, %v12055_v38, -inf }
 0xe53   :  { %5274 = vmax.xlane.f32.xlu0 %v5273_v53 }
 0xe54   :  { %v5276_v6 = vsel %vm749_vm10, %v12058_v2, -inf }
 0xe55   :  { %v5196_v56 = vpop.f32.mrb[128].mxu0  ;;  %5277 = vmax.xlane.f32.xlu1 %v5276_v6 }
 0xe56   :  { %v5251_v31 = vmul.f32 0.35355338, %v5196_v56  ;;  %v9514_v9 = vpop.f32.mrb[129].mxu0  ;;  %v4898_v56 = vsel %vm4892_vm11, %v11809_v18, 0 }
 0xe57   :  { %v5199_v19 = vpop.f32.mrb[130].mxu0  ;;  %v5239_v42 = vpop.f32.mrb[136].mxu1 }
 0xe58   :  { %v12065_v58 = vadd.f32 %v5251_v31, %v10853_v63  ;;  %v5252_v5 = vmul.f32 0.35355338, %v5239_v42  ;;  %v9515_v50 = vpop.f32.mrb[131].mxu0  ;;  %v9520_v41 = vpop.f32.mrb[137].mxu1  ;;  %v4897_v31 = vsel %vm4892_vm11, %v11811_v26, 0 }
 0xe59   :  { %v5242_v47 = vpop.f32.mrb[138].mxu1  ;;  %v12082_v9 = vpop.permute.xlu0 %5452 }
 0xe5a   :  { %v12068_v54 = vadd.f32 %v5252_v5, %v10853_v63  ;;  %v9521_v53 = vpop.f32.mrb[139].mxu1  ;;  %v5279_v34 = vsel %vm749_vm10, %v12065_v58, -inf  ;;  %v12085_v5 = vpop.permute.xlu1 %5499 }
 0xe5b   :  { %5280 = vmax.xlane.f32.xlu0 %v5279_v34 }
 0xe5c   :  { %v5282_v6 = vsel %vm749_vm10, %v12068_v54, -inf }
 0xe5d   :  { %5283 = vmax.xlane.f32.xlu1 %v5282_v6 }
 0xe6e   :  { %5593 = vrot.lane.b32.xlu1 %v4898_v56, %s10406_s25 }
 0xe71   :  { %5546 = vrot.lane.b32.xlu0 %v4897_v31, %s10406_s25 }
 0xe88   :  { %v4788_v19 = vpop.xlane.xlu0 %4787 }
 0xe89   :  { %v4810_v34 = vsub.f32 %v11995_v12, %v4788_v19 }
 0xe8b   :  { %v4818_v42 = vmul.f32 1.442695, %v4810_v34 }
 0xe8d   :  { %10236 = vpow2.f32 %v4818_v42 }
 0xe90   :  { %v4791_v50 = vpop.xlane.xlu1 %4790 }
 0xe91   :  { %v4811_v41 = vsub.f32 %v12000_v52, %v4791_v50 }
 0xe93   :  { %v4820_v47 = vmul.f32 1.442695, %v4811_v41 }
 0xe95   :  { %10238 = vpow2.f32 %v4820_v47 }
 0xe97   :  { %v12088_v53 = vpop.eup %10236 }
 0xe98   :  { %v4794_v6 = vpop.xlane.xlu0 %4793  ;;  %v4834_v56 = vsel %vm749_vm10, %v12088_v53, 0.0 }
 0xe99   :  { %v4812_v31 = vsub.f32 %v12005_v32, %v4794_v6  ;;  %4835 = vadd.xlane.f32.xlu1 %v4834_v56 }
 0xe9b   :  { %v4822_v17 = vmul.f32 1.442695, %v4812_v31 }
 0xe9d   :  { %10240 = vpow2.f32 %v4822_v17 }
 0xe9f   :  { %v12093_v12 = vpop.eup %10238 }
 0xea0   :  { %v4797_v19 = vpop.xlane.xlu1 %4796  ;;  %v4837_v34 = vsel %vm749_vm10, %v12093_v12, 0.0 }
 0xea1   :  { %v4813_v52 = vsub.f32 %v12010_v1, %v4797_v19  ;;  %4838 = vadd.xlane.f32.xlu0 %v4837_v34 }
 0xea3   :  { %v4824_v42 = vmul.f32 1.442695, %v4813_v52 }
 0xea5   :  { %10242 = vpow2.f32 %v4824_v42 }
 0xea7   :  { %v12098_v50 = vpop.eup %10240 }
 0xea8   :  { %v4840_v41 = vsel %vm749_vm10, %v12098_v50, 0.0 }
 0xea9   :  { %4841 = vadd.xlane.f32.xlu1 %v4840_v41 }
 0xeaf   :  { %v12102_v32 = vpop.eup %10242 }
 0xeb0   :  { %v4843_v17 = vsel %vm749_vm10, %v12102_v32, 0.0 }
 0xeb1   :  { %4844 = vadd.xlane.f32.xlu0 %v4843_v17 }
 0xec0   :  { %v4800_v47 = vpop.xlane.xlu0 %4799 }
 0xec1   :  { %v4814_v6 = vsub.f32 %v12015_v16, %v4800_v47 }
 0xec3   :  { %v4826_v56 = vmul.f32 1.442695, %v4814_v6 }
 0xec5   :  { %10244 = vpow2.f32 %v4826_v56 }
 0xec8   :  { %v4806_v1 = vpop.xlane.xlu1 %4805 }
 0xecc   :  { %v4803_v31 = vpop.xlane.xlu1 %4802 }
 0xecd   :  { %v4815_v34 = vsub.f32 %v12023_v14, %v4803_v31 }
 0xecf   :  { %v12107_v19 = vpop.eup %10244  ;;  %v4828_v17 = vmul.f32 1.442695, %v4815_v34 }
 0xed0   :  { %v5263_v52 = vpop.xlane.xlu0 %5262  ;;  %v12110_v42 = vpop.xlane.xlu1 %4808  ;;  %v4846_v41 = vsel %vm749_vm10, %v12107_v19, 0.0 }
 0xed1   :  { %v5285_v30 = vsub.f32 %v12033_v49, %v5263_v52  ;;  %4847 = vadd.xlane.f32.xlu1 %v4846_v41 }
 0xed3   :  { %v5293_v57 = vmul.f32 1.442695, %v5285_v30 }
 0xed4   :  { %v5266_v16 = vpop.xlane.xlu1 %5265 }
 0xed5   :  { %10246 = vpow2.f32 %v5293_v57  ;;  %v5286_v47 = vsub.f32 %v12036_v3, %v5266_v16 }
 0xed6   :  { %10248 = vpow2.f32 %v4828_v17 }
 0xed7   :  { %v5295_v6 = vmul.f32 1.442695, %v5286_v47 }
 0xed8   :  { %v5269_v56 = vpop.xlane.xlu0 %5268 }
 0xed9   :  { %10250 = vpow2.f32 %v5295_v6  ;;  %v5287_v14 = vsub.f32 %v12045_v8, %v5269_v56 }
 0xeda   :  { %v5272_v51 = vpop.xlane.xlu1 %5271 }
 0xedb   :  { %v5297_v31 = vmul.f32 1.442695, %v5287_v14  ;;  %v5288_v49 = vsub.f32 %v12048_v13, %v5272_v51  ;;  %v4900_v14 = vsel %vm4892_vm11, %v11819_v55, 0 }
 0xedd   :  { %10252 = vpow2.f32 %v5297_v31  ;;  %v5299_v41 = vmul.f32 1.442695, %v5288_v49 }
 0xedf   :  { %v12117_v33 = vpop.eup %10246 }
 0xee0   :  { %v5275_v52 = vpop.xlane.xlu0 %5274  ;;  %v5309_v30 = vsel %vm749_vm10, %v12117_v33, 0.0  ;;  %v12122_v57 = vpop.eup %10248 }
 0xee1   :  { %v5289_v3 = vsub.f32 %v12055_v38, %v5275_v52  ;;  %5310 = vadd.xlane.f32.xlu0 %v5309_v30  ;;  %v4849_v17 = vsel %vm749_vm10, %v12122_v57, 0.0  ;;  %v4816_v52 = vsub.f32 %v12020_v0, %v4806_v1  ;;  %v4817_v0 = vsub.f32 %v12028_v22, %v12110_v42 }
 0xee2   :  { %v5278_v31 = vpop.xlane.xlu1 %5277 }
 0xee3   :  { %v12125_v34 = vpop.eup %10250  ;;  %v5301_v8 = vmul.f32 1.442695, %v5289_v3  ;;  %v5290_v49 = vsub.f32 %v12058_v2, %v5278_v31 }
 0xee4   :  { %v5312_v16 = vsel %vm749_vm10, %v12125_v34, 0.0 }
 0xee5   :  { %10254 = vpow2.f32 %v5301_v8  ;;  %4850 = vadd.xlane.f32.xlu0 %v4849_v17  ;;  %5313 = vadd.xlane.f32.xlu1 %v5312_v16  ;;  %v5303_v30 = vmul.f32 1.442695, %v5290_v49  ;;  %v4830_v8 = vmul.f32 1.442695, %v4816_v52 }
 0xee6   :  { %10256 = vpow2.f32 %v5299_v41  ;;  %v4899_v41 = vsel %vm4892_vm11, %v11821_v4, 0 }
 0xee7   :  { %v12131_v51 = vpop.eup %10252  ;;  %10258 = vpow2.f32 %v5303_v30  ;;  %v4395_v30 = vsel %vm4393_vm6, %v11776_v61, 0 }
 0xee8   :  { %v5315_v13 = vsel %vm749_vm10, %v12131_v51, 0.0  ;;  %10260 = vpow2.f32 %v4830_v8  ;;  %v4400_v8 = vsel %vm4393_vm6, %v11821_v4, 0 }
 0xee9   :  { %5316 = vadd.xlane.f32.xlu0 %v5315_v13  ;;  %v5281_v13 = vpop.xlane.xlu0 %5280 }
 0xeea   :  { %v5284_v3 = vpop.xlane.xlu1 %5283 }
 0xeeb   :  { %v5292_v17 = vsub.f32 %v12068_v54, %v5284_v3  ;;  %v4396_v3 = vsel %vm4393_vm6, %v11788_v59, 0 }
 0xeed   :  { %v5307_v16 = vmul.f32 1.442695, %v5292_v17  ;;  %v4394_v17 = vsel %vm4393_vm6, %v11778_v40, 0 }
 0xeef   :  { %v12135_v38 = vpop.eup %10254  ;;  %10262 = vpow2.f32 %v5307_v16  ;;  %v4399_v16 = vsel %vm4393_vm6, %v11809_v18, 0 }
 0xef0   :  { %v5321_v47 = vsel %vm749_vm10, %v12135_v38, 0.0  ;;  %v12139_v6 = vpop.eup %10256 }
 0xef1   :  { %5322 = vadd.xlane.f32.xlu0 %v5321_v47  ;;  %v5318_v56 = vsel %vm749_vm10, %v12139_v6, 0.0  ;;  %v5291_v47 = vsub.f32 %v12065_v58, %v5281_v13  ;;  %v12155_v2 = vpop.eup %10258  ;;  %v4401_v13 = vsel %vm4393_vm6, %v11819_v55, 0 }
 0xef2   :  { %v5324_v48 = vsel %vm749_vm10, %v12155_v2, 0.0 }
 0xef3   :  { %v5305_v1 = vmul.f32 1.442695, %v5291_v47  ;;  %v5547_v47 = vpop.permute.xlu0 %5546 }
 0xef5   :  { %5319 = vadd.xlane.f32.xlu0 %v5318_v56  ;;  %v12161_v56 = vpop.eup %10260  ;;  %10264 = vpow2.f32 %v5305_v1 }
 0xef6   :  { %5687 = vrot.lane.b32.xlu1 %v4900_v14, %s10406_s25  ;;  %v4832_v14 = vmul.f32 1.442695, %v4817_v0  ;;  %v4852_v54 = vsel %vm749_vm10, %v12161_v56, 0.0  ;;  %v5594_v0 = vpop.permute.xlu1 %5593 }
 0xef8   :  { %10266 = vpow2.f32 %v4832_v14 }
 0xef9   :  { %v12165_v31 = vpop.eup %10262 }
 0xefa   :  { %v5330_v58 = vsel %vm749_vm10, %v12165_v31, 0.0 }
 0xeff   :  { %v12169_v22 = vpop.eup %10264 }
 0xf00   :  { %v5327_v42 = vsel %vm749_vm10, %v12169_v22, 0.0 }
 0xf02   :  { %v12173_v49 = vpop.eup %10266 }
 0xf03   :  { %v4855_v52 = vsel %vm749_vm10, %v12173_v49, 0.0 }
 0xf0b   :  { %5640 = vrot.lane.b32.xlu0 %v4899_v41, %s10406_s25  ;;  %v4398_v41 = vsel %vm4393_vm6, %v11811_v26, 0 }
 0xf1a   :  { %5325 = vadd.xlane.f32.xlu1 %v5324_v48 }
 0xf1e   :  { %4853 = vadd.xlane.f32.xlu1 %v4852_v54 }
 0xf22   :  { %5331 = vadd.xlane.f32.xlu1 %v5330_v58 }
 0xf26   :  { %v12194_v1 = vpop.xlane.xlu1 %4835 }
 0xf2a   :  { %5328 = vadd.xlane.f32.xlu0 %v5327_v42 }
 0xf2e   :  { %4856 = vadd.xlane.f32.xlu0 %v4855_v52  ;;  %v4839_v48 = vpop.xlane.xlu0 %4838 }
 0xf33   :  { %5781 = vrot.lane.b32.xlu1 %v4395_v30, %s10406_s25 }
 0xf36   :  { %v12196_v14 = vpop.xlane.xlu1 %4841 }
 0xf37   :  { %5828 = vrot.lane.b32.xlu1 %v4396_v3, %s10406_s25 }
 0xf3b   :  { %5922 = vrot.lane.b32.xlu1 %v4398_v41, %s10406_s25 }
 0xf3e   :  { %v12198_v54 = vpop.xlane.xlu0 %4844 }
 0xf3f   :  { %6016 = vrot.lane.b32.xlu1 %v4400_v8, %s10406_s25 }
 0xf44   :  { %5734 = vrot.lane.b32.xlu0 %v4394_v17, %s10406_s25 }
 0xf48   :  { %5875 = vrot.lane.b32.xlu0 %v4397_v62, %s10406_s25 }
 0xf4c   :  { %5969 = vrot.lane.b32.xlu0 %v4399_v16, %s10406_s25 }
 0xf50   :  { %6063 = vrot.lane.b32.xlu0 %v4401_v13, %s10406_s25 }
 0xf5e   :  { %v12200_v58 = vpop.xlane.xlu1 %4847 }
 0xf6e   :  { %v5311_v42 = vpop.xlane.xlu0 %5310 }
 0xf6f   :  { %10268 = vrcp.f32 %v5311_v42 }
 0xf72   :  { %v12202_v52 = vpop.xlane.xlu0 %4850  ;;  %v5314_v30 = vpop.xlane.xlu1 %5313 }
 0xf73   :  { %10270 = vrcp.f32 %v5314_v30 }
 0xf76   :  { %v5317_v3 = vpop.xlane.xlu0 %5316 }
 0xf77   :  { %10272 = vrcp.f32 %v5317_v3 }
 0xf79   :  { %v10269_v41 = vpop.eup %10268 }
 0xf7a   :  { %v5341_v8 = vmul.f32 %v10269_v41, %v12117_v33 }
 0xf7c   :  { %v5349_v17 = vpack.c.bf16 %v5341_v8, %v5341_v8 }
 0xf7d   :  { %v10271_v62 = vpop.eup %10270 }
 0xf7e   :  { %9525 = vmatmul.mubr.msk.bf16.vlgmr.msra.gmra.mrb[132].mxu0 %vm749_vm10, %v5349_v17  ;;  %v5323_v16 = vpop.xlane.xlu0 %5322  ;;  %v5342_v13 = vmul.f32 %v10271_v62, %v12125_v34 }
 0xf7f   :  { %9535 = vmatpush3.bf16.msra.mxu0 %v12082_v9  ;;  %10274 = vrcp.f32 %v5323_v16  ;;  %9536 = vmatprep.mubr.msk.bf16.mxu0 %vm10405_vm1, %v12972_v25 }
 0xf80   :  { %9546 = vmatprep.subr.bf16.mxu0 %v12972_v25  ;;  %v5350_v30 = vpack.c.bf16 %v5342_v13, %v5342_v13 }
 0xf81   :  { %v10273_v42 = vpop.eup %10272 }
 0xf82   :  { %v5343_v3 = vmul.f32 %v10273_v42, %v12131_v51  ;;  %v5320_v33 = vpop.xlane.xlu0 %5319  ;;  %9531 = vmatmul.mubr.msk.bf16.vlgmr.msra.gmra.mrb[140].mxu1 %vm749_vm10, %v5350_v30 }
 0xf83   :  { %10276 = vrcp.f32 %v5320_v33  ;;  %9541 = vmatpush3.bf16.msra.mxu1 %v12085_v5  ;;  %9542 = vmatprep.mubr.msk.bf16.mxu1 %vm10405_vm1, %v12972_v25 }
 0xf84   :  { %v5351_v41 = vpack.c.bf16 %v5343_v3, %v5343_v3  ;;  %9552 = vmatprep.subr.bf16.mxu1 %v12972_v25 }
 0xf86   :  { %9537 = vmatmul.mubr.msk.bf16.vlgmr.msra.gmra.mrb[136].mxu0 %vm749_vm10, %v5351_v41  ;;  %v5641_v17 = vpop.permute.xlu0 %5640 }
 0xf87   :  { %9547 = vmatpush3.bf16.msra.mxu0 %v5547_v47  ;;  %9548 = vmatprep.mubr.msk.bf16.mxu0 %vm10405_vm1, %v12972_v25 }
 0xf88   :  { %9558 = vmatprep.subr.bf16.mxu0 %v12972_v25 }
 0xf89   :  { %v10275_v9 = vpop.eup %10274 }
 0xf8a   :  { %v5345_v34 = vmul.f32 %v10275_v9, %v12135_v38  ;;  %v5688_v38 = vpop.permute.xlu1 %5687 }
 0xf8c   :  { %v5353_v51 = vpack.c.bf16 %v5345_v34, %v5345_v34 }
 0xf8d   :  { %v10277_v8 = vpop.eup %10276 }
 0xf8e   :  { %v5344_v5 = vmul.f32 %v10277_v8, %v12139_v6  ;;  %9549 = vmatmul.mubr.msk.bf16.vlgmr.msra.gmra.mrb[140].mxu0 %vm749_vm10, %v5353_v51 }
 0xf8f   :  { %9559 = vmatpush3.bf16.msra.mxu0 %v5641_v17  ;;  %9560 = vmatprep.mubr.msk.bf16.mxu0 %vm10405_vm1, %v12972_v25 }
 0xf90   :  { %v5352_v47 = vpack.c.bf16 %v5344_v5, %v5344_v5  ;;  %9570 = vmatprep.subr.bf16.mxu0 %v12972_v25 }
 0xf92   :  { %9543 = vmatmul.mubr.msk.bf16.vlgmr.msra.gmra.mrb[144].mxu1 %vm749_vm10, %v5352_v47 }
 0xf93   :  { %9553 = vmatpush3.bf16.msra.mxu1 %v5594_v0  ;;  %9554 = vmatprep.mubr.msk.bf16.mxu1 %vm10405_vm1, %v12972_v25 }
 0xf94   :  { %9564 = vmatprep.subr.bf16.mxu1 %v12972_v25 }
 0xfa7   :  { %v5326_v6 = vpop.xlane.xlu1 %5325 }
 0xfa8   :  { %10278 = vrcp.f32 %v5326_v6 }
 0xfab   :  { %v12231_v62 = vpop.xlane.xlu1 %4853 }
 0xfaf   :  { %v5332_v16 = vpop.xlane.xlu1 %5331 }
 0xfb0   :  { %10280 = vrcp.f32 %v5332_v16 }
 0xfb1   :  { %10282 = vrcp.f32 %v4839_v48 }
 0xfb2   :  { %v10279_v13 = vpop.eup %10278 }
 0xfb3   :  { %v5346_v42 = vmul.f32 %v10279_v13, %v12155_v2  ;;  %v5782_v9 = vpop.permute.xlu1 %5781 }
 0xfb5   :  { %v5354_v30 = vpack.c.bf16 %v5346_v42, %v5346_v42 }
 0xfb7   :  { %v5329_v3 = vpop.xlane.xlu0 %5328  ;;  %9555 = vmatmul.mubr.msk.bf16.vlgmr.msra.gmra.mrb[148].mxu1 %vm749_vm10, %v5354_v30 }
 0xfb8   :  { %10284 = vrcp.f32 %v5329_v3  ;;  %9565 = vmatpush3.bf16.msra.mxu1 %v5688_v38  ;;  %9566 = vmatprep.mubr.msk.bf16.mxu1 %vm10405_vm1, %v12972_v25 }
 0xfb9   :  { %9576 = vmatprep.subr.bf16.mxu1 %v12972_v25  ;;  %10286 = vrcp.f32 %v12194_v1 }
 0xfba   :  { %v10281_v0 = vpop.eup %10280  ;;  %10288 = vrcp.f32 %v12198_v54 }
 0xfbb   :  { %v4857_v33 = vpop.xlane.xlu0 %4856  ;;  %v5348_v41 = vmul.f32 %v10281_v0, %v12165_v31  ;;  %v10283_v48 = vpop.eup %10282  ;;  %10290 = vrcp.f32 %v12196_v14 }
 0xfbc   :  { %v4867_v34 = vmul.f32 %v10283_v48, %v12093_v12  ;;  %10292 = vrcp.f32 %v12202_v52 }
 0xfbd   :  { %v5356_v2 = vpack.c.bf16 %v5348_v41, %v5348_v41  ;;  %10294 = vrcp.f32 %v12200_v58 }
 0xfbe   :  { %v4875_v5 = vpack.c.bf16 %v4867_v34, %v4867_v34  ;;  %10296 = vrcp.f32 %v4857_v33  ;;  %v6112_v34 = vsel %vm11154_vm15, %v11868_v28, 0 }
 0xfbf   :  { %9567 = vmatmul.mubr.msk.bf16.vlgmr.msra.gmra.mrb[152].mxu1 %vm749_vm10, %v5356_v2  ;;  %v5735_v51 = vpop.permute.xlu0 %5734  ;;  %10298 = vrcp.f32 %v12231_v62 }
 0xfc0   :  { %9577 = vmatpush3.bf16.msra.mxu1 %v5782_v9  ;;  %9578 = vmatprep.mubr.msk.bf16.mxu1 %vm10405_vm1, %v12972_v25  ;;  %v6110_v9 = vsel %vm11154_vm15, %v11840_v11, 0 }
 0xfc1   :  { %9588 = vmatprep.subr.bf16.mxu1 %v12972_v25 }
 0xfc2   :  { %v10285_v1 = vpop.eup %10284 }
 0xfc3   :  { %v5347_v31 = vmul.f32 %v10285_v1, %v12169_v22  ;;  %v10287_v54 = vpop.eup %10286  ;;  %v5876_v47 = vpop.permute.xlu0 %5875  ;;  %v6114_v1 = vsel %vm11154_vm15, %v11884_v20, 0 }
 0xfc4   :  { %v10289_v17 = vpop.eup %10288  ;;  %v4866_v22 = vmul.f32 %v10287_v54, %v12088_v53  ;;  %v6116_v54 = vsel %vm11154_vm15, %v11912_v29, 0 }
 0xfc5   :  { %v5355_v8 = vpack.c.bf16 %v5347_v31, %v5347_v31  ;;  %v4869_v12 = vmul.f32 %v10289_v17, %v12102_v32  ;;  %v10291_v14 = vpop.eup %10290  ;;  %v5829_v32 = vpop.permute.xlu1 %5828  ;;  %v6113_v31 = vsel %vm11154_vm15, %v11882_v15, 0 }
 0xfc6   :  { %v4874_v52 = vpack.c.bf16 %v4866_v22, %v4866_v22  ;;  %v10293_v6 = vpop.eup %10292  ;;  %v4868_v58 = vmul.f32 %v10291_v14, %v12098_v50 }
 0xfc7   :  { %9561 = vmatmul.mubr.msk.bf16.vlgmr.msra.gmra.mrb[144].mxu0 %vm749_vm10, %v5355_v8  ;;  %9579 = vmatmul.mubr.msk.bf16.vlgmr.msra.gmra.mrb[140].mxu1 %vm749_vm10, %v4875_v5  ;;  %v4877_v38 = vpack.c.bf16 %v4869_v12, %v4869_v12  ;;  %v5970_v16 = vpop.permute.xlu0 %5969  ;;  %v4871_v53 = vmul.f32 %v10293_v6, %v12122_v57  ;;  %v10295_v13 = vpop.eup %10294  ;;  %v6115_v8 = vsel %vm11154_vm15, %v11906_v44, 0 }
 0xfc8   :  { %9571 = vmatpush3.bf16.msra.mxu0 %v5735_v51  ;;  %9589 = vmatpush3.bf16.msra.mxu1 %v5876_v47  ;;  %v4876_v42 = vpack.c.bf16 %v4868_v58, %v4868_v58  ;;  %v10297_v3 = vpop.eup %10296  ;;  %v4870_v62 = vmul.f32 %v10295_v13, %v12107_v19  ;;  %v6111_v51 = vsel %vm11154_vm15, %v11854_v10, 0 }
 0xfc9   :  { %9572 = vmatprep.mubr.msk.bf16.mxu0 %vm10405_vm1, %v12972_v25  ;;  %9582 = vmatprep.subr.bf16.mxu0 %v12972_v25  ;;  %v4879_v30 = vpack.c.bf16 %v4871_v53, %v4871_v53  ;;  %v5923_v0 = vpop.permute.xlu1 %5922  ;;  %v4873_v50 = vmul.f32 %v10297_v3, %v12173_v49  ;;  %v10299_v2 = vpop.eup %10298 }
 0xfca   :  { %9590 = vmatprep.mubr.msk.bf16.mxu1 %vm10405_vm1, %v12972_v25  ;;  %9600 = vmatprep.subr.bf16.mxu1 %v12972_v25  ;;  %v4878_v33 = vpack.c.bf16 %v4870_v62, %v4870_v62  ;;  %v4872_v19 = vmul.f32 %v10299_v2, %v12161_v56  ;;  %v6109_v56 = vsel %vm11154_vm15, %v11826_v24, 0 }
 0xfcb   :  { %v6064_v57 = vpop.permute.xlu0 %6063  ;;  %v4881_v41 = vpack.c.bf16 %v4873_v50, %v4873_v50 }
 0xfcc   :  { %v4880_v49 = vpack.c.bf16 %v4872_v19, %v4872_v19 }
 0xfcd   :  { %v6017_v48 = vpop.permute.xlu1 %6016 }
 0xfcf   :  { %9573 = vmatmul.mubr.msk.bf16.vlgmr.msra.gmra.mrb[132].mxu0 %vm749_vm10, %v4874_v52  ;;  %9591 = vmatmul.mubr.msk.bf16.vlgmr.msra.gmra.mrb[144].mxu1 %vm749_vm10, %v4877_v38 }
 0xfd0   :  { %9583 = vmatpush3.bf16.msra.mxu0 %v5829_v32  ;;  %9601 = vmatpush3.bf16.msra.mxu1 %v5970_v16 }
 0xfd1   :  { %9584 = vmatprep.mubr.msk.bf16.mxu0 %vm10405_vm1, %v12972_v25  ;;  %9594 = vmatprep.subr.bf16.mxu0 %v12972_v25 }
 0xfd2   :  { %9602 = vmatprep.mubr.msk.bf16.mxu1 %vm10405_vm1, %v12972_v25  ;;  %9612 = vmatprep.subr.bf16.mxu1 %v12972_v25 }
 0xfd7   :  { %9585 = vmatmul.mubr.msk.bf16.vlgmr.msra.gmra.mrb[136].mxu0 %vm749_vm10, %v4876_v42  ;;  %9603 = vmatmul.mubr.msk.bf16.vlgmr.msra.gmra.mrb[148].mxu1 %vm749_vm10, %v4879_v30 }
 0xfd8   :  { %9595 = vmatpush3.bf16.msra.mxu0 %v5923_v0  ;;  %9613 = vmatpush3.bf16.msra.mxu1 %v6064_v57 }
 0xfd9   :  { %9596 = vmatprep.mubr.msk.bf16.mxu0 %vm10405_vm1, %v12972_v25  ;;  %9606 = vmatprep.subr.bf16.mxu0 %v12972_v25 }
 0xfda   :  { %9614 = vmatprep.mubr.msk.bf16.mxu1 %vm10405_vm1, %v12972_v25  ;;  %9624 = vmatprep.subr.bf16.mxu1 %v12972_v25 }
 0xfdf   :  { %9597 = vmatmul.mubr.msk.bf16.vlgmr.msra.gmra.mrb[140].mxu0 %vm749_vm10, %v4878_v33  ;;  %9615 = vmatmul.mubr.msk.bf16.vlgmr.msra.gmra.mrb[152].mxu1 %vm749_vm10, %v4881_v41 }
 0xfe0   :  { %9607 = vmatpush3.bf16.msra.mxu0 %v6017_v48  ;;  %9608 = vmatprep.mubr.msk.bf16.mxu0 %vm10405_vm1, %v12972_v25 }
 0xfe1   :  { %9625 = vmatpush3.bf16.xpose.msra.mxu1 %v11830_v43  ;;  %9626 = vmatprep.mubr.msk.bf16.mxu1 %vm10405_vm1, %v12972_v25 }
 0xfe2   :  { %9618 = vmatprep.subr.bf16.mxu0 %v12972_v25  ;;  %9636 = vmatprep.subr.bf16.mxu1 %v12972_v25 }
 0xfe7   :  { %9609 = vmatmul.mubr.msk.bf16.vlgmr.msra.gmra.mrb[144].mxu0 %vm749_vm10, %v4880_v49 }
 0xfe8   :  { %9627 = vmatmul.mubr.msk.bf16.vlgmr.msra.gmra.mrb[156].mxu1 %vm173_vm0, %v6110_v9  ;;  %9620 = vmatprep.mubr.msk.bf16.mxu0 %vm10405_vm1, %v12972_v25 }
 0xfe9   :  { %9619 = vmatpush3.bf16.xpose.msra.mxu0 %v11782_v21  ;;  %9637 = vmatpush3.bf16.xpose.msra.mxu1 %v11858_v46 }
 0xfea   :  { %9638 = vmatprep.mubr.msk.bf16.mxu1 %vm10405_vm1, %v12972_v25  ;;  %9630 = vmatprep.subr.bf16.mxu0 %v12972_v25 }
 0xfeb   :  { %9648 = vmatprep.subr.bf16.mxu1 %v12972_v25 }
 0xff0   :  { %9621 = vmatmul.mubr.msk.bf16.vlgmr.msra.gmra.mrb[148].mxu0 %vm173_vm0, %v6109_v56  ;;  %9639 = vmatmul.mubr.msk.bf16.vlgmr.msra.gmra.mrb[160].mxu1 %vm173_vm0, %v6112_v34 }
 0xff1   :  { %9631 = vmatpush3.bf16.xpose.msra.mxu0 %v11844_v60  ;;  %9649 = vmatpush3.bf16.xpose.msra.mxu1 %v11872_v27 }
 0xff2   :  { %9632 = vmatprep.mubr.msk.bf16.mxu0 %vm10405_vm1, %v12972_v25  ;;  %9650 = vmatprep.mubr.msk.bf16.mxu1 %vm10405_vm1, %v12972_v25 }
 0xff3   :  { %9642 = vmatprep.subr.bf16.mxu0 %v12972_v25  ;;  %9660 = vmatprep.subr.bf16.mxu1 %v12972_v25 }
 0xff8   :  { %9633 = vmatmul.mubr.msk.bf16.vlgmr.msra.gmra.mrb[152].mxu0 %vm173_vm0, %v6111_v51  ;;  %9651 = vmatmul.mubr.msk.bf16.vlgmr.msra.gmra.mrb[164].mxu1 %vm173_vm0, %v6114_v1 }
 0xff9   :  { %9643 = vmatpush3.bf16.xpose.msra.mxu0 %v11815_v37  ;;  %9661 = vmatpush3.bf16.xpose.msra.mxu1 %v11903_v7 }
 0xffa   :  { %9644 = vmatprep.mubr.msk.bf16.mxu0 %vm10405_vm1, %v12972_v25  ;;  %9662 = vmatprep.mubr.msk.bf16.mxu1 %vm10405_vm1, %v12972_v25 }
 0xffb   :  { %9654 = vmatprep.subr.bf16.mxu0 %v12972_v25  ;;  %9672 = vmatprep.subr.bf16.mxu1 %v12972_v25 }
0x1000   :  { %9645 = vmatmul.mubr.msk.bf16.vlgmr.msra.gmra.mrb[156].mxu0 %vm173_vm0, %v6113_v31  ;;  %9663 = vmatmul.mubr.msk.bf16.vlgmr.msra.gmra.mrb[168].mxu1 %vm173_vm0, %v6116_v54 }
0x1001   :  { %9655 = vmatpush3.bf16.xpose.msra.mxu0 %v11892_v36  ;;  %9656 = vmatprep.mubr.msk.bf16.mxu0 %vm10405_vm1, %v12972_v25 }
0x1002   :  { %9666 = vmatprep.subr.bf16.mxu0 %v12972_v25  ;;  %9674 = vmatprep.mubr.msk.bf16.mxu1 %vm10405_vm1, %v12972_v25 }
0x1008   :  { %9657 = vmatmul.mubr.msk.bf16.vlgmr.msra.gmra.mrb[160].mxu0 %vm173_vm0, %v6115_v8 }
0x1009   :  { %9668 = vmatprep.mubr.msk.bf16.mxu0 %vm10405_vm1, %v12972_v25 }
0x10bb   :  { %v6208_v5 = vpop.f32.mrb[156].mxu1 }
0x10bc   :  { %v6473_v17 = vmul.f32 0.35355338, %v6208_v5  ;;  %v9628_v47 = vpop.f32.mrb[157].mxu1 }
0x10bd   :  { %v6211_v12 = vpop.f32.mrb[158].mxu1 }
0x10be   :  { %v12357_v22 = vadd.f32 %v6473_v17, %v10853_v63  ;;  %v9629_v14 = vpop.f32.mrb[159].mxu1 }
0x10c0   :  { %v6491_v52 = vsel %vm749_vm10, %v12357_v22, -inf }
0x10c1   :  { %6492 = vmax.xlane.f32.xlu0 %v6491_v52 }
0x10c3   :  { %v6165_v38 = vpop.f32.mrb[148].mxu0  ;;  %v6294_v23 = vpop.f32.mrb[160].mxu1 }
0x10c4   :  { %v6472_v6 = vmul.f32 0.35355338, %v6165_v38  ;;  %v6475_v32 = vmul.f32 0.35355338, %v6294_v23  ;;  %v9622_v16 = vpop.f32.mrb[149].mxu0  ;;  %v9640_v53 = vpop.f32.mrb[161].mxu1 }
0x10c5   :  { %v6168_v58 = vpop.f32.mrb[150].mxu0  ;;  %v6297_v13 = vpop.f32.mrb[162].mxu1 }
0x10c6   :  { %v6480_v42 = vadd.f32 %v6472_v6, %v10853_v63  ;;  %v9623_v30 = vpop.f32.mrb[151].mxu0  ;;  %v9641_v3 = vpop.f32.mrb[163].mxu1  ;;  %v12363_v0 = vadd.f32 %v6475_v32, %v10853_v63 }
0x10c8   :  { %v6488_v57 = vsel %vm749_vm10, %v6480_v42, -inf  ;;  %v6497_v48 = vsel %vm749_vm10, %v12363_v0, -inf }
0x10c9   :  { %6489 = vmax.xlane.f32.xlu1 %v6488_v57 }
0x10cb   :  { %v6251_v50 = vpop.f32.mrb[152].mxu0  ;;  %v6380_v62 = vpop.f32.mrb[164].mxu1 }
0x10cc   :  { %v6474_v33 = vmul.f32 0.35355338, %v6251_v50  ;;  %v9634_v41 = vpop.f32.mrb[153].mxu0  ;;  %v9652_v2 = vpop.f32.mrb[165].mxu1 }
0x10cd   :  { %v6254_v19 = vpop.f32.mrb[154].mxu0  ;;  %6498 = vmax.xlane.f32.xlu1 %v6497_v48  ;;  %v6383_v49 = vpop.f32.mrb[166].mxu1 }
0x10ce   :  { %v6482_v9 = vadd.f32 %v6474_v33, %v10853_v63  ;;  %v9635_v56 = vpop.f32.mrb[155].mxu0  ;;  %v9653_v34 = vpop.f32.mrb[167].mxu1 }
0x10cf   :  { %v6477_v34 = vmul.f32 0.35355338, %v6380_v62 }
0x10d0   :  { %v6494_v51 = vsel %vm749_vm10, %v6482_v9, -inf }
0x10d1   :  { %6495 = vmax.xlane.f32.xlu0 %v6494_v51 }
0x10d3   :  { %v6337_v1 = vpop.f32.mrb[156].mxu0  ;;  %v6466_v31 = vpop.f32.mrb[168].mxu1 }
0x10d4   :  { %v6476_v54 = vmul.f32 0.35355338, %v6337_v1  ;;  %v9646_v8 = vpop.f32.mrb[157].mxu0  ;;  %v9664_v5 = vpop.f32.mrb[169].mxu1 }
0x10d5   :  { %v6340_v17 = vpop.f32.mrb[158].mxu0  ;;  %v6469_v47 = vpop.f32.mrb[170].mxu1  ;;  %v6479_v8 = vmul.f32 0.35355338, %v6466_v31 }
0x10d6   :  { %v6484_v12 = vadd.f32 %v6476_v54, %v10853_v63  ;;  %v9647_v14 = vpop.f32.mrb[159].mxu0  ;;  %v9665_v52 = vpop.f32.mrb[171].mxu1  ;;  %v6485_v54 = vadd.f32 %v6477_v34, %v10853_v63 }
0x10d7   :  { %v6487_v47 = vadd.f32 %v6479_v8, %v10853_v63 }
0x10d8   :  { %v6500_v38 = vsel %vm749_vm10, %v6484_v12, -inf  ;;  %v6503_v52 = vsel %vm749_vm10, %v6485_v54, -inf }
0x10d9   :  { %6501 = vmax.xlane.f32.xlu0 %v6500_v38 }
0x10db   :  { %v6423_v23 = vpop.f32.mrb[160].mxu0 }
0x10dc   :  { %v6478_v6 = vmul.f32 0.35355338, %v6423_v23  ;;  %v9658_v32 = vpop.f32.mrb[161].mxu0 }
0x10dd   :  { %v6426_v16 = vpop.f32.mrb[162].mxu0 }
0x10de   :  { %v6486_v53 = vadd.f32 %v6478_v6, %v10853_v63  ;;  %v9659_v58 = vpop.f32.mrb[163].mxu0 }
0x10e0   :  { %v6506_v13 = vsel %vm749_vm10, %v6486_v53, -inf }
0x10e1   :  { %6507 = vmax.xlane.f32.xlu0 %v6506_v13 }
0x10f7   :  { %6117 = vrot.lane.b32.xlu0 %v11254_v45, %s10409_s8 }
0x114e   :  { %v6493_v30 = vpop.xlane.xlu0 %6492 }
0x114f   :  { %v6513_v51 = vsub.f32 %v12357_v22, %v6493_v30  ;;  %v6509_v22 = vsel %vm749_vm10, %v6487_v47, -inf }
0x1151   :  { %v6522_v5 = vmul.f32 1.442695, %v6513_v51 }
0x1156   :  { %v6490_v48 = vpop.xlane.xlu1 %6489 }
0x1157   :  { %v6512_v19 = vsub.f32 %v6480_v42, %v6490_v48 }
0x1159   :  { %v6520_v49 = vmul.f32 1.442695, %v6512_v19 }
0x115a   :  { %v6499_v14 = vpop.xlane.xlu1 %6498 }
0x115b   :  { %10300 = vpow2.f32 %v6520_v49  ;;  %v6515_v42 = vsub.f32 %v12363_v0, %v6499_v14 }
0x115d   :  { %v6526_v38 = vmul.f32 1.442695, %v6515_v42 }
0x115e   :  { %v6496_v3 = vpop.xlane.xlu0 %6495 }
0x115f   :  { %v6514_v56 = vsub.f32 %v6482_v9, %v6496_v3 }
0x1161   :  { %v6524_v1 = vmul.f32 1.442695, %v6514_v56 }
0x1163   :  { %10302 = vpow2.f32 %v6524_v1 }
0x1164   :  { %10304 = vpow2.f32 %v6522_v5 }
0x1165   :  { %v10301_v9 = vpop.eup %10300 }
0x1166   :  { %v6502_v57 = vpop.xlane.xlu0 %6501  ;;  %v6536_v23 = vsel %vm749_vm10, %v10301_v9, 0.0 }
0x1167   :  { %v6516_v17 = vsub.f32 %v6484_v12, %v6502_v57 }
0x1169   :  { %v6528_v62 = vmul.f32 1.442695, %v6516_v17 }
0x116b   :  { %10306 = vpow2.f32 %v6528_v62 }
0x116c   :  { %10308 = vpow2.f32 %v6526_v38 }
0x116d   :  { %v12398_v12 = vpop.eup %10302 }
0x116e   :  { %v6508_v50 = vpop.xlane.xlu0 %6507  ;;  %v6542_v32 = vsel %vm749_vm10, %v12398_v12, 0.0  ;;  %v10305_v16 = vpop.eup %10304 }
0x116f   :  { %v6518_v31 = vsub.f32 %v6486_v53, %v6508_v50  ;;  %v6539_v0 = vsel %vm749_vm10, %v10305_v16, 0.0 }
0x1171   :  { %v6532_v6 = vmul.f32 1.442695, %v6518_v31 }
0x1172   :  { %v12376_v33 = vpop.permute.xlu0 %6117 }
0x1173   :  { %vm6119_vm7 = vcmp.ne.s16.totalorder %v12376_v33, 0  ;;  %10310 = vpow2.f32 %v6532_v6  ;;  %v6968_v33 = vsel %vm11284_vm8, %v11826_v24, 0 }
0x1174   :  { %v6120_v41 = vsel %vm6119_vm7, %v11778_v40, 0  ;;  %v6121_v2 = vsel %vm6119_vm7, %v11776_v61, 0  ;;  %v6122_v45 = vsel %vm6119_vm7, %v11788_v59, 0  ;;  %v6124_v50 = vsel %vm6119_vm7, %v11811_v26, 0 }
0x1175   :  { %6585 = vrot.lane.b32.xlu1 %v6120_v41, %s10406_s25  ;;  %v12403_v58 = vpop.eup %10306  ;;  %v6125_v41 = vsel %vm6119_vm7, %v11809_v18, 0 }
0x1176   :  { %v6548_v53 = vsel %vm749_vm10, %v12403_v58, 0.0  ;;  %v12407_v13 = vpop.eup %10308 }
0x1177   :  { %v6545_v30 = vsel %vm749_vm10, %v12407_v13, 0.0 }
0x1179   :  { %6632 = vrot.lane.b32.xlu1 %v6121_v2, %s10406_s25  ;;  %v6126_v2 = vsel %vm6119_vm7, %v11821_v4, 0 }
0x117d   :  { %6679 = vrot.lane.b32.xlu1 %v6122_v45, %s10406_s25  ;;  %v12411_v3 = vpop.eup %10310 }
0x117e   :  { %v6554_v57 = vsel %vm749_vm10, %v12411_v3, 0.0 }
0x11a1   :  { %6504 = vmax.xlane.f32.xlu1 %v6503_v52 }
0x11a5   :  { %6510 = vmax.xlane.f32.xlu1 %v6509_v22 }
0x11a9   :  { %6537 = vadd.xlane.f32.xlu1 %v6536_v23 }
0x11ad   :  { %6543 = vadd.xlane.f32.xlu1 %v6542_v32 }
0x11b1   :  { %6540 = vadd.xlane.f32.xlu1 %v6539_v0 }
0x11b5   :  { %6549 = vadd.xlane.f32.xlu1 %v6548_v53 }
0x11b9   :  { %6546 = vadd.xlane.f32.xlu1 %v6545_v30 }
0x11bd   :  { %6555 = vadd.xlane.f32.xlu1 %v6554_v57 }
0x11ce   :  { %6773 = vrot.lane.b32.xlu1 %v6124_v50, %s10406_s25 }
0x11d2   :  { %6820 = vrot.lane.b32.xlu1 %v6125_v41, %s10406_s25 }
0x11d6   :  { %6867 = vrot.lane.b32.xlu1 %v6126_v2, %s10406_s25  ;;  %v6127_v2 = vsel %vm6119_vm7, %v11819_v55, 0 }
0x11e7   :  { %v6586_v45 = vpop.permute.xlu1 %6585 }
0x11e8   :  { %9667 = vmatpush3.bf16.msra.mxu0 %v6586_v45  ;;  %v6123_v45 = vsel %vm6119_vm7, %v11786_v39, 0 }
0x11e9   :  { %9678 = vmatprep.subr.bf16.mxu0 %v12972_v25 }
0x11eb   :  { %v6633_v48 = vpop.permute.xlu1 %6632 }
0x11ec   :  { %9673 = vmatpush3.bf16.msra.mxu1 %v6633_v48 }
0x11ed   :  { %9684 = vmatprep.subr.bf16.mxu1 %v12972_v25 }
0x11ef   :  { %v6680_v19 = vpop.permute.xlu1 %6679 }
0x122e   :  { %v6505_v49 = vpop.xlane.xlu1 %6504 }
0x122f   :  { %v6517_v56 = vsub.f32 %v6485_v54, %v6505_v49 }
0x1231   :  { %v6530_v34 = vmul.f32 1.442695, %v6517_v56 }
0x1232   :  { %v6511_v51 = vpop.xlane.xlu1 %6510 }
0x1233   :  { %10312 = vpow2.f32 %v6530_v34  ;;  %v6519_v1 = vsub.f32 %v6487_v47, %v6511_v51 }
0x1235   :  { %v6534_v8 = vmul.f32 1.442695, %v6519_v1 }
0x1236   :  { %v6538_v5 = vpop.xlane.xlu1 %6537 }
0x1237   :  { %10314 = vpow2.f32 %v6534_v8 }
0x1238   :  { %10316 = vrcp.f32 %v6538_v5 }
0x123a   :  { %v6544_v17 = vpop.xlane.xlu1 %6543 }
0x123b   :  { %10318 = vrcp.f32 %v6544_v17 }
0x123d   :  { %v12429_v14 = vpop.eup %10312 }
0x123e   :  { %v6541_v52 = vpop.xlane.xlu1 %6540  ;;  %v6551_v42 = vsel %vm749_vm10, %v12429_v14, 0.0 }
0x123f   :  { %10320 = vrcp.f32 %v6541_v52  ;;  %6552 = vadd.xlane.f32.xlu0 %v6551_v42  ;;  %v6971_v52 = vsel %vm11284_vm8, %v11868_v28, 0 }
0x1241   :  { %v12433_v62 = vpop.eup %10314 }
0x1242   :  { %v10317_v54 = vpop.eup %10316  ;;  %v6550_v22 = vpop.xlane.xlu1 %6549  ;;  %v6557_v47 = vsel %vm749_vm10, %v12433_v62, 0.0 }
0x1243   :  { %v6568_v38 = vmul.f32 %v10317_v54, %v10301_v9  ;;  %6558 = vadd.xlane.f32.xlu1 %v6557_v47  ;;  %10322 = vrcp.f32 %v6550_v22 }
0x1245   :  { %v6576_v31 = vpack.c.bf16 %v6568_v38, %v6568_v38  ;;  %v10319_v23 = vpop.eup %10318 }
0x1246   :  { %v6547_v6 = vpop.xlane.xlu1 %6546  ;;  %v6570_v0 = vmul.f32 %v10319_v23, %v12398_v12 }
0x1247   :  { %9669 = vmatmul.mubr.msk.bf16.vlgmr.msra.gmra.mrb[132].mxu0 %vm749_vm10, %v6576_v31 }
0x1248   :  { %9679 = vmatpush3.bf16.msra.mxu0 %v6680_v19  ;;  %9680 = vmatprep.mubr.msk.bf16.mxu0 %vm10405_vm1, %v12972_v25  ;;  %v6578_v57 = vpack.c.bf16 %v6570_v0, %v6570_v0 }
0x1249   :  { %v10321_v32 = vpop.eup %10320  ;;  %9690 = vmatprep.subr.bf16.mxu0 %v12972_v25 }
0x124a   :  { %v6569_v53 = vmul.f32 %v10321_v32, %v10305_v16  ;;  %v6556_v30 = vpop.xlane.xlu1 %6555 }
0x124b   :  { %10324 = vrcp.f32 %v6556_v30 }
0x124c   :  { %v6577_v9 = vpack.c.bf16 %v6569_v53, %v6569_v53  ;;  %10326 = vrcp.f32 %v6547_v6 }
0x124d   :  { %v10323_v50 = vpop.eup %10322 }
0x124e   :  { %9675 = vmatmul.mubr.msk.bf16.vlgmr.msra.gmra.mrb[140].mxu1 %vm749_vm10, %v6577_v9  ;;  %v6774_v41 = vpop.permute.xlu1 %6773  ;;  %v6572_v12 = vmul.f32 %v10323_v50, %v12403_v58 }
0x124f   :  { %9681 = vmatmul.mubr.msk.bf16.vlgmr.msra.gmra.mrb[136].mxu0 %vm749_vm10, %v6578_v57  ;;  %9686 = vmatprep.mubr.msk.bf16.mxu1 %vm10405_vm1, %v12972_v25 }
0x1250   :  { %9691 = vmatpush3.bf16.msra.mxu0 %v6774_v41  ;;  %9692 = vmatprep.mubr.msk.bf16.mxu0 %vm10405_vm1, %v12972_v25  ;;  %v6580_v48 = vpack.c.bf16 %v6572_v12, %v6572_v12 }
0x1251   :  { %9702 = vmatprep.subr.bf16.mxu0 %v12972_v25 }
0x1252   :  { %v6821_v16 = vpop.permute.xlu1 %6820 }
0x1254   :  { %6914 = vrot.lane.b32.xlu1 %v6127_v2, %s10406_s25 }
0x1255   :  { %6726 = vrot.lane.b32.xlu0 %v6123_v45, %s10406_s25  ;;  %v10325_v19 = vpop.eup %10324 }
0x1256   :  { %v6868_v49 = vpop.permute.xlu1 %6867  ;;  %v6574_v58 = vmul.f32 %v10325_v19, %v12411_v3  ;;  %v6970_v3 = vsel %vm11284_vm8, %v11854_v10, 0  ;;  %v10327_v24 = vpop.eup %10326 }
0x1257   :  { %9693 = vmatmul.mubr.msk.bf16.vlgmr.msra.gmra.mrb[140].mxu0 %vm749_vm10, %v6580_v48  ;;  %v6571_v10 = vmul.f32 %v10327_v24, %v12407_v13 }
0x1258   :  { %9703 = vmatpush3.bf16.msra.mxu0 %v6868_v49  ;;  %9704 = vmatprep.mubr.msk.bf16.mxu0 %vm10405_vm1, %v12972_v25  ;;  %v6582_v56 = vpack.c.bf16 %v6574_v58, %v6574_v58 }
0x1259   :  { %9714 = vmatprep.subr.bf16.mxu0 %v12972_v25  ;;  %v6579_v34 = vpack.c.bf16 %v6571_v10, %v6571_v10 }
0x125f   :  { %9705 = vmatmul.mubr.msk.bf16.vlgmr.msra.gmra.mrb[144].mxu0 %vm749_vm10, %v6582_v56 }
0x1260   :  { %9716 = vmatprep.mubr.msk.bf16.mxu0 %vm10405_vm1, %v12972_v25 }
0x1261   :  { %9715 = vmatpush3.bf16.xpose.msra.mxu0 %v11782_v21  ;;  %v6972_v21 = vsel %vm11284_vm8, %v11882_v15, 0 }
0x1262   :  { %9726 = vmatprep.subr.bf16.mxu0 %v12972_v25 }
0x1268   :  { %9717 = vmatmul.mubr.msk.bf16.vlgmr.msra.gmra.mrb[164].mxu0 %vm173_vm0, %v6968_v33 }
0x1269   :  { %9727 = vmatpush3.bf16.xpose.msra.mxu0 %v11844_v60  ;;  %9728 = vmatprep.mubr.msk.bf16.mxu0 %vm10405_vm1, %v12972_v25 }
0x126a   :  { %9738 = vmatprep.subr.bf16.mxu0 %v12972_v25 }
0x1270   :  { %9729 = vmatmul.mubr.msk.bf16.vlgmr.msra.gmra.mrb[168].mxu0 %vm173_vm0, %v6970_v3 }
0x1271   :  { %9739 = vmatpush3.bf16.xpose.msra.mxu0 %v11815_v37  ;;  %9740 = vmatprep.mubr.msk.bf16.mxu0 %vm10405_vm1, %v12972_v25  ;;  %v6974_v37 = vsel %vm11284_vm8, %v11906_v44, 0 }
0x1272   :  { %9750 = vmatprep.subr.bf16.mxu0 %v12972_v25 }
0x1278   :  { %9741 = vmatmul.mubr.msk.bf16.vlgmr.msra.gmra.mrb[172].mxu0 %vm173_vm0, %v6972_v21 }
0x1279   :  { %9751 = vmatpush3.bf16.xpose.msra.mxu0 %v11892_v36  ;;  %9752 = vmatprep.mubr.msk.bf16.mxu0 %vm10405_vm1, %v12972_v25 }
0x127a   :  { %9762 = vmatprep.subr.bf16.mxu0 %v12972_v25 }
0x1280   :  { %9753 = vmatmul.mubr.msk.bf16.vlgmr.msra.gmra.mrb[176].mxu0 %vm173_vm0, %v6974_v37 }
0x1281   :  { %9764 = vmatprep.mubr.msk.bf16.mxu0 %vm10405_vm1, %v12972_v25 }
0x12cc   :  { %v6553_v60 = vpop.xlane.xlu0 %6552 }
0x12cd   :  { %10328 = vrcp.f32 %v6553_v60 }
0x12d0   :  { %v6727_v15 = vpop.permute.xlu0 %6726  ;;  %v6559_v36 = vpop.xlane.xlu1 %6558 }
0x12d1   :  { %10330 = vrcp.f32 %v6559_v36  ;;  %9685 = vmatpush3.bf16.msra.mxu1 %v6727_v15 }
0x12d2   :  { %9696 = vmatprep.subr.bf16.mxu1 %v12972_v25 }
0x12d4   :  { %9687 = vmatmul.mubr.msk.bf16.vlgmr.msra.gmra.mrb[144].mxu1 %vm749_vm10, %v6579_v34  ;;  %v6915_v8 = vpop.permute.xlu1 %6914 }
0x12d5   :  { %9697 = vmatpush3.bf16.msra.mxu1 %v6821_v16  ;;  %9698 = vmatprep.mubr.msk.bf16.mxu1 %vm10405_vm1, %v12972_v25 }
0x12d6   :  { %9708 = vmatprep.subr.bf16.mxu1 %v12972_v25 }
0x12d7   :  { %v10329_v44 = vpop.eup %10328 }
0x12d8   :  { %v6573_v51 = vmul.f32 %v10329_v44, %v12429_v14  ;;  %v6969_v14 = vsel %vm11284_vm8, %v11840_v11, 0  ;;  %v6975_v11 = vsel %vm11284_vm8, %v11912_v29, 0 }
0x12da   :  { %v6581_v1 = vpack.c.bf16 %v6573_v51, %v6573_v51 }
0x12db   :  { %v10331_v13 = vpop.eup %10330 }
0x12dc   :  { %9699 = vmatmul.mubr.msk.bf16.vlgmr.msra.gmra.mrb[148].mxu1 %vm749_vm10, %v6581_v1  ;;  %v6575_v5 = vmul.f32 %v10331_v13, %v12433_v62 }
0x12dd   :  { %9709 = vmatpush3.bf16.msra.mxu1 %v6915_v8  ;;  %9710 = vmatprep.mubr.msk.bf16.mxu1 %vm10405_vm1, %v12972_v25 }
0x12de   :  { %9720 = vmatprep.subr.bf16.mxu1 %v12972_v25  ;;  %v6583_v17 = vpack.c.bf16 %v6575_v5, %v6575_v5 }
0x12e4   :  { %9711 = vmatmul.mubr.msk.bf16.vlgmr.msra.gmra.mrb[152].mxu1 %vm749_vm10, %v6583_v17 }
0x12e5   :  { %9722 = vmatprep.mubr.msk.bf16.mxu1 %vm10405_vm1, %v12972_v25 }
0x12e6   :  { %9721 = vmatpush3.bf16.xpose.msra.mxu1 %v11830_v43  ;;  %v6973_v43 = vsel %vm11284_vm8, %v11884_v20, 0 }
0x12e7   :  { %9732 = vmatprep.subr.bf16.mxu1 %v12972_v25 }
0x12ed   :  { %9723 = vmatmul.mubr.msk.bf16.vlgmr.msra.gmra.mrb[172].mxu1 %vm173_vm0, %v6969_v14  ;;  %v12993_v14 = vld [vmem:[#allocation4_spill] sm:$0xff] }
0x12ee   :  { %9733 = vmatpush3.bf16.xpose.msra.mxu1 %v11858_v46  ;;  %9734 = vmatprep.mubr.msk.bf16.mxu1 %vm10405_vm1, %v12972_v25 }
0x12ef   :  { %9744 = vmatprep.subr.bf16.mxu1 %v12972_v25 }
0x12f5   :  { %9735 = vmatmul.mubr.msk.bf16.vlgmr.msra.gmra.mrb[176].mxu1 %vm173_vm0, %v6971_v52 }
0x12f6   :  { %9745 = vmatpush3.bf16.xpose.msra.mxu1 %v11872_v27  ;;  %9746 = vmatprep.mubr.msk.bf16.mxu1 %vm10405_vm1, %v12972_v25 }
0x12f7   :  { %9756 = vmatprep.subr.bf16.mxu1 %v12972_v25 }
0x12fd   :  { %9747 = vmatmul.mubr.msk.bf16.vlgmr.msra.gmra.mrb[180].mxu1 %vm173_vm0, %v6973_v43 }
0x12fe   :  { %9757 = vmatpush3.bf16.xpose.msra.mxu1 %v11903_v7  ;;  %9758 = vmatprep.mubr.msk.bf16.mxu1 %vm10405_vm1, %v12972_v25 }
0x12ff   :  { %9768 = vmatprep.subr.bf16.mxu1 %v12972_v25 }
0x1305   :  { %9759 = vmatmul.mubr.msk.bf16.vlgmr.msra.gmra.mrb[184].mxu1 %vm173_vm0, %v6975_v11 }
0x1306   :  { %9770 = vmatprep.mubr.msk.bf16.mxu1 %vm10405_vm1, %v12972_v25 }
0x133b   :  { %v7024_v46 = vpop.f32.mrb[164].mxu0 }
0x133c   :  { %v7331_v28 = vmul.f32 0.35355338, %v7024_v46  ;;  %v9718_v27 = vpop.f32.mrb[165].mxu0 }
0x133d   :  { %v7027_v20 = vpop.f32.mrb[166].mxu0 }
0x133e   :  { %v12546_v7 = vadd.f32 %v7331_v28, %v10853_v63  ;;  %v9719_v42 = vpop.f32.mrb[167].mxu0 }
0x1340   :  { %v7347_v62 = vsel %vm749_vm10, %v12546_v7, -inf }
0x1341   :  { %7348 = vmax.xlane.f32.xlu1 %v7347_v62 }
0x1343   :  { %v7110_v54 = vpop.f32.mrb[168].mxu0 }
0x1344   :  { %v9730_v35 = vpop.f32.mrb[169].mxu0  ;;  %v7333_v9 = vmul.f32 0.35355338, %v7110_v54 }
0x1345   :  { %v7113_v29 = vpop.f32.mrb[170].mxu0 }
0x1346   :  { %v9731_v22 = vpop.f32.mrb[171].mxu0  ;;  %v7341_v2 = vadd.f32 %v7333_v9, %v10853_v63 }
0x1348   :  { %v7353_v3 = vsel %vm749_vm10, %v7341_v2, -inf }
0x134b   :  { %v7196_v47 = vpop.f32.mrb[172].mxu0 }
0x134c   :  { %v9742_v38 = vpop.f32.mrb[173].mxu0  ;;  %v7335_v45 = vmul.f32 0.35355338, %v7196_v47 }
0x134d   :  { %v7199_v31 = vpop.f32.mrb[174].mxu0 }
0x134e   :  { %v9743_v23 = vpop.f32.mrb[175].mxu0  ;;  %v12554_v49 = vadd.f32 %v7335_v45, %v10853_v63 }
0x1350   :  { %v7359_v10 = vsel %vm749_vm10, %v12554_v49, -inf }
0x1353   :  { %v7282_v6 = vpop.f32.mrb[176].mxu0 }
0x1354   :  { %v9754_v32 = vpop.f32.mrb[177].mxu0  ;;  %v7337_v58 = vmul.f32 0.35355338, %v7282_v6 }
0x1355   :  { %v7285_v0 = vpop.f32.mrb[178].mxu0 }
0x1356   :  { %v9755_v53 = vpop.f32.mrb[179].mxu0  ;;  %v7345_v60 = vadd.f32 %v7337_v58, %v10853_v63 }
0x1358   :  { %v7365_v44 = vsel %vm749_vm10, %v7345_v60, -inf }
0x13c0   :  { %v7067_v30 = vpop.f32.mrb[172].mxu1 }
0x13c1   :  { %v7332_v57 = vmul.f32 0.35355338, %v7067_v30  ;;  %v9724_v50 = vpop.f32.mrb[173].mxu1 }
0x13c2   :  { %v7070_v41 = vpop.f32.mrb[174].mxu1 }
0x13c3   :  { %v7340_v12 = vadd.f32 %v7332_v57, %v10853_v63  ;;  %v9725_v16 = vpop.f32.mrb[175].mxu1 }
0x13c5   :  { %v7350_v48 = vsel %vm749_vm10, %v7340_v12, -inf }
0x13c6   :  { %7351 = vmax.xlane.f32.xlu0 %v7350_v48 }
0x13c8   :  { %v7153_v19 = vpop.f32.mrb[176].mxu1 }
0x13c9   :  { %v7334_v56 = vmul.f32 0.35355338, %v7153_v19  ;;  %v9736_v33 = vpop.f32.mrb[177].mxu1 }
0x13ca   :  { %7354 = vmax.xlane.f32.xlu0 %v7353_v3  ;;  %v7156_v21 = vpop.f32.mrb[178].mxu1 }
0x13cb   :  { %v7342_v37 = vadd.f32 %v7334_v56, %v10853_v63  ;;  %v9737_v24 = vpop.f32.mrb[179].mxu1 }
0x13cd   :  { %v7356_v15 = vsel %vm749_vm10, %v7342_v37, -inf }
0x13ce   :  { %7360 = vmax.xlane.f32.xlu0 %v7359_v10  ;;  %7357 = vmax.xlane.f32.xlu1 %v7356_v15 }
0x13d0   :  { %v7239_v36 = vpop.f32.mrb[180].mxu1 }
0x13d1   :  { %v9748_v34 = vpop.f32.mrb[181].mxu1 }
0x13d2   :  { %7366 = vmax.xlane.f32.xlu0 %v7365_v44  ;;  %v7242_v51 = vpop.f32.mrb[182].mxu1 }
0x13d3   :  { %v9749_v1 = vpop.f32.mrb[183].mxu1 }
0x13d8   :  { %v7325_v13 = vpop.f32.mrb[184].mxu1 }
0x13d9   :  { %v9760_v8 = vpop.f32.mrb[185].mxu1  ;;  %v7338_v32 = vmul.f32 0.35355338, %v7325_v13 }
0x13da   :  { %v7328_v5 = vpop.f32.mrb[186].mxu1 }
0x13db   :  { %v9761_v17 = vpop.f32.mrb[187].mxu1 }
0x13e8   :  { %6976 = vrot.lane.b32.xlu0 %v12993_v14, %s10409_s8 }
0x1453   :  { %v7352_v52 = vpop.xlane.xlu0 %7351 }
0x1454   :  { %v7372_v31 = vsub.f32 %v7340_v12, %v7352_v52 }
0x1456   :  { %v7381_v0 = vmul.f32 1.442695, %v7372_v31 }
0x1457   :  { %v7355_v43 = vpop.xlane.xlu0 %7354 }
0x1458   :  { %v7373_v38 = vsub.f32 %v7341_v2, %v7355_v43 }
0x145a   :  { %v7383_v23 = vmul.f32 1.442695, %v7373_v38 }
0x145b   :  { %v7361_v11 = vpop.xlane.xlu0 %7360 }
0x145c   :  { %v7375_v53 = vsub.f32 %v12554_v49, %v7361_v11 }
0x145e   :  { %v7387_v9 = vmul.f32 1.442695, %v7375_v53 }
0x145f   :  { %v7367_v46 = vpop.xlane.xlu0 %7366 }
0x1460   :  { %v7377_v28 = vsub.f32 %v7345_v60, %v7367_v46 }
0x1462   :  { %v7391_v27 = vmul.f32 1.442695, %v7377_v28 }
0x1463   :  { %v12565_v20 = vpop.permute.xlu0 %6976 }
0x1464   :  { %10332 = vpow2.f32 %v7391_v27  ;;  %vm6978_vm12 = vcmp.ne.s16.totalorder %v12565_v20, 0  ;;  %v10076_v20 = vld [vmem:[%s12923_s10] sm:$0xff]  }
0x1465   :  { %v6979_v42 = vsel %vm6978_vm12, %v11778_v40, 0  ;;  %v6980_v62 = vsel %vm6978_vm12, %v11776_v61, 0  ;;  %v6981_v54 = vsel %vm6978_vm12, %v11788_v59, 0  ;;  %v7349_v40 = vpop.xlane.xlu1 %7348  ;;  %v6982_v61 = vsel %vm6978_vm12, %v11786_v39, 0 }
0x1466   :  { %7444 = vrot.lane.b32.xlu1 %v6979_v42, %s10406_s25  ;;  %v7371_v22 = vsub.f32 %v12546_v7, %v7349_v40  ;;  %v7336_v59 = vmul.f32 0.35355338, %v7239_v36  ;;  %v7346_v7 = vadd.f32 %v7338_v32, %v10853_v63  ;;  %v6983_v33 = vsel %vm6978_vm12, %v11811_v26, 0 }
0x1467   :  { %v6984_v3 = vsel %vm6978_vm12, %v11809_v18, 0  ;;  %v6985_v21 = vsel %vm6978_vm12, %v11821_v4, 0 }
0x1468   :  { %v7379_v47 = vmul.f32 1.442695, %v7371_v22  ;;  %v7344_v6 = vadd.f32 %v7336_v59, %v10853_v63  ;;  %v7368_v50 = vsel %vm749_vm10, %v7346_v7, -inf }
0x1469   :  { %v7358_v30 = vpop.xlane.xlu1 %7357 }
0x146a   :  { %7491 = vrot.lane.b32.xlu1 %v6980_v62, %s10406_s25  ;;  %10334 = vpow2.f32 %v7379_v47  ;;  %v7362_v39 = vsel %vm749_vm10, %v7344_v6, -inf  ;;  %v7374_v57 = vsub.f32 %v7342_v37, %v7358_v30  ;;  %v10077_v30 = vld [vmem:[%s12923_s10 + $0x8] sm:$0xff]  }
0x146b   :  { %10336 = vpow2.f32 %v7383_v23  ;;  %v6986_v23 = vsel %vm6978_vm12, %v11819_v55, 0 }
0x146c   :  { %10338 = vpow2.f32 %v7381_v0  ;;  %v7385_v12 = vmul.f32 1.442695, %v7374_v57 }
0x146d   :  { %10340 = vpow2.f32 %v7387_v9 }
0x146e   :  { %v12579_v35 = vpop.eup %10332  ;;  %7538 = vrot.lane.b32.xlu1 %v6981_v54, %s10406_s25  ;;  %10342 = vpow2.f32 %v7385_v12 }
0x146f   :  { %v7413_v29 = vsel %vm749_vm10, %v12579_v35, 0.0 }
0x1470   :  { %7414 = vadd.xlane.f32.xlu0 %v7413_v29 }
0x1474   :  { %v10335_v41 = vpop.eup %10334 }
0x1475   :  { %v7395_v16 = vsel %vm749_vm10, %v10335_v41, 0.0  ;;  %v10337_v2 = vpop.eup %10336 }
0x1476   :  { %v7401_v63 = vsel %vm749_vm10, %v10337_v2, 0.0  ;;  %v10339_v45 = vpop.eup %10338 }
0x1477   :  { %v7398_v48 = vsel %vm749_vm10, %v10339_v45, 0.0  ;;  %v12597_v19 = vpop.eup %10340 }
0x1478   :  { %v7407_v49 = vsel %vm749_vm10, %v12597_v19, 0.0  ;;  %v12601_v58 = vpop.eup %10342 }
0x1479   :  { %v7404_v56 = vsel %vm749_vm10, %v12601_v58, 0.0 }
0x1486   :  { %7585 = vrot.lane.b32.xlu0 %v6982_v61, %s10406_s25 }
0x1492   :  { %7363 = vmax.xlane.f32.xlu1 %v7362_v39 }
0x1496   :  { %7369 = vmax.xlane.f32.xlu1 %v7368_v50 }
0x149a   :  { %7396 = vadd.xlane.f32.xlu1 %v7395_v16 }
0x149e   :  { %7402 = vadd.xlane.f32.xlu1 %v7401_v63 }
0x14a2   :  { %7399 = vadd.xlane.f32.xlu1 %v7398_v48 }
0x14a6   :  { %7408 = vadd.xlane.f32.xlu1 %v7407_v49 }
0x14aa   :  { %7405 = vadd.xlane.f32.xlu1 %v7404_v56 }
0x14bb   :  { %7632 = vrot.lane.b32.xlu1 %v6983_v33, %s10406_s25 }
0x14bf   :  { %7679 = vrot.lane.b32.xlu1 %v6984_v3, %s10406_s25 }
0x14c3   :  { %7726 = vrot.lane.b32.xlu1 %v6985_v21, %s10406_s25 }
0x14d8   :  { %v7445_v37 = vpop.permute.xlu1 %7444 }
0x14d9   :  { %9763 = vmatpush3.bf16.msra.mxu0 %v7445_v37 }
0x14da   :  { %9774 = vmatprep.subr.bf16.mxu0 %v12972_v25 }
0x14dc   :  { %v7492_v24 = vpop.permute.xlu1 %7491 }
0x14dd   :  { %9769 = vmatpush3.bf16.msra.mxu1 %v7492_v24 }
0x14de   :  { %9780 = vmatprep.subr.bf16.mxu1 %v12972_v25 }
0x14e0   :  { %v7539_v26 = vpop.permute.xlu1 %7538 }
0x14fd   :  { %v7415_v28 = vpop.xlane.xlu0 %7414 }
0x1501   :  { %v7586_v61 = vpop.permute.xlu0 %7585 }
0x151f   :  { %v7364_v60 = vpop.xlane.xlu1 %7363 }
0x1520   :  { %v7376_v10 = vsub.f32 %v7344_v6, %v7364_v60 }
0x1522   :  { %v7389_v18 = vmul.f32 1.442695, %v7376_v10 }
0x1523   :  { %v7370_v15 = vpop.xlane.xlu1 %7369 }
0x1524   :  { %10344 = vpow2.f32 %v7389_v18  ;;  %v7378_v36 = vsub.f32 %v7346_v7, %v7370_v15 }
0x1526   :  { %v7393_v34 = vmul.f32 1.442695, %v7378_v36 }
0x1527   :  { %v7397_v44 = vpop.xlane.xlu1 %7396 }
0x1528   :  { %10346 = vpow2.f32 %v7393_v34 }
0x1529   :  { %10348 = vrcp.f32 %v7397_v44 }
0x152b   :  { %v7403_v4 = vpop.xlane.xlu1 %7402 }
0x152c   :  { %10350 = vrcp.f32 %v7403_v4 }
0x152e   :  { %v12619_v51 = vpop.eup %10344 }
0x152f   :  { %v7400_v1 = vpop.xlane.xlu1 %7399  ;;  %v7410_v13 = vsel %vm749_vm10, %v12619_v51, 0.0 }
0x1530   :  { %10352 = vrcp.f32 %v7400_v1  ;;  %7411 = vadd.xlane.f32.xlu1 %v7410_v13 }
0x1532   :  { %v12623_v8 = vpop.eup %10346 }
0x1533   :  { %v10349_v5 = vpop.eup %10348  ;;  %v7409_v17 = vpop.xlane.xlu1 %7408  ;;  %v7416_v14 = vsel %vm749_vm10, %v12623_v8, 0.0 }
0x1534   :  { %v7427_v52 = vmul.f32 %v10349_v5, %v10335_v41  ;;  %7417 = vadd.xlane.f32.xlu1 %v7416_v14  ;;  %10354 = vrcp.f32 %v7409_v17 }
0x1536   :  { %v7435_v43 = vpack.c.bf16 %v7427_v52, %v7427_v52  ;;  %v10351_v11 = vpop.eup %10350 }
0x1537   :  { %v7406_v46 = vpop.xlane.xlu1 %7405  ;;  %v7429_v42 = vmul.f32 %v10351_v11, %v10337_v2 }
0x1538   :  { %9765 = vmatmul.mubr.msk.bf16.vlgmr.msra.gmra.mrb[132].mxu0 %vm749_vm10, %v7435_v43  ;;  %10356 = vrcp.f32 %v7406_v46 }
0x1539   :  { %9775 = vmatpush3.bf16.msra.mxu0 %v7539_v26  ;;  %9776 = vmatprep.mubr.msk.bf16.mxu0 %vm10405_vm1, %v12972_v25  ;;  %10358 = vrcp.f32 %v7415_v28  ;;  %v7437_v40 = vpack.c.bf16 %v7429_v42, %v7429_v42 }
0x153a   :  { %v10353_v27 = vpop.eup %10352  ;;  %9786 = vmatprep.subr.bf16.mxu0 %v12972_v25 }
0x153b   :  { %v7428_v62 = vmul.f32 %v10353_v27, %v10339_v45  ;;  %v7633_v54 = vpop.permute.xlu1 %7632 }
0x153d   :  { %v7436_v29 = vpack.c.bf16 %v7428_v62, %v7428_v62  ;;  %v8643_v62 = vld [vmem:[%s12924_s11] ss:$0 sm:$0xff] }
0x153e   :  { %v10355_v22 = vpop.eup %10354 }
0x153f   :  { %9771 = vmatmul.mubr.msk.bf16.vlgmr.msra.gmra.mrb[140].mxu1 %vm749_vm10, %v7436_v29  ;;  %v7431_v38 = vmul.f32 %v10355_v22, %v12597_v19  ;;  %v7680_v59 = vpop.permute.xlu1 %7679 }
0x1540   :  { %9777 = vmatmul.mubr.msk.bf16.vlgmr.msra.gmra.mrb[136].mxu0 %vm749_vm10, %v7437_v40  ;;  %9781 = vmatpush3.bf16.msra.mxu1 %v7586_v61 }
0x1541   :  { %9787 = vmatpush3.bf16.msra.mxu0 %v7633_v54  ;;  %9782 = vmatprep.mubr.msk.bf16.mxu1 %vm10405_vm1, %v12972_v25  ;;  %v7439_v32 = vpack.c.bf16 %v7431_v38, %v7431_v38 }
0x1542   :  { %v10357_v47 = vpop.eup %10356  ;;  %9788 = vmatprep.mubr.msk.bf16.mxu0 %vm10405_vm1, %v12972_v25  ;;  %9792 = vmatprep.subr.bf16.mxu1 %v12972_v25 }
0x1543   :  { %v7430_v31 = vmul.f32 %v10357_v47, %v12601_v58  ;;  %9798 = vmatprep.subr.bf16.mxu0 %v12972_v25  ;;  %v10359_v0 = vpop.eup %10358  ;;  %v7727_v53 = vpop.permute.xlu1 %7726 }
0x1544   :  { %v7433_v7 = vmul.f32 %v10359_v0, %v12579_v35  ;;  %v12996_v0 = vld [vmem:[#allocation6_spill] sm:$0xff] }
0x1545   :  { %7773 = vrot.lane.b32.xlu1 %v6986_v23, %s10406_s25  ;;  %v7438_v6 = vpack.c.bf16 %v7430_v31, %v7430_v31 }
0x1546   :  { %v7441_v55 = vpack.c.bf16 %v7433_v7, %v7433_v7 }
0x1547   :  { %9783 = vmatmul.mubr.msk.bf16.vlgmr.msra.gmra.mrb[144].mxu1 %vm749_vm10, %v7438_v6  ;;  %v12995_v6 = vld [vmem:[#allocation8_spill] sm:$0xff] }
0x1548   :  { %9789 = vmatmul.mubr.msk.bf16.vlgmr.msra.gmra.mrb[140].mxu0 %vm749_vm10, %v7439_v32  ;;  %9793 = vmatpush3.bf16.msra.mxu1 %v7680_v59  ;;  %v12994_v59 = vld [vmem:[#allocation5_spill] sm:$0xff] }
0x1549   :  { %9799 = vmatpush3.bf16.msra.mxu0 %v7727_v53  ;;  %9800 = vmatprep.mubr.msk.bf16.mxu0 %vm10405_vm1, %v12972_v25 }
0x154a   :  { %9794 = vmatprep.mubr.msk.bf16.mxu1 %vm10405_vm1, %v12972_v25  ;;  %9804 = vmatprep.subr.bf16.mxu1 %v12972_v25 }
0x154b   :  { %9810 = vmatprep.subr.bf16.mxu0 %v10076_v20 }
0x1550   :  { %9801 = vmatmul.mubr.msk.bf16.vlgmr.msra.gmra.mrb[144].mxu0 %vm749_vm10, %v7441_v55  ;;  %v12997_v55 = vld [vmem:[#allocation7_spill] sm:$0xff] }
0x1551   :  { %9811 = vmatpush3.bf16.msra.mxu0 %v10076_v20 }
0x1552   :  { %9812 = vmatprep.subr.bf16.mxu0 %v10077_v30 }
0x1555   :  { %9813 = vmatpush3.bf16.msra.mxu0 %v10077_v30 }
0x15bd   :  { %v7412_v35 = vpop.xlane.xlu1 %7411 }
0x15be   :  { %10360 = vrcp.f32 %v7412_v35 }
0x15c1   :  { %v7418_v39 = vpop.xlane.xlu1 %7417 }
0x15c2   :  { %10362 = vrcp.f32 %v7418_v39 }
0x15c5   :  { %v7774_v12 = vpop.permute.xlu1 %7773 }
0x15c8   :  { %v10361_v9 = vpop.eup %10360 }
0x15c9   :  { %v7432_v57 = vmul.f32 %v10361_v9, %v12619_v51 }
0x15cb   :  { %v7440_v50 = vpack.c.bf16 %v7432_v57, %v7432_v57 }
0x15cc   :  { %v10363_v41 = vpop.eup %10362 }
0x15cd   :  { %9795 = vmatmul.mubr.msk.bf16.vlgmr.msra.gmra.mrb[148].mxu1 %vm749_vm10, %v7440_v50  ;;  %v7434_v16 = vmul.f32 %v10363_v41, %v12623_v8 }
0x15ce   :  { %9805 = vmatpush3.bf16.msra.mxu1 %v7774_v12  ;;  %9806 = vmatprep.mubr.msk.bf16.mxu1 %vm10405_vm1, %v12972_v25  ;;  %vm8228_vm1 = vcmask 523264  }
0x15cf   :  { %v7442_v2 = vpack.c.bf16 %v7434_v16, %v7434_v16 }
0x15d5   :  { %9807 = vmatmul.mubr.msk.bf16.vlgmr.msra.gmra.mrb[152].mxu1 %vm749_vm10, %v7442_v2  ;;  %v12998_v2 = vld [vmem:[#allocation9_spill] sm:$0xff] }
0x160b   :  { %v7484_v63 = vpop.f32.mrb[132].mxu0 }
0x160c   :  { %v9766_v45 = vpop.f32.mrb[133].mxu0 }
0x160d   :  { %v7487_v48 = vpop.f32.mrb[134].mxu0 }
0x160e   :  { %v9767_v19 = vpop.f32.mrb[135].mxu0 }
0x160f   :  { %v12999_v19 = vld [vmem:[#allocation11_spill] sm:$0xff] }
0x1612   :  { %v7531_v49 = vpop.f32.mrb[140].mxu1 }
0x1613   :  { %v7827_v58 = vpack.c.bf16 %v7531_v49, %v7484_v63  ;;  %v7578_v56 = vpop.f32.mrb[136].mxu0  ;;  %v9772_v33 = vpop.f32.mrb[141].mxu1 }
0x1614   :  { %v9778_v3 = vpop.f32.mrb[137].mxu0  ;;  %v7534_v21 = vpop.f32.mrb[142].mxu1 }
0x1615   :  { %v7581_v37 = vpop.f32.mrb[138].mxu0  ;;  %v9773_v24 = vpop.f32.mrb[143].mxu1  ;;  %9814 = vmatprep.mubr.msk.bf16.mxu0 %vm173_vm0, %v7827_v58  ;;  %v13000_v58 = vld [vmem:[#allocation10_spill] sm:$0xff] }
0x1616   :  { %v9779_v25 = vpop.f32.mrb[139].mxu0  ;;  %v13001_v37 = vld [vmem:[#allocation12_spill] sm:$0xff] }
0x161a   :  { %v7625_v26 = vpop.f32.mrb[144].mxu1 }
0x161b   :  { %v7828_v60 = vpack.c.bf16 %v7625_v26, %v7578_v56  ;;  %v7672_v10 = vpop.f32.mrb[140].mxu0  ;;  %v9784_v18 = vpop.f32.mrb[145].mxu1 }
0x161c   :  { %v9790_v15 = vpop.f32.mrb[141].mxu0  ;;  %v7628_v36 = vpop.f32.mrb[146].mxu1 }
0x161d   :  { %v7675_v34 = vpop.f32.mrb[142].mxu0  ;;  %v9785_v44 = vpop.f32.mrb[147].mxu1  ;;  %9815 = vmatmul.mubr.msk.bf16.vlgmr.msra.gmra.mrb[180].mxu0 %vm173_vm0, %v7828_v60 }
0x161e   :  { %v9791_v4 = vpop.f32.mrb[143].mxu0 }
0x1623   :  { %v7766_v51 = vpop.f32.mrb[144].mxu0 }
0x1624   :  { %v9802_v1 = vpop.f32.mrb[145].mxu0 }
0x1625   :  { %v7769_v13 = vpop.f32.mrb[146].mxu0 }
0x1626   :  { %v9803_v8 = vpop.f32.mrb[147].mxu0 }
0x16a0   :  { %v7719_v5 = vpop.f32.mrb[148].mxu1 }
0x16a1   :  { %v7829_v17 = vpack.c.bf16 %v7719_v5, %v7672_v10  ;;  %v9796_v14 = vpop.f32.mrb[149].mxu1 }
0x16a2   :  { %v7722_v52 = vpop.f32.mrb[150].mxu1 }
0x16a3   :  { %v9797_v43 = vpop.f32.mrb[151].mxu1  ;;  %9818 = vmatprep.mubr.msk.bf16.mxu0 %vm173_vm0, %v7829_v17 }
0x16a8   :  { %v7813_v11 = vpop.f32.mrb[152].mxu1 }
0x16a9   :  { %v7830_v46 = vpack.c.bf16 %v7813_v11, %v7766_v51  ;;  %v9808_v28 = vpop.f32.mrb[153].mxu1 }
0x16aa   :  { %v7816_v27 = vpop.f32.mrb[154].mxu1  ;;  %v10078_v28 = vld [vmem:[%s12925_s16] sm:$0xff]  }
0x16ab   :  { %v9809_v42 = vpop.f32.mrb[155].mxu1  ;;  %9819 = vmatmul.mubr.msk.bf16.gmra.mrb[184].mxu0 %vm173_vm0, %v7830_v46  ;;  %9822 = vmatprep.subr.bf16.mxu1 %v10078_v28  ;;  %v10079_v27 = vld [vmem:[%s12925_s16 + $0x8] sm:$0xff]  }
0x16ac   :  { %9823 = vmatpush3.bf16.msra.mxu1 %v10078_v28 }
0x16ad   :  { %9824 = vmatprep.subr.bf16.mxu1 %v10079_v27 }
0x16b0   :  { %9825 = vmatpush3.bf16.msra.mxu1 %v10079_v27 }
0x16f0   :  { %v9816_v54 = vpop.f32.mrb[180].mxu0 }
0x16f1   :  { %v7900_v29 = vpop.f32.mrb[181].mxu0  ;;  %v7909_v38 = vadd.f32 %v9816_v54, %v8643_v62 }
0x16f2   :  { %v7901_v40 = vadd.f32 %v8643_v62, %v7900_v29  ;;  %v9817_v22 = vpop.f32.mrb[182].mxu0 }
0x16f3   :  { %v7912_v61 = vadd.f32 %v9817_v22, %v8643_v62  ;;  %v7903_v47 = vpop.f32.mrb[183].mxu0  ;;  %v7933_v20 = vadd.f32 %v7909_v38, %v12997_v55 }
0x16f4   :  { %v7931_v31 = vadd.f32 %v7901_v40, %v12994_v59  ;;  %v7904_v23 = vadd.f32 %v8643_v62, %v7903_v47 }
0x16f5   :  { %v7934_v32 = vadd.f32 %v7912_v61, %v12995_v6  ;;  %v7945_v39 = vsel %vm173_vm0, %v7933_v20, 0.0 }
0x16f6   :  { %v7932_v53 = vadd.f32 %v7904_v23, %v12996_v0  ;;  %v7939_v7 = vsel %vm173_vm0, %v7931_v31, 0.0 }
0x16f7   :  { %7940 = vadd.xlane.f32.xlu1 %v7939_v7  ;;  %v7948_v35 = vsel %vm173_vm0, %v7934_v32, 0.0 }
0x16f8   :  { %v7942_v30 = vsel %vm173_vm0, %v7932_v53, 0.0 }
0x16f9   :  { %7943 = vadd.xlane.f32.xlu0 %v7942_v30 }
0x16fb   :  { %7949 = vadd.xlane.f32.xlu1 %v7948_v35 }
0x16fd   :  { %7946 = vadd.xlane.f32.xlu0 %v7945_v39 }
0x177e   :  { %v9820_v9 = vpop.f32.mrb[184].mxu0 }
0x177f   :  { %v7916_v57 = vpop.f32.mrb[185].mxu0  ;;  %v7925_v50 = vadd.f32 %v9820_v9, %v8643_v62 }
0x1780   :  { %v7917_v41 = vadd.f32 %v8643_v62, %v7916_v57  ;;  %v9821_v12 = vpop.f32.mrb[186].mxu0 }
0x1781   :  { %v7919_v16 = vpop.f32.mrb[187].mxu0  ;;  %v7928_v45 = vadd.f32 %v9821_v12, %v8643_v62  ;;  %v7937_v49 = vadd.f32 %v7925_v50, %v12999_v19 }
0x1782   :  { %v7935_v63 = vadd.f32 %v7917_v41, %v12998_v2  ;;  %v7920_v48 = vadd.f32 %v8643_v62, %v7919_v16 }
0x1783   :  { %v7938_v24 = vadd.f32 %v7928_v45, %v13001_v37  ;;  %v7957_v15 = vsel %vm173_vm0, %v7937_v49, 0.0 }
0x1784   :  { %v7936_v56 = vadd.f32 %v7920_v48, %v13000_v58  ;;  %v7941_v33 = vpop.xlane.xlu1 %7940  ;;  %v7951_v3 = vsel %vm173_vm0, %v7935_v63, 0.0 }
0x1785   :  { %v7963_v21 = vmul.f32 0.03125, %v7941_v33  ;;  %7952 = vadd.xlane.f32.xlu0 %v7951_v3  ;;  %v7960_v51 = vsel %vm173_vm0, %v7938_v24, 0.0 }
0x1786   :  { %v7944_v25 = vpop.xlane.xlu0 %7943  ;;  %v7954_v26 = vsel %vm173_vm0, %v7936_v56, 0.0 }
0x1787   :  { %v12687_v60 = vsub.f32 %v7931_v31, %v7963_v21  ;;  %v7964_v10 = vmul.f32 0.03125, %v7944_v25  ;;  %7955 = vadd.xlane.f32.xlu1 %v7954_v26  ;;  %v8651_v21 = vld [vmem:[%s12927_s15] ss:$0 sm:$0xff] }
0x1788   :  { %v7950_v18 = vpop.xlane.xlu1 %7949 }
0x1789   :  { %v12690_v36 = vsub.f32 %v7932_v53, %v7964_v10  ;;  %v7966_v34 = vmul.f32 0.03125, %v7950_v18  ;;  %7958 = vadd.xlane.f32.xlu0 %v7957_v15  ;;  %v7979_v44 = vmul.f32 %v12687_v60, %v12687_v60 }
0x178a   :  { %v7947_v4 = vpop.xlane.xlu0 %7946 }
0x178b   :  { %v12695_v1 = vsub.f32 %v7934_v32, %v7966_v34  ;;  %v7965_v13 = vmul.f32 0.03125, %v7947_v4  ;;  %7961 = vadd.xlane.f32.xlu1 %v7960_v51  ;;  %v7987_v8 = vsel %vm173_vm0, %v7979_v44, 0.0  ;;  %v7980_v5 = vmul.f32 %v12690_v36, %v12690_v36 }
0x178d   :  { %v12700_v17 = vsub.f32 %v7933_v20, %v7965_v13  ;;  %7988 = vadd.xlane.f32.xlu0 %v7987_v8  ;;  %v7990_v14 = vsel %vm173_vm0, %v7980_v5, 0.0  ;;  %v7982_v52 = vmul.f32 %v12695_v1, %v12695_v1  ;;  %v10081_v13 = vld [vmem:[%s12928_s18 + $0x8] sm:$0xff]   ;;  %v10082_v8 = vld [vmem:[%s12928_s18 + $0x10] sm:$0xff]   ;;  %v10083_v5 = vld [vmem:[%s12928_s18 + $0x18] sm:$0xff]  }
0x178f   :  { %7991 = vadd.xlane.f32.xlu1 %v7990_v14  ;;  %v7981_v43 = vmul.f32 %v12700_v17, %v12700_v17  ;;  %v7996_v46 = vsel %vm173_vm0, %v7982_v52, 0.0 }
0x1791   :  { %v7993_v11 = vsel %vm173_vm0, %v7981_v43, 0.0 }
0x1792   :  { %7994 = vadd.xlane.f32.xlu0 %v7993_v11 }
0x1793   :  { %7997 = vadd.xlane.f32.xlu1 %v7996_v46 }
0x1812   :  { %v7953_v42 = vpop.xlane.xlu0 %7952 }
0x1813   :  { %v7967_v62 = vmul.f32 0.03125, %v7953_v42 }
0x1814   :  { %v7956_v54 = vpop.xlane.xlu1 %7955 }
0x1815   :  { %v12715_v29 = vsub.f32 %v7935_v63, %v7967_v62  ;;  %v7968_v40 = vmul.f32 0.03125, %v7956_v54 }
0x1816   :  { %v7959_v22 = vpop.xlane.xlu0 %7958 }
0x1817   :  { %v12717_v61 = vsub.f32 %v7936_v56, %v7968_v40  ;;  %v7969_v47 = vmul.f32 0.03125, %v7959_v22  ;;  %v7983_v38 = vmul.f32 %v12715_v29, %v12715_v29 }
0x1818   :  { %v7962_v59 = vpop.xlane.xlu1 %7961 }
0x1819   :  { %v12721_v31 = vsub.f32 %v7937_v49, %v7969_v47  ;;  %v7970_v23 = vmul.f32 0.03125, %v7962_v59  ;;  %v7999_v6 = vsel %vm173_vm0, %v7983_v38, 0.0  ;;  %v7984_v32 = vmul.f32 %v12717_v61, %v12717_v61  ;;  %v12738_v49 = vld [vmem:[%s12926_s14] ss:$0 sm:$0xff] }
0x181a   :  { %8000 = vadd.xlane.f32.xlu0 %v7999_v6  ;;  %v7989_v0 = vpop.xlane.xlu0 %7988 }
0x181b   :  { %v12726_v53 = vsub.f32 %v7938_v24, %v7970_v23  ;;  %v8011_v7 = vmul.f32 0.03125, %v7989_v0  ;;  %v8002_v55 = vsel %vm173_vm0, %v7984_v32, 0.0  ;;  %v7985_v20 = vmul.f32 %v12721_v31, %v12721_v31 }
0x181c   :  { %8003 = vadd.xlane.f32.xlu1 %v8002_v55  ;;  %v7992_v30 = vpop.xlane.xlu1 %7991 }
0x181d   :  { %v8019_v35 = vadd.f32 1e-05, %v8011_v7  ;;  %v8012_v39 = vmul.f32 0.03125, %v7992_v30  ;;  %v8005_v9 = vsel %vm173_vm0, %v7985_v20, 0.0  ;;  %v7986_v57 = vmul.f32 %v12726_v53, %v12726_v53 }
0x181e   :  { %8006 = vadd.xlane.f32.xlu0 %v8005_v9  ;;  %v8652_v9 = vld [vmem:[%s12929_s17] ss:$0 sm:$0xff] }
0x181f   :  { %10364 = vrsqrt.f32 %v8019_v35  ;;  %v8020_v50 = vadd.f32 1e-05, %v8012_v39  ;;  %v7995_v41 = vpop.xlane.xlu0 %7994  ;;  %v8008_v12 = vsel %vm173_vm0, %v7986_v57, 0.0 }
0x1820   :  { %v8013_v16 = vmul.f32 0.03125, %v7995_v41  ;;  %8009 = vadd.xlane.f32.xlu1 %v8008_v12  ;;  %v7998_v2 = vpop.xlane.xlu1 %7997 }
0x1821   :  { %10366 = vrsqrt.f32 %v8020_v50  ;;  %v8014_v63 = vmul.f32 0.03125, %v7998_v2 }
0x1822   :  { %v8021_v45 = vadd.f32 1e-05, %v8013_v16 }
0x1823   :  { %v8022_v48 = vadd.f32 1e-05, %v8014_v63 }
0x1824   :  { %10368 = vrsqrt.f32 %v8021_v45 }
0x1825   :  { %10370 = vrsqrt.f32 %v8022_v48 }
0x1829   :  { %v10365_v19 = vpop.eup %10364 }
0x182a   :  { %v8035_v58 = vmul.f32 %v10365_v19, %v12687_v60 }
0x182b   :  { %v10367_v56 = vpop.eup %10366 }
0x182c   :  { %v8036_v33 = vmul.f32 %v10367_v56, %v12690_v36  ;;  %v8050_v3 = vmul.f32 %v12738_v49, %v8035_v58 }
0x182e   :  { %v10369_v37 = vpop.eup %10368  ;;  %v8051_v24 = vmul.f32 %v12738_v49, %v8036_v33  ;;  %v12749_v18 = vadd.f32 %v8651_v21, %v8050_v3 }
0x182f   :  { %v10371_v25 = vpop.eup %10370  ;;  %v8037_v26 = vmul.f32 %v10369_v37, %v12700_v17 }
0x1830   :  { %v8038_v10 = vmul.f32 %v10371_v25, %v12695_v1  ;;  %v12751_v60 = vadd.f32 %v8651_v21, %v8051_v24  ;;  %v10080_v1 = vld [vmem:[%s12928_s18] sm:$0xff]  }
0x1831   :  { %v8052_v15 = vmul.f32 %v12738_v49, %v8037_v26  ;;  %9834 = vmatprep.subr.bf16.mxu0 %v10080_v1 }
0x1832   :  { %v8053_v36 = vmul.f32 %v12738_v49, %v8038_v10  ;;  %v8073_v34 = vpack.c.bf16 %v12751_v60, %v12749_v18  ;;  %9835 = vmatpush3.bf16.msra.mxu0 %v10080_v1 }
0x1833   :  { %v12757_v44 = vadd.f32 %v8651_v21, %v8052_v15  ;;  %9836 = vmatprep.subr.bf16.mxu0 %v10081_v13 }
0x1834   :  { %9826 = vmatprep.mubr.msk.bf16.mxu1 %vm173_vm0, %v8073_v34  ;;  %v12760_v4 = vadd.f32 %v8651_v21, %v8053_v36 }
0x1836   :  { %v8074_v51 = vpack.c.bf16 %v12760_v4, %v12757_v44  ;;  %9837 = vmatpush3.bf16.msra.mxu0 %v10081_v13 }
0x1837   :  { %9838 = vmatprep.subr.bf16.mxu0 %v10082_v8 }
0x1838   :  { %9827 = vmatmul.mubr.msk.bf16.vlgmr.msra.gmra.mrb[188].mxu1 %vm173_vm0, %v8074_v51 }
0x183a   :  { %9839 = vmatpush3.bf16.msra.mxu0 %v10082_v8 }
0x183b   :  { %9840 = vmatprep.subr.bf16.mxu0 %v10083_v5 }
0x183e   :  { %9841 = vmatpush3.bf16.msra.mxu0 %v10083_v5  ;;  %v8659_v5 = vld [vmem:[%s12930_s19] ss:$0 sm:$0xff] }
0x18a7   :  { %v8001_v17 = vpop.xlane.xlu0 %8000 }
0x18a8   :  { %v8015_v14 = vmul.f32 0.03125, %v8001_v17 }
0x18a9   :  { %v8004_v52 = vpop.xlane.xlu1 %8003 }
0x18aa   :  { %v8023_v43 = vadd.f32 1e-05, %v8015_v14  ;;  %v8016_v11 = vmul.f32 0.03125, %v8004_v52 }
0x18ab   :  { %v8007_v46 = vpop.xlane.xlu0 %8006 }
0x18ac   :  { %10372 = vrsqrt.f32 %v8023_v43  ;;  %v8024_v28 = vadd.f32 1e-05, %v8016_v11  ;;  %v8017_v27 = vmul.f32 0.03125, %v8007_v46 }
0x18ad   :  { %v8010_v42 = vpop.xlane.xlu1 %8009 }
0x18ae   :  { %10374 = vrsqrt.f32 %v8024_v28  ;;  %v8025_v62 = vadd.f32 1e-05, %v8017_v27  ;;  %v8018_v54 = vmul.f32 0.03125, %v8010_v42 }
0x18b0   :  { %10376 = vrsqrt.f32 %v8025_v62  ;;  %v8026_v40 = vadd.f32 1e-05, %v8018_v54 }
0x18b2   :  { %10378 = vrsqrt.f32 %v8026_v40 }
0x18b6   :  { %v10373_v22 = vpop.eup %10372 }
0x18b7   :  { %v8039_v47 = vmul.f32 %v10373_v22, %v12715_v29 }
0x18b8   :  { %v10375_v38 = vpop.eup %10374 }
0x18b9   :  { %v8040_v59 = vmul.f32 %v10375_v38, %v12717_v61  ;;  %v8054_v23 = vmul.f32 %v12738_v49, %v8039_v47 }
0x18ba   :  { %v10377_v6 = vpop.eup %10376 }
0x18bb   :  { %v8041_v32 = vmul.f32 %v10377_v6, %v12721_v31  ;;  %v8055_v0 = vmul.f32 %v12738_v49, %v8040_v59  ;;  %v12783_v20 = vadd.f32 %v8651_v21, %v8054_v23 }
0x18bc   :  { %v10379_v7 = vpop.eup %10378 }
0x18bd   :  { %v8042_v55 = vmul.f32 %v10379_v7, %v12726_v53  ;;  %v12785_v30 = vadd.f32 %v8651_v21, %v8055_v0  ;;  %v8056_v35 = vmul.f32 %v12738_v49, %v8041_v32 }
0x18bf   :  { %v8075_v29 = vpack.c.bf16 %v12785_v30, %v12783_v20  ;;  %v8057_v61 = vmul.f32 %v12738_v49, %v8042_v55  ;;  %v12792_v39 = vadd.f32 %v8651_v21, %v8056_v35 }
0x18c1   :  { %9830 = vmatprep.mubr.msk.bf16.mxu1 %vm173_vm0, %v8075_v29  ;;  %v12794_v31 = vadd.f32 %v8651_v21, %v8057_v61 }
0x18c3   :  { %v8076_v53 = vpack.c.bf16 %v12794_v31, %v12792_v39 }
0x18c5   :  { %9831 = vmatmul.mubr.msk.bf16.gmra.mrb[192].mxu1 %vm173_vm0, %v8076_v53 }
0x190b   :  { %v9828_v57 = vpop.f32.mrb[188].mxu1 }
0x190c   :  { %v8155_v50 = vadd.f32 %v9828_v57, %v8652_v9  ;;  %v8146_v41 = vpop.f32.mrb[189].mxu1 }
0x190d   :  { %v8147_v12 = vadd.f32 %v8652_v9, %v8146_v41  ;;  %v9829_v16 = vpop.f32.mrb[190].mxu1 }
0x190e   :  { %v8158_v2 = vadd.f32 %v9829_v16, %v8652_v9  ;;  %v8149_v63 = vpop.f32.mrb[191].mxu1  ;;  %v8179_v48 = vmax.f32 %v8155_v50, 0.0 }
0x190f   :  { %v8150_v45 = vadd.f32 %v8652_v9, %v8149_v63  ;;  %v8177_v49 = vmax.f32 %v8147_v12, 0.0 }
0x1910   :  { %v8180_v19 = vmax.f32 %v8158_v2, 0.0 }
0x1911   :  { %v8178_v58 = vmax.f32 %v8150_v45, 0.0 }
0x1912   :  { %v8186_v56 = vpack.c.bf16 %v8180_v19, %v8179_v48 }
0x1913   :  { %v8185_v33 = vpack.c.bf16 %v8178_v58, %v8177_v49 }
0x1915   :  { %9842 = vmatprep.mubr.msk.bf16.mxu0 %vm8228_vm1, %v8185_v33 }
0x1916   :  { %9843 = vmatmul.mubr.msk.bf16.vlgmr.msra.gmra.mrb[188].mxu0 %vm8228_vm1, %v8186_v56 }
0x1998   :  { %v9832_v3 = vpop.f32.mrb[192].mxu1 }
0x1999   :  { %v8171_v21 = vadd.f32 %v9832_v3, %v8652_v9  ;;  %v8162_v37 = vpop.f32.mrb[193].mxu1 }
0x199a   :  { %v8163_v24 = vadd.f32 %v8652_v9, %v8162_v37  ;;  %v9833_v25 = vpop.f32.mrb[194].mxu1 }
0x199b   :  { %v8174_v26 = vadd.f32 %v9833_v25, %v8652_v9  ;;  %v8165_v10 = vpop.f32.mrb[195].mxu1  ;;  %v8183_v36 = vmax.f32 %v8171_v21, 0.0 }
0x199c   :  { %v8166_v15 = vadd.f32 %v8652_v9, %v8165_v10  ;;  %v8181_v51 = vmax.f32 %v8163_v24, 0.0 }
0x199d   :  { %v8184_v34 = vmax.f32 %v8174_v26, 0.0 }
0x199e   :  { %v8182_v1 = vmax.f32 %v8166_v15, 0.0 }
0x199f   :  { %v8188_v13 = vpack.c.bf16 %v8184_v34, %v8183_v36 }
0x19a0   :  { %v8187_v8 = vpack.c.bf16 %v8182_v1, %v8181_v51 }
0x19a2   :  { %9846 = vmatprep.mubr.msk.bf16.mxu0 %vm8228_vm1, %v8187_v8 }
0x19a3   :  { %9847 = vmatmul.mubr.msk.bf16.gmra.mrb[192].mxu0 %vm8228_vm1, %v8188_v13 }
0x19e9   :  { %v9844_v17 = vpop.f32.mrb[188].mxu0 }
0x19ea   :  { %v8284_v14 = vadd.f32 %v9844_v17, %v8659_v5  ;;  %v8275_v52 = vpop.f32.mrb[189].mxu0 }
0x19eb   :  { %v8276_v43 = vadd.f32 %v8659_v5, %v8275_v52  ;;  %v9845_v11 = vpop.f32.mrb[190].mxu0 }
0x19ec   :  { %v8308_v46 = vadd.f32 %v8284_v14, %v12757_v44  ;;  %v8287_v28 = vadd.f32 %v9845_v11, %v8659_v5  ;;  %v8278_v27 = vpop.f32.mrb[191].mxu0 }
0x19ed   :  { %v8279_v42 = vadd.f32 %v8659_v5, %v8278_v27  ;;  %v8306_v62 = vadd.f32 %v8276_v43, %v12749_v18 }
0x19ee   :  { %v8309_v54 = vadd.f32 %v8287_v28, %v12760_v4  ;;  %v8320_v40 = vsel %vm173_vm0, %v8308_v46, 0.0 }
0x19ef   :  { %8321 = vadd.xlane.f32.xlu0 %v8320_v40  ;;  %v8307_v22 = vadd.f32 %v8279_v42, %v12751_v60  ;;  %v8314_v38 = vsel %vm173_vm0, %v8306_v62, 0.0 }
0x19f0   :  { %v8323_v47 = vsel %vm173_vm0, %v8309_v54, 0.0 }
0x19f1   :  { %8324 = vadd.xlane.f32.xlu1 %v8323_v47  ;;  %v8317_v44 = vsel %vm173_vm0, %v8307_v22, 0.0 }
0x19f3   :  { %8315 = vadd.xlane.f32.xlu0 %v8314_v38 }
0x19f5   :  { %8318 = vadd.xlane.f32.xlu1 %v8317_v44 }
0x1a76   :  { %v9848_v59 = vpop.f32.mrb[192].mxu0 }
0x1a77   :  { %v8291_v23 = vpop.f32.mrb[193].mxu0  ;;  %v8300_v6 = vadd.f32 %v9848_v59, %v8659_v5 }
0x1a78   :  { %v8292_v18 = vadd.f32 %v8659_v5, %v8291_v23  ;;  %v9849_v32 = vpop.f32.mrb[194].mxu0 }
0x1a79   :  { %v8294_v4 = vpop.f32.mrb[195].mxu0  ;;  %v8303_v7 = vadd.f32 %v9849_v32, %v8659_v5  ;;  %v8312_v60 = vadd.f32 %v8300_v6, %v12792_v39 }
0x1a7a   :  { %v8310_v0 = vadd.f32 %v8292_v18, %v12783_v20  ;;  %v8295_v55 = vadd.f32 %v8659_v5, %v8294_v4  ;;  %v8668_v4 = vld [vmem:[%s12931_s20] ss:$0 sm:$0xff] }
0x1a7b   :  { %v8313_v9 = vadd.f32 %v8303_v7, %v12794_v31  ;;  %v8332_v16 = vsel %vm173_vm0, %v8312_v60, 0.0 }
0x1a7c   :  { %v8311_v35 = vadd.f32 %v8295_v55, %v12785_v30  ;;  %v8322_v29 = vpop.xlane.xlu0 %8321  ;;  %v8326_v61 = vsel %vm173_vm0, %v8310_v0, 0.0  ;;  %v8669_v55 = vld [vmem:[%s12932_s21] ss:$0 sm:$0xff] }
0x1a7d   :  { %v8340_v53 = vmul.f32 0.03125, %v8322_v29  ;;  %8327 = vadd.xlane.f32.xlu0 %v8326_v61  ;;  %v8335_v31 = vsel %vm173_vm0, %v8313_v9, 0.0 }
0x1a7e   :  { %v8325_v57 = vpop.xlane.xlu1 %8324  ;;  %v8329_v50 = vsel %vm173_vm0, %v8311_v35, 0.0 }
0x1a7f   :  { %v12823_v41 = vsub.f32 %v8308_v46, %v8340_v53  ;;  %v8341_v12 = vmul.f32 0.03125, %v8325_v57  ;;  %8330 = vadd.xlane.f32.xlu1 %v8329_v50 }
0x1a80   :  { %v8316_v20 = vpop.xlane.xlu0 %8315 }
0x1a81   :  { %v12826_v39 = vsub.f32 %v8309_v54, %v8341_v12  ;;  %v8338_v30 = vmul.f32 0.03125, %v8316_v20  ;;  %8333 = vadd.xlane.f32.xlu0 %v8332_v16  ;;  %v8356_v2 = vmul.f32 %v12823_v41, %v12823_v41 }
0x1a82   :  { %v8319_v63 = vpop.xlane.xlu1 %8318 }
0x1a83   :  { %v12831_v45 = vsub.f32 %v8306_v62, %v8338_v30  ;;  %v8339_v48 = vmul.f32 0.03125, %v8319_v63  ;;  %8336 = vadd.xlane.f32.xlu1 %v8335_v31  ;;  %v8368_v19 = vsel %vm173_vm0, %v8356_v2, 0.0  ;;  %v8357_v49 = vmul.f32 %v12826_v39, %v12826_v39 }
0x1a85   :  { %v12836_v58 = vsub.f32 %v8307_v22, %v8339_v48  ;;  %8369 = vadd.xlane.f32.xlu0 %v8368_v19  ;;  %v8371_v56 = vsel %vm173_vm0, %v8357_v49, 0.0  ;;  %v8354_v33 = vmul.f32 %v12831_v45, %v12831_v45 }
0x1a87   :  { %8372 = vadd.xlane.f32.xlu1 %v8371_v56  ;;  %v8362_v3 = vsel %vm173_vm0, %v8354_v33, 0.0  ;;  %v8355_v21 = vmul.f32 %v12836_v58, %v12836_v58 }
0x1a89   :  { %8363 = vadd.xlane.f32.xlu0 %v8362_v3  ;;  %v8365_v37 = vsel %vm173_vm0, %v8355_v21, 0.0 }
0x1a8b   :  { %8366 = vadd.xlane.f32.xlu1 %v8365_v37 }
0x1b0a   :  { %v8328_v24 = vpop.xlane.xlu0 %8327 }
0x1b0b   :  { %v8342_v25 = vmul.f32 0.03125, %v8328_v24 }
0x1b0c   :  { %v8331_v26 = vpop.xlane.xlu1 %8330 }
0x1b0d   :  { %v12845_v10 = vsub.f32 %v8310_v0, %v8342_v25  ;;  %v8343_v15 = vmul.f32 0.03125, %v8331_v26 }
0x1b0e   :  { %v8334_v36 = vpop.xlane.xlu0 %8333 }
0x1b0f   :  { %v12847_v34 = vsub.f32 %v8311_v35, %v8343_v15  ;;  %v8344_v51 = vmul.f32 0.03125, %v8334_v36  ;;  %v8358_v1 = vmul.f32 %v12845_v10, %v12845_v10 }
0x1b10   :  { %v8337_v13 = vpop.xlane.xlu1 %8336 }
0x1b11   :  { %v12851_v8 = vsub.f32 %v8312_v60, %v8344_v51  ;;  %v8345_v5 = vmul.f32 0.03125, %v8337_v13  ;;  %v8374_v17 = vsel %vm173_vm0, %v8358_v1, 0.0  ;;  %v8359_v14 = vmul.f32 %v12847_v34, %v12847_v34 }
0x1b12   :  { %8375 = vadd.xlane.f32.xlu0 %v8374_v17  ;;  %v8370_v52 = vpop.xlane.xlu0 %8369 }
0x1b13   :  { %v12856_v43 = vsub.f32 %v8313_v9, %v8345_v5  ;;  %v8388_v11 = vmul.f32 0.03125, %v8370_v52  ;;  %v8377_v46 = vsel %vm173_vm0, %v8359_v14, 0.0  ;;  %v8360_v28 = vmul.f32 %v12851_v8, %v12851_v8 }
0x1b14   :  { %8378 = vadd.xlane.f32.xlu1 %v8377_v46  ;;  %v8373_v27 = vpop.xlane.xlu1 %8372 }
0x1b15   :  { %v8396_v42 = vadd.f32 1e-05, %v8388_v11  ;;  %v8389_v62 = vmul.f32 0.03125, %v8373_v27  ;;  %v8380_v54 = vsel %vm173_vm0, %v8360_v28, 0.0  ;;  %v8361_v40 = vmul.f32 %v12856_v43, %v12856_v43 }
0x1b16   :  { %8381 = vadd.xlane.f32.xlu0 %v8380_v54  ;;  %v8364_v22 = vpop.xlane.xlu0 %8363 }
0x1b17   :  { %10380 = vrsqrt.f32 %v8396_v42  ;;  %v8397_v47 = vadd.f32 1e-05, %v8389_v62  ;;  %v8386_v38 = vmul.f32 0.03125, %v8364_v22  ;;  %v8383_v44 = vsel %vm173_vm0, %v8361_v40, 0.0 }
0x1b18   :  { %8384 = vadd.xlane.f32.xlu1 %v8383_v44  ;;  %v8367_v59 = vpop.xlane.xlu1 %8366  ;;  %vm8448_vm0 = vcmask 261124  }
0x1b19   :  { %10382 = vrsqrt.f32 %v8397_v47  ;;  %v8394_v23 = vadd.f32 1e-05, %v8386_v38  ;;  %v8387_v6 = vmul.f32 0.03125, %v8367_v59 }
0x1b1b   :  { %10384 = vrsqrt.f32 %v8394_v23  ;;  %v8395_v18 = vadd.f32 1e-05, %v8387_v6 }
0x1b1d   :  { %10386 = vrsqrt.f32 %v8395_v18 }
0x1b21   :  { %v10381_v32 = vpop.eup %10380 }
0x1b22   :  { %v8412_v0 = vmul.f32 %v10381_v32, %v12823_v41 }
0x1b23   :  { %v10383_v7 = vpop.eup %10382 }
0x1b24   :  { %v8427_v60 = vmul.f32 %v8668_v4, %v8412_v0  ;;  %v8413_v35 = vmul.f32 %v10383_v7, %v12826_v39 }
0x1b25   :  { %v10385_v29 = vpop.eup %10384 }
0x1b26   :  { %v8442_v61 = vadd.f32 %v8669_v55, %v8427_v60  ;;  %v8428_v53 = vmul.f32 %v8668_v4, %v8413_v35  ;;  %v8410_v9 = vmul.f32 %v10385_v29, %v12831_v45 }
0x1b27   :  { %v10387_v57 = vpop.eup %10386 }
0x1b28   :  { %8451 = vst.msk [vmem:[%s12933_s22 + $0x4] sm:$0xf0] %vm8448_vm0, %v8442_v61  ;;  %v8443_v50 = vadd.f32 %v8669_v55, %v8428_v53  ;;  %v8425_v41 = vmul.f32 %v8668_v4, %v8410_v9  ;;  %v8411_v12 = vmul.f32 %v10387_v57, %v12836_v58 }
0x1b2a   :  { %8452 = vst.msk [vmem:[%s12933_s22 + $0x8] sm:$0xf0] %vm8448_vm0, %v8443_v50  ;;  %v8440_v20 = vadd.f32 %v8669_v55, %v8425_v41  ;;  %v8426_v16 = vmul.f32 %v8668_v4, %v8411_v12 }
0x1b2c   :  { %8449 = vst.msk [vmem:[%s12933_s22 - $0x4] sm:$0xf0] %vm8448_vm0, %v8440_v20  ;;  %v8441_v39 = vadd.f32 %v8669_v55, %v8426_v16 }
0x1b2e   :  { %8450 = vst.msk [vmem:[%s12933_s22] sm:$0xf0] %vm8448_vm0, %v8441_v39 }
0x1b9f   :  { %v8376_v30 = vpop.xlane.xlu0 %8375 }
0x1ba0   :  { %v8390_v2 = vmul.f32 0.03125, %v8376_v30 }
0x1ba1   :  { %v8379_v63 = vpop.xlane.xlu1 %8378 }
0x1ba2   :  { %v8398_v31 = vadd.f32 1e-05, %v8390_v2  ;;  %v8391_v45 = vmul.f32 0.03125, %v8379_v63 }
0x1ba3   :  { %v8382_v48 = vpop.xlane.xlu0 %8381 }
0x1ba4   :  { %10388 = vrsqrt.f32 %v8398_v31  ;;  %v8399_v19 = vadd.f32 1e-05, %v8391_v45  ;;  %v8392_v49 = vmul.f32 0.03125, %v8382_v48 }
0x1ba5   :  { %v8385_v58 = vpop.xlane.xlu1 %8384 }
0x1ba6   :  { %10390 = vrsqrt.f32 %v8399_v19  ;;  %v8400_v56 = vadd.f32 1e-05, %v8392_v49  ;;  %v8393_v33 = vmul.f32 0.03125, %v8385_v58 }
0x1ba8   :  { %10392 = vrsqrt.f32 %v8400_v56  ;;  %v8401_v3 = vadd.f32 1e-05, %v8393_v33 }
0x1baa   :  { %10394 = vrsqrt.f32 %v8401_v3 }
0x1bae   :  { %v10389_v21 = vpop.eup %10388 }
0x1baf   :  { %v8414_v37 = vmul.f32 %v10389_v21, %v12845_v10 }
0x1bb0   :  { %v10391_v24 = vpop.eup %10390 }
0x1bb1   :  { %v8429_v25 = vmul.f32 %v8668_v4, %v8414_v37  ;;  %v8415_v26 = vmul.f32 %v10391_v24, %v12847_v34 }
0x1bb2   :  { %v10393_v15 = vpop.eup %10392 }
0x1bb3   :  { %v8444_v36 = vadd.f32 %v8669_v55, %v8429_v25  ;;  %v8430_v51 = vmul.f32 %v8668_v4, %v8415_v26  ;;  %v8416_v1 = vmul.f32 %v10393_v15, %v12851_v8 }
0x1bb4   :  { %v10395_v13 = vpop.eup %10394 }
0x1bb5   :  { %8453 = vst.msk [vmem:[%s12933_s22 + $0xc] sm:$0xf0] %vm8448_vm0, %v8444_v36  ;;  %v8445_v5 = vadd.f32 %v8669_v55, %v8430_v51  ;;  %v8431_v17 = vmul.f32 %v8668_v4, %v8416_v1  ;;  %v8417_v14 = vmul.f32 %v10395_v13, %v12856_v43 }
0x1bb7   :  { %8454 = vst.msk [vmem:[%s12933_s22 + $0x10] sm:$0xf0] %vm8448_vm0, %v8445_v5  ;;  %v8446_v10 = vadd.f32 %v8669_v55, %v8431_v17  ;;  %v8432_v34 = vmul.f32 %v8668_v4, %v8417_v14 }
0x1bb9   :  { %8455 = vst.msk [vmem:[%s12933_s22 + $0x14] sm:$0xf0] %vm8448_vm0, %v8446_v10  ;;  %v8447_v8 = vadd.f32 %v8669_v55, %v8432_v34 }
0x1bbb   :  { %8456 = vst.msk [vmem:[%s12933_s22 + $0x18] sm:$0xf0] %vm8448_vm0, %v8447_v8 }

</bundles_post_ra>
